<compile_context>
chip_gen: v7x
topology: tpu7x:2x2x1
jax: 0.10.0
libtpu: 0.0.40
codegen_flags: <defaults>
</compile_context>

<pallas_src>
import jax
import jax.numpy as jnp
from jax.experimental import pallas as pl
from jax.experimental.pallas import tpu as pltpu


# ---------------------------------------------------------------------------
# small static helpers (run at trace time on static shapes)
# ---------------------------------------------------------------------------

# TODO(synk): in production size the T-chunk from a VMEM budget; kept tiny here
#             so the demo (T=8) actually exercises the multi-chunk streaming path.
_SCAN_T_CHUNK = 4


def _largest_divisor_leq(dim, cap):
    for d in range(min(dim, cap), 0, -1):
        if dim % d == 0:
            return d
    return dim


def _aligned_tile(dim, cap, align):
    """Largest multiple-of-`align` divisor of `dim` <= cap; full dim otherwise."""
    if dim <= cap:
        return dim
    t = (cap // align) * align
    while t >= align:
        if dim % t == 0:
            return t
        t -= align
    return dim


def _batch_tile(B):
    # Split batch across TensorCores (v7x megacore) only when each tile keeps
    # >= 8 sublanes; otherwise keep the whole batch in one tile.
    if B % 16 == 0:
        return B // 2
    return B


# ---------------------------------------------------------------------------
# Pallas kernels
# ---------------------------------------------------------------------------

def _matmul_bias_kernel(x_ref, w_ref, b_ref, o_ref, acc_ref):
    """Tiled o = x @ w + b with f32 accumulator; grid = (M, N, K) tiles."""
    k = pl.program_id(2)

    @pl.when(k == 0)
    def _():
        acc_ref[...] = jnp.zeros_like(acc_ref)

    acc_ref[...] += jnp.dot(x_ref[...].astype(jnp.bfloat16),
                            w_ref[...].astype(jnp.bfloat16),
                            preferred_element_type=jnp.float32)

    @pl.when(k == pl.num_programs(2) - 1)
    def _():
        o_ref[...] = acc_ref[...] + b_ref[...]


def _proj_kernel(x_ref, w_ref, add_ref, o_ref):
    """Input projection to gate-major preactivations.

    x: (tt, B, E) embeddings; w: (E, 3H) fused [r|z|n]; add: (1,3H) or (B,3H)
    (bias with b_hh[r|z] folded in; decoder additionally has the context term).
    Output block: (tt, 3, B, H) gate-major, f32.
    Runs on a "parallel" T grid, off the serial recurrence path.
    """
    tt, B, _ = x_ref.shape
    H = o_ref.shape[-1]
    w = w_ref[...].astype(jnp.bfloat16)
    add = jnp.broadcast_to(add_ref[...], (B, 3 * H))          # hoisted broadcast
    for t in range(tt):                                       # static unroll
        y = jnp.dot(x_ref[t].astype(jnp.bfloat16), w,
                    preferred_element_type=jnp.float32) + add  # (B, 3H)
        o_ref[t, 0] = y[:, :H]
        o_ref[t, 1] = y[:, H:2 * H]
        o_ref[t, 2] = y[:, 2 * H:]


def _gru_encoder_scan_kernel(xp_ref, whh_ref, bhn_ref, hfin_ref, h_scr):
    """Encoder recurrence over one (batch-tile, T-chunk) grid cell.

    xp_ref: (tc, 3, bt, H) gate-major preactivations (biases already folded).
    whh_ref: (3, H, H) gate-major recurrent weights. Hidden state carries across
    T-chunks in the h_scr VMEM scratch; only the final hidden is emitted.
    """
    tc = xp_ref.shape[0]
    bt, H = h_scr.shape

    @pl.when(pl.program_id(1) == 0)
    def _():
        h_scr[...] = jnp.zeros_like(h_scr)

    whh = whh_ref[...].astype(jnp.bfloat16)                    # loop-invariant
    wr, wz, wn = whh[0], whh[1], whh[2]
    bhn = jnp.broadcast_to(bhn_ref[...], (bt, H))              # hoisted broadcast

    def step(i, h):
        xp = xp_ref[i]                                         # (3, bt, H)
        hb = h.astype(jnp.bfloat16)
        r = jax.nn.sigmoid(xp[0] + jnp.dot(hb, wr, preferred_element_type=jnp.float32))
        z = jax.nn.sigmoid(xp[1] + jnp.dot(hb, wz, preferred_element_type=jnp.float32))
        n = jnp.tanh(xp[2] + r * (jnp.dot(hb, wn, preferred_element_type=jnp.float32) + bhn))
        return (1.0 - z) * n + z * h

    h = jax.lax.fori_loop(0, tc, step, h_scr[...], unroll=min(tc, 8))
    h_scr[...] = h
    hfin_ref[...] = h


def _gru_decoder_scan_kernel(xp_ref, h0_ref, whh_ref, bhn_ref, hseq_ref, h_scr):
    """Decoder recurrence (init state = encoder final hidden).

    Context (enc_h @ W_ih_ctx + biases) is already folded into xp_ref by the
    projection kernel. Emits all hidden states for the vocab head, streamed
    per T-chunk through the output BlockSpec.
    """
    tc = xp_ref.shape[0]
    bt, H = h_scr.shape

    @pl.when(pl.program_id(1) == 0)
    def _():
        h_scr[...] = h0_ref[...]

    whh = whh_ref[...].astype(jnp.bfloat16)
    wr, wz, wn = whh[0], whh[1], whh[2]
    bhn = jnp.broadcast_to(bhn_ref[...], (bt, H))

    def step(i, h):
        xp = xp_ref[i]                                         # (3, bt, H)
        hb = h.astype(jnp.bfloat16)
        r = jax.nn.sigmoid(xp[0] + jnp.dot(hb, wr, preferred_element_type=jnp.float32))
        z = jax.nn.sigmoid(xp[1] + jnp.dot(hb, wz, preferred_element_type=jnp.float32))
        n = jnp.tanh(xp[2] + r * (jnp.dot(hb, wn, preferred_element_type=jnp.float32) + bhn))
        h_new = (1.0 - z) * n + z * h
        hseq_ref[i] = h_new
        return h_new

    h = jax.lax.fori_loop(0, tc, step, h_scr[...], unroll=min(tc, 8))
    h_scr[...] = h


def _head_kernel(h_ref, w_ref, b_ref, o_ref):
    """Vocab head: (tt, B, H) hidden block -> (B, tt, tv) logits block.

    The (T,B)->(B,T) reorder happens through the out_specs index_map + the
    per-t stores below, so no extra HBM transpose of the largest tensor.
    """
    tt, B, _ = h_ref.shape
    tv = o_ref.shape[-1]
    w = w_ref[...].astype(jnp.bfloat16)
    b = jnp.broadcast_to(b_ref[...], (B, tv))
    for t in range(tt):                                        # static unroll
        o_ref[:, t, :] = jnp.dot(h_ref[t].astype(jnp.bfloat16), w,
                                 preferred_element_type=jnp.float32) + b


# ---------------------------------------------------------------------------
# pallas_call wrappers
# ---------------------------------------------------------------------------

def matmul_bias(x, w, b):
    """Tiled (M,K) @ (K,N) + (1,N) with f32 accumulation."""
    M, K = x.shape
    N = w.shape[1]
    tm = _aligned_tile(M, 256, 8)
    tn = _aligned_tile(N, 512, 128)
    tk = _aligned_tile(K, 512, 128)
    return pl.pallas_call(
        _matmul_bias_kernel,
        out_shape=jax.ShapeDtypeStruct((M, N), jnp.float32),
        grid_spec=pltpu.PrefetchScalarGridSpec(
            num_scalar_prefetch=0,
            grid=(M // tm, N // tn, K // tk),
            in_specs=[pl.BlockSpec((tm, tk), lambda i, j, k: (i, k)),
                      pl.BlockSpec((tk, tn), lambda i, j, k: (k, j)),
                      pl.BlockSpec((1, tn), lambda i, j, k: (0, j))],
            out_specs=pl.BlockSpec((tm, tn), lambda i, j, k: (i, j)),
            scratch_shapes=[pltpu.VMEM((tm, tn), jnp.float32)]),
        compiler_params=pltpu.CompilerParams(
            dimension_semantics=("parallel", "parallel", "arbitrary")),
    )(x, w, b)


def input_proj_gate_major(x_tm, w, add):
    """(T,B,E) embeddings -> (T,3,B,H) gate-major preactivations (x@W + add)."""
    T, B, E = x_tm.shape
    H3 = w.shape[1]
    H = H3 // 3
    tt = _largest_divisor_leq(T, 8)   # TODO(synk): size from a VMEM budget at scale
    return pl.pallas_call(
        _proj_kernel,
        out_shape=jax.ShapeDtypeStruct((T, 3, B, H), jnp.float32),
        grid=(T // tt,),
        in_specs=[pl.BlockSpec((tt, B, E), lambda i: (i, 0, 0)),
                  pl.BlockSpec((E, H3), lambda i: (0, 0)),
                  pl.BlockSpec(add.shape, lambda i: (0, 0))],
        out_specs=pl.BlockSpec((tt, 3, B, H), lambda i: (i, 0, 0, 0)),
        compiler_params=pltpu.CompilerParams(dimension_semantics=("parallel",)),
    )(x_tm, w, add)


def gru_encoder(xp, whh_g, bhn):
    """xp: (T,3,B,H) gate-major preactivations -> final hidden (B, H)."""
    T, _, B, H = xp.shape
    bt = _batch_tile(B)
    tc = _largest_divisor_leq(T, _SCAN_T_CHUNK)
    return pl.pallas_call(
        _gru_encoder_scan_kernel,
        out_shape=jax.ShapeDtypeStruct((B, H), jnp.float32),
        grid_spec=pltpu.PrefetchScalarGridSpec(
            num_scalar_prefetch=0,
            grid=(B // bt, T // tc),
            in_specs=[pl.BlockSpec((tc, 3, bt, H), lambda bi, c: (c, 0, bi, 0)),
                      pl.BlockSpec((3, H, H), lambda bi, c: (0, 0, 0)),
                      pl.BlockSpec((1, H), lambda bi, c: (0, 0))],
            out_specs=pl.BlockSpec((bt, H), lambda bi, c: (bi, 0)),
            scratch_shapes=[pltpu.VMEM((bt, H), jnp.float32)]),
        compiler_params=pltpu.CompilerParams(
            dimension_semantics=("parallel", "arbitrary")),
    )(xp, whh_g, bhn)


def gru_decoder(xp, h0, whh_g, bhn):
    """xp: (T,3,B,H) (ctx+biases folded in), h0: (B,H) -> hidden seq (T,B,H)."""
    T, _, B, H = xp.shape
    bt = _batch_tile(B)
    tc = _largest_divisor_leq(T, _SCAN_T_CHUNK)
    return pl.pallas_call(
        _gru_decoder_scan_kernel,
        out_shape=jax.ShapeDtypeStruct((T, B, H), jnp.float32),
        grid_spec=pltpu.PrefetchScalarGridSpec(
            num_scalar_prefetch=0,
            grid=(B // bt, T // tc),
            in_specs=[pl.BlockSpec((tc, 3, bt, H), lambda bi, c: (c, 0, bi, 0)),
                      pl.BlockSpec((bt, H), lambda bi, c: (bi, 0)),
                      pl.BlockSpec((3, H, H), lambda bi, c: (0, 0, 0)),
                      pl.BlockSpec((1, H), lambda bi, c: (0, 0))],
            out_specs=pl.BlockSpec((tc, bt, H), lambda bi, c: (c, bi, 0)),
            scratch_shapes=[pltpu.VMEM((bt, H), jnp.float32)]),
        compiler_params=pltpu.CompilerParams(
            dimension_semantics=("parallel", "arbitrary")),
    )(xp, h0, whh_g, bhn)


def vocab_head(hseq, w, b):
    """(T,B,H) hidden seq -> logits written directly in (B,T,V) layout."""
    T, B, H = hseq.shape
    V = w.shape[1]
    tt = _aligned_tile(T, 16, 8)
    tv = _aligned_tile(V, 512, 128)
    return pl.pallas_call(
        _head_kernel,
        out_shape=jax.ShapeDtypeStruct((B, T, V), jnp.float32),
        grid=(T // tt, V // tv),
        in_specs=[pl.BlockSpec((tt, B, H), lambda ti, vi: (ti, 0, 0)),
                  pl.BlockSpec((H, tv), lambda ti, vi: (0, vi)),
                  pl.BlockSpec((1, tv), lambda ti, vi: (0, vi))],
        out_specs=pl.BlockSpec((B, tt, tv), lambda ti, vi: (0, ti, vi)),
        compiler_params=pltpu.CompilerParams(
            dimension_semantics=("parallel", "parallel")),
    )(hseq, w, b)


# ---------------------------------------------------------------------------
# EncoderDecoder forward (embedding gather + tiny weight re-layouts in JAX;
# all matmuls, recurrences and the head in Pallas)
# ---------------------------------------------------------------------------

def _fold_rz_bias(bih, bhh, H):
    """b_ih + [b_hh_r | b_hh_z | 0]: r/z hidden biases folded into xp."""
    return jnp.concatenate([bih[:, :2 * H] + bhh[:, :2 * H], bih[:, 2 * H:]], axis=1)


def _gate_major(whh, H):
    """(H, 3H) fused -> (3, H, H) gate-major stack [r, z, n]."""
    return jnp.stack([whh[:, :H], whh[:, H:2 * H], whh[:, 2 * H:]], axis=0)


@jax.jit
def encoder_decoder_forward(enc_X, dec_X, params):
    H = params["enc_whh"].shape[0]

    # --- encoder: Embedding -> GRU (only the final hidden is needed) ---
    enc_emb = jnp.take(params["enc_emb"], enc_X.T, axis=0)           # (T, B, E)
    b_enc = _fold_rz_bias(params["enc_bih"], params["enc_bhh"], H)   # (1, 3H)
    xp_enc = input_proj_gate_major(enc_emb, params["enc_wih"], b_enc)
    enc_h = gru_encoder(xp_enc, _gate_major(params["enc_whh"], H),
                        params["enc_bhh"][:, 2 * H:])                # (B, H)

    # --- decoder.init_state = encoder final hidden; context = same hidden ---
    dec_emb = jnp.take(params["dec_emb"], dec_X.T, axis=0)           # (T, B, E)
    b_dec = _fold_rz_bias(params["dec_bih"], params["dec_bhh"], H)   # (1, 3H)
    ctx = matmul_bias(enc_h, params["dec_wih_c"], b_dec)             # (B, 3H) ctx+biases
    xp_dec = input_proj_gate_major(dec_emb, params["dec_wih_x"], ctx)
    hseq = gru_decoder(xp_dec, enc_h, _gate_major(params["dec_whh"], H),
                       params["dec_bhh"][:, 2 * H:])                 # (T, B, H)

    # --- dense head: logits written directly in (B, T, V) layout ---
    return vocab_head(hseq, params["out_w"], params["out_b"])        # (B, T, V)


# ---------------------------------------------------------------------------
# Pure-JAX f32 reference (mirrors PyTorch nn.GRU semantics) for validation
# ---------------------------------------------------------------------------

def _gru_ref(x_tm, h0, wih, bih, whh, bhh):
    H = h0.shape[-1]
    wr, wz, wn = wih[:, :H], wih[:, H:2 * H], wih[:, 2 * H:]
    ur, uz, un = whh[:, :H], whh[:, H:2 * H], whh[:, 2 * H:]
    br, bz, bn = bih[0, :H], bih[0, H:2 * H], bih[0, 2 * H:]
    vr, vz, vn = bhh[0, :H], bhh[0, H:2 * H], bhh[0, 2 * H:]

    def step(h, x):
        r = jax.nn.sigmoid(x @ wr + br + h @ ur + vr)
        z = jax.nn.sigmoid(x @ wz + bz + h @ uz + vz)
        n = jnp.tanh(x @ wn + bn + r * (h @ un + vn))
        h_new = (1.0 - z) * n + z * h
        return h_new, h_new

    h_fin, outs = jax.lax.scan(step, h0, x_tm)
    return outs, h_fin


def reference_forward(enc_X, dec_X, params):
    B = enc_X.shape[0]
    H = params["enc_whh"].shape[0]
    enc_emb = jnp.take(params["enc_emb"], enc_X.T, axis=0)
    _, enc_h = _gru_ref(enc_emb, jnp.zeros((B, H), jnp.float32),
                        params["enc_wih"], params["enc_bih"],
                        params["enc_whh"], params["enc_bhh"])
    dec_emb = jnp.take(params["dec_emb"], dec_X.T, axis=0)
    T = dec_X.shape[1]
    ctx = jnp.broadcast_to(enc_h[None], (T, B, H))
    dec_in = jnp.concatenate([dec_emb, ctx], axis=-1)
    wih_full = jnp.concatenate([params["dec_wih_x"], params["dec_wih_c"]], 0)
    outs, _ = _gru_ref(dec_in, enc_h, wih_full, params["dec_bih"],
                       params["dec_whh"], params["dec_bhh"])
    logits = outs @ params["out_w"] + params["out_b"][0]
    return jnp.transpose(logits, (1, 0, 2))


# ---------------------------------------------------------------------------
# Deterministic parameter construction
# ---------------------------------------------------------------------------

def make_params(key, vocab, embed, hidden):
    ks = jax.random.split(key, 13)
    s = 1.0 / jnp.sqrt(hidden)
    u = lambda k, shape: jax.random.uniform(k, shape, jnp.float32, -s, s)
    return {
        "enc_emb": jax.random.normal(ks[0], (vocab, embed), jnp.float32) * 0.1,
        "dec_emb": jax.random.normal(ks[1], (vocab, embed), jnp.float32) * 0.1,
        # fused gate layout along the last dim: [r | z | n]  (PyTorch nn.GRU)
        "enc_wih": u(ks[2], (embed, 3 * hidden)),
        "enc_whh": u(ks[3], (hidden, 3 * hidden)),
        "enc_bih": u(ks[4], (1, 3 * hidden)),
        "enc_bhh": u(ks[5], (1, 3 * hidden)),
        "dec_wih_x": u(ks[6], (embed, 3 * hidden)),    # rows for the embedding
        "dec_wih_c": u(ks[7], (hidden, 3 * hidden)),   # rows for the context
        "dec_whh": u(ks[8], (hidden, 3 * hidden)),
        "dec_bih": u(ks[9], (1, 3 * hidden)),
        "dec_bhh": u(ks[10], (1, 3 * hidden)),
        "out_w": u(ks[11], (hidden, vocab)),
        "out_b": u(ks[12], (1, vocab)),
    }


if __name__ == "__main__":
    VOCAB, EMBED, HIDDEN = 16, 32, 32
    BATCH, T_ENC, T_DEC = 2, 8, 8

    key = jax.random.PRNGKey(0)
    k_enc, k_dec, k_par = jax.random.split(key, 3)
    enc_X = jax.random.randint(k_enc, (BATCH, T_ENC), 0, VOCAB, jnp.int32)
    dec_X = jax.random.randint(k_dec, (BATCH, T_DEC), 0, VOCAB, jnp.int32)
    params = make_params(k_par, VOCAB, EMBED, HIDDEN)

    out = jax.block_until_ready(encoder_decoder_forward(enc_X, dec_X, params))
    ref = jax.block_until_ready(reference_forward(enc_X, dec_X, params))

    assert out.shape == (BATCH, T_DEC, VOCAB) and out.dtype == jnp.float32
    # bf16 MXU operands (f32 accumulation) vs. the pure-f32 reference.
    assert jnp.allclose(out, ref, atol=3e-2, rtol=3e-2), "mismatch vs JAX reference"

    print("KERNEL_OK")
</pallas_src>

<mosaic_0001>
module attributes {stable_mosaic.version = 11 : i64} {
  func.func @_matmul_bias_kernel(%arg0: i32, %arg1: i32, %arg2: i32, %arg3: memref<2x32xf32, #tpu.memory_space<vmem>>, %arg4: memref<32x96xf32, #tpu.memory_space<vmem>>, %arg5: memref<1x96xf32, #tpu.memory_space<vmem>>, %arg6: memref<2x96xf32, #tpu.memory_space<vmem>>, %arg7: memref<2x96xf32, #tpu.memory_space<vmem>>) attributes {dimension_semantics = [#tpu.dimension_semantics<parallel>, #tpu.dimension_semantics<parallel>, #tpu.dimension_semantics<arbitrary>], iteration_bounds = array<i64: 1, 1, 1>, scalar_prefetch = 0 : i64, scratch_operands = 1 : i64, tpu.core_type = #tpu.core_type<tc>, window_params = [{transform_indices = @transform_0, window_bounds = array<i64: 2, 32>}, {transform_indices = @transform_1, window_bounds = array<i64: 32, 96>}, {transform_indices = @transform_2, window_bounds = array<i64: 1, 96>}, {transform_indices = @transform_3, window_bounds = array<i64: 2, 96>}]} {
    %c0_i32 = arith.constant 0 : i32
    %0 = arith.cmpi eq, %arg2, %c0_i32 : i32
    %1 = arith.extui %0 : i1 to i32
    %c0_i32_0 = arith.constant 0 : i32
    %2 = arith.cmpi ne, %1, %c0_i32_0 : i32
    scf.if %2 {
      %cst_10 = arith.constant 0.000000e+00 : f32
      %14 = vector.broadcast %cst_10 : f32 to vector<2x96xf32>
      %c0_11 = arith.constant 0 : index
      %c0_12 = arith.constant 0 : index
      %15 = vector.load %arg7[%c0_11, %c0_12] : memref<2x96xf32, #tpu.memory_space<vmem>>, vector<2x96xf32>
      tpu.vector_store %arg7[%c0_11, %c0_12], %14 {strides = array<i32>} : memref<2x96xf32, #tpu.memory_space<vmem>>, vector<2x96xf32>,
    } else {
    }
    %c0 = arith.constant 0 : index
    %c0_1 = arith.constant 0 : index
    %3 = vector.load %arg7[%c0, %c0_1] : memref<2x96xf32, #tpu.memory_space<vmem>>, vector<2x96xf32>
    %c0_2 = arith.constant 0 : index
    %c0_3 = arith.constant 0 : index
    %4 = vector.load %arg3[%c0_2, %c0_3] : memref<2x32xf32, #tpu.memory_space<vmem>>, vector<2x32xf32>
    %5 = arith.truncf %4 : vector<2x32xf32> to vector<2x32xbf16>
    %c0_4 = arith.constant 0 : index
    %c0_5 = arith.constant 0 : index
    %6 = vector.load %arg4[%c0_4, %c0_5] : memref<32x96xf32, #tpu.memory_space<vmem>>, vector<32x96xf32>
    %7 = arith.truncf %6 : vector<32x96xf32> to vector<32x96xbf16>
    %cst = arith.constant dense<0.000000e+00> : vector<2x96xf32>
    %8 = tpu.matmul %5, %7, %cst {dimension_numbers = #tpu.dot_dimension_numbers<[1], [0], [0], [1], [0, 0, 1, 1], [], []>} : vector<2x32xbf16>, vector<32x96xbf16>, vector<2x96xf32> -> vector<2x96xf32>
    %9 = arith.addf %3, %8 : vector<2x96xf32>
    %c0_6 = arith.constant 0 : index
    %c0_7 = arith.constant 0 : index
    %10 = vector.load %arg7[%c0_6, %c0_7] : memref<2x96xf32, #tpu.memory_space<vmem>>, vector<2x96xf32>
    tpu.vector_store %arg7[%c0_6, %c0_7], %9 {strides = array<i32>} : memref<2x96xf32, #tpu.memory_space<vmem>>, vector<2x96xf32>,
    %c0_i32_8 = arith.constant 0 : i32
    %11 = arith.cmpi eq, %arg2, %c0_i32_8 : i32
    %12 = arith.extui %11 : i1 to i32
    %c0_i32_9 = arith.constant 0 : i32
    %13 = arith.cmpi ne, %12, %c0_i32_9 : i32
    scf.if %13 {
      %c0_10 = arith.constant 0 : index
      %c0_11 = arith.constant 0 : index
      %14 = vector.load %arg7[%c0_10, %c0_11] : memref<2x96xf32, #tpu.memory_space<vmem>>, vector<2x96xf32>
      %c0_12 = arith.constant 0 : index
      %c0_13 = arith.constant 0 : index
      %15 = vector.load %arg5[%c0_12, %c0_13] : memref<1x96xf32, #tpu.memory_space<vmem>>, vector<1x96xf32>
      %16 = vector.broadcast %15 : vector<1x96xf32> to vector<2x96xf32>
      %17 = arith.addf %14, %16 : vector<2x96xf32>
      %c0_14 = arith.constant 0 : index
      %c0_15 = arith.constant 0 : index
      %18 = vector.load %arg6[%c0_14, %c0_15] : memref<2x96xf32, #tpu.memory_space<vmem>>, vector<2x96xf32>
      tpu.vector_store %arg6[%c0_14, %c0_15], %17 {strides = array<i32>} : memref<2x96xf32, #tpu.memory_space<vmem>>, vector<2x96xf32>,
    } else {
    }
    return
  }
  func.func @transform_0(%arg0: i32, %arg1: i32, %arg2: i32) -> (i32, i32) {
    %c0_i32 = arith.constant 0 : i32
    return %arg0, %arg2 : i32, i32
  }
  func.func @transform_1(%arg0: i32, %arg1: i32, %arg2: i32) -> (i32, i32) {
    %c0_i32 = arith.constant 0 : i32
    return %arg2, %arg1 : i32, i32
  }
  func.func @transform_2(%arg0: i32, %arg1: i32, %arg2: i32) -> (i32, i32) {
    %c0_i32 = arith.constant 0 : i32
    %c0_i32_0 = arith.constant 0 : i32
    return %c0_i32, %arg1 : i32, i32
  }
  func.func @transform_3(%arg0: i32, %arg1: i32, %arg2: i32) -> (i32, i32) {
    %c0_i32 = arith.constant 0 : i32
    return %arg0, %arg1 : i32, i32
  }
}

module attributes {stable_mosaic.version = 11 : i64} {
  func.func @_gru_encoder_scan_kernel(%arg0: i32, %arg1: i32, %arg2: memref<4x3x2x32xf32, #tpu.memory_space<vmem>>, %arg3: memref<3x32x32xf32, #tpu.memory_space<vmem>>, %arg4: memref<1x32xf32, #tpu.memory_space<vmem>>, %arg5: memref<2x32xf32, #tpu.memory_space<vmem>>, %arg6: memref<2x32xf32, #tpu.memory_space<vmem>>) attributes {dimension_semantics = [#tpu.dimension_semantics<parallel>, #tpu.dimension_semantics<arbitrary>], iteration_bounds = array<i64: 1, 2>, scalar_prefetch = 0 : i64, scratch_operands = 1 : i64, tpu.core_type = #tpu.core_type<tc>, window_params = [{transform_indices = @transform_0, window_bounds = array<i64: 4, 3, 2, 32>}, {pipeline_mode = #tpu.pipeline_mode<synchronous>, transform_indices = @transform_1, window_bounds = array<i64: 3, 32, 32>}, {pipeline_mode = #tpu.pipeline_mode<synchronous>, transform_indices = @transform_2, window_bounds = array<i64: 1, 32>}, {transform_indices = @transform_3, window_bounds = array<i64: 2, 32>}]} {
    %c0_i32 = arith.constant 0 : i32
    %0 = arith.cmpi eq, %arg1, %c0_i32 : i32
    %1 = arith.extui %0 : i1 to i32
    %c0_i32_0 = arith.constant 0 : i32
    %2 = arith.cmpi ne, %1, %c0_i32_0 : i32
    scf.if %2 {
      %cst_47 = arith.constant 0.000000e+00 : f32
      %153 = vector.broadcast %cst_47 : f32 to vector<2x32xf32>
      %c0_48 = arith.constant 0 : index
      %c0_49 = arith.constant 0 : index
      %154 = vector.load %arg6[%c0_48, %c0_49] : memref<2x32xf32, #tpu.memory_space<vmem>>, vector<2x32xf32>
      tpu.vector_store %arg6[%c0_48, %c0_49], %153 {strides = array<i32>} : memref<2x32xf32, #tpu.memory_space<vmem>>, vector<2x32xf32>,
    } else {
    }
    %c0 = arith.constant 0 : index
    %c0_1 = arith.constant 0 : index
    %c0_2 = arith.constant 0 : index
    %3 = vector.load %arg3[%c0, %c0_1, %c0_2] : memref<3x32x32xf32, #tpu.memory_space<vmem>>, vector<3x32x32xf32>
    %4 = arith.truncf %3 : vector<3x32x32xf32> to vector<3x32x32xbf16>
    %5 = vector.extract_strided_slice %4 {offsets = [0, 0, 0], sizes = [1, 32, 32], strides = [1, 1, 1]} : vector<3x32x32xbf16> to vector<1x32x32xbf16>
    %6 = vector.shape_cast %5 : vector<1x32x32xbf16> to vector<32x32xbf16>
    %7 = vector.extract_strided_slice %4 {offsets = [1, 0, 0], sizes = [1, 32, 32], strides = [1, 1, 1]} : vector<3x32x32xbf16> to vector<1x32x32xbf16>
    %8 = vector.shape_cast %7 : vector<1x32x32xbf16> to vector<32x32xbf16>
    %9 = vector.extract_strided_slice %4 {offsets = [2, 0, 0], sizes = [1, 32, 32], strides = [1, 1, 1]} : vector<3x32x32xbf16> to vector<1x32x32xbf16>
    %10 = vector.shape_cast %9 : vector<1x32x32xbf16> to vector<32x32xbf16>
    %c0_3 = arith.constant 0 : index
    %c0_4 = arith.constant 0 : index
    %11 = vector.load %arg4[%c0_3, %c0_4] : memref<1x32xf32, #tpu.memory_space<vmem>>, vector<1x32xf32>
    %12 = vector.shape_cast %11 : vector<1x32xf32> to vector<1x32xf32>
    %13 = vector.broadcast %12 : vector<1x32xf32> to vector<2x32xf32>
    %c0_5 = arith.constant 0 : index
    %c0_6 = arith.constant 0 : index
    %14 = vector.load %arg6[%c0_5, %c0_6] : memref<2x32xf32, #tpu.memory_space<vmem>>, vector<2x32xf32>
    %c0_i32_7 = arith.constant 0 : i32
    %15 = arith.index_cast %c0_i32_7 : i32 to index
    %c0_8 = arith.constant 0 : index
    %c0_9 = arith.constant 0 : index
    %c0_10 = arith.constant 0 : index
    %16 = vector.load %arg2[%15, %c0_8, %c0_9, %c0_10] : memref<4x3x2x32xf32, #tpu.memory_space<vmem>>, vector<1x3x2x32xf32>
    %17 = vector.shape_cast %16 : vector<1x3x2x32xf32> to vector<3x2x32xf32>
    %18 = arith.truncf %14 : vector<2x32xf32> to vector<2x32xbf16>
    %19 = vector.extract_strided_slice %17 {offsets = [0, 0, 0], sizes = [1, 2, 32], strides = [1, 1, 1]} : vector<3x2x32xf32> to vector<1x2x32xf32>
    %20 = vector.shape_cast %19 : vector<1x2x32xf32> to vector<2x32xf32>
    %cst = arith.constant dense<0.000000e+00> : vector<2x32xf32>
    %21 = tpu.matmul %18, %6, %cst {dimension_numbers = #tpu.dot_dimension_numbers<[1], [0], [0], [1], [0, 0, 1, 1], [], []>} : vector<2x32xbf16>, vector<32x32xbf16>, vector<2x32xf32> -> vector<2x32xf32>
    %22 = arith.addf %20, %21 : vector<2x32xf32>
    %23 = arith.negf %22 : vector<2x32xf32>
    %24 = math.exp %23 : vector<2x32xf32>
    %cst_11 = arith.constant 1.000000e+00 : f32
    %25 = vector.broadcast %cst_11 : f32 to vector<2x32xf32>
    %26 = arith.addf %25, %24 : vector<2x32xf32>
    %27 = arith.divf %25, %26 : vector<2x32xf32>
    %28 = vector.extract_strided_slice %17 {offsets = [1, 0, 0], sizes = [1, 2, 32], strides = [1, 1, 1]} : vector<3x2x32xf32> to vector<1x2x32xf32>
    %29 = vector.shape_cast %28 : vector<1x2x32xf32> to vector<2x32xf32>
    %cst_12 = arith.constant dense<0.000000e+00> : vector<2x32xf32>
    %30 = tpu.matmul %18, %8, %cst_12 {dimension_numbers = #tpu.dot_dimension_numbers<[1], [0], [0], [1], [0, 0, 1, 1], [], []>} : vector<2x32xbf16>, vector<32x32xbf16>, vector<2x32xf32> -> vector<2x32xf32>
    %31 = arith.addf %29, %30 : vector<2x32xf32>
    %32 = arith.negf %31 : vector<2x32xf32>
    %33 = math.exp %32 : vector<2x32xf32>
    %cst_13 = arith.constant 1.000000e+00 : f32
    %34 = vector.broadcast %cst_13 : f32 to vector<2x32xf32>
    %35 = arith.addf %34, %33 : vector<2x32xf32>
    %36 = arith.divf %34, %35 : vector<2x32xf32>
    %37 = vector.extract_strided_slice %17 {offsets = [2, 0, 0], sizes = [1, 2, 32], strides = [1, 1, 1]} : vector<3x2x32xf32> to vector<1x2x32xf32>
    %38 = vector.shape_cast %37 : vector<1x2x32xf32> to vector<2x32xf32>
    %cst_14 = arith.constant dense<0.000000e+00> : vector<2x32xf32>
    %39 = tpu.matmul %18, %10, %cst_14 {dimension_numbers = #tpu.dot_dimension_numbers<[1], [0], [0], [1], [0, 0, 1, 1], [], []>} : vector<2x32xbf16>, vector<32x32xbf16>, vector<2x32xf32> -> vector<2x32xf32>
    %40 = arith.addf %39, %13 : vector<2x32xf32>
    %41 = arith.mulf %27, %40 : vector<2x32xf32>
    %42 = arith.addf %38, %41 : vector<2x32xf32>
    %43 = math.tanh %42 : vector<2x32xf32>
    %cst_15 = arith.constant 1.000000e+00 : f32
    %44 = vector.broadcast %cst_15 : f32 to vector<2x32xf32>
    %45 = arith.subf %44, %36 : vector<2x32xf32>
    %46 = arith.mulf %45, %43 : vector<2x32xf32>
    %47 = arith.mulf %36, %14 : vector<2x32xf32>
    %48 = arith.addf %46, %47 : vector<2x32xf32>
    %c1_i32 = arith.constant 1 : i32
    %49 = arith.index_cast %c1_i32 : i32 to index
    %c0_16 = arith.constant 0 : index
    %c0_17 = arith.constant 0 : index
    %c0_18 = arith.constant 0 : index
    %50 = vector.load %arg2[%49, %c0_16, %c0_17, %c0_18] : memref<4x3x2x32xf32, #tpu.memory_space<vmem>>, vector<1x3x2x32xf32>
    %51 = vector.shape_cast %50 : vector<1x3x2x32xf32> to vector<3x2x32xf32>
    %52 = arith.truncf %48 : vector<2x32xf32> to vector<2x32xbf16>
    %53 = vector.extract_strided_slice %51 {offsets = [0, 0, 0], sizes = [1, 2, 32], strides = [1, 1, 1]} : vector<3x2x32xf32> to vector<1x2x32xf32>
    %54 = vector.shape_cast %53 : vector<1x2x32xf32> to vector<2x32xf32>
    %cst_19 = arith.constant dense<0.000000e+00> : vector<2x32xf32>
    %55 = tpu.matmul %52, %6, %cst_19 {dimension_numbers = #tpu.dot_dimension_numbers<[1], [0], [0], [1], [0, 0, 1, 1], [], []>} : vector<2x32xbf16>, vector<32x32xbf16>, vector<2x32xf32> -> vector<2x32xf32>
    %56 = arith.addf %54, %55 : vector<2x32xf32>
    %57 = arith.negf %56 : vector<2x32xf32>
    %58 = math.exp %57 : vector<2x32xf32>
    %cst_20 = arith.constant 1.000000e+00 : f32
    %59 = vector.broadcast %cst_20 : f32 to vector<2x32xf32>
    %60 = arith.addf %59, %58 : vector<2x32xf32>
    %61 = arith.divf %59, %60 : vector<2x32xf32>
    %62 = vector.extract_strided_slice %51 {offsets = [1, 0, 0], sizes = [1, 2, 32], strides = [1, 1, 1]} : vector<3x2x32xf32> to vector<1x2x32xf32>
    %63 = vector.shape_cast %62 : vector<1x2x32xf32> to vector<2x32xf32>
    %cst_21 = arith.constant dense<0.000000e+00> : vector<2x32xf32>
    %64 = tpu.matmul %52, %8, %cst_21 {dimension_numbers = #tpu.dot_dimension_numbers<[1], [0], [0], [1], [0, 0, 1, 1], [], []>} : vector<2x32xbf16>, vector<32x32xbf16>, vector<2x32xf32> -> vector<2x32xf32>
    %65 = arith.addf %63, %64 : vector<2x32xf32>
    %66 = arith.negf %65 : vector<2x32xf32>
    %67 = math.exp %66 : vector<2x32xf32>
    %cst_22 = arith.constant 1.000000e+00 : f32
    %68 = vector.broadcast %cst_22 : f32 to vector<2x32xf32>
    %69 = arith.addf %68, %67 : vector<2x32xf32>
    %70 = arith.divf %68, %69 : vector<2x32xf32>
    %71 = vector.extract_strided_slice %51 {offsets = [2, 0, 0], sizes = [1, 2, 32], strides = [1, 1, 1]} : vector<3x2x32xf32> to vector<1x2x32xf32>
    %72 = vector.shape_cast %71 : vector<1x2x32xf32> to vector<2x32xf32>
    %cst_23 = arith.constant dense<0.000000e+00> : vector<2x32xf32>
    %73 = tpu.matmul %52, %10, %cst_23 {dimension_numbers = #tpu.dot_dimension_numbers<[1], [0], [0], [1], [0, 0, 1, 1], [], []>} : vector<2x32xbf16>, vector<32x32xbf16>, vector<2x32xf32> -> vector<2x32xf32>
    %74 = arith.addf %73, %13 : vector<2x32xf32>
    %75 = arith.mulf %61, %74 : vector<2x32xf32>
    %76 = arith.addf %72, %75 : vector<2x32xf32>
    %77 = math.tanh %76 : vector<2x32xf32>
    %cst_24 = arith.constant 1.000000e+00 : f32
    %78 = vector.broadcast %cst_24 : f32 to vector<2x32xf32>
    %79 = arith.subf %78, %70 : vector<2x32xf32>
    %80 = arith.mulf %79, %77 : vector<2x32xf32>
    %81 = arith.mulf %70, %48 : vector<2x32xf32>
    %82 = arith.addf %80, %81 : vector<2x32xf32>
    %c2_i32 = arith.constant 2 : i32
    %83 = arith.index_cast %c2_i32 : i32 to index
    %c0_25 = arith.constant 0 : index
    %c0_26 = arith.constant 0 : index
    %c0_27 = arith.constant 0 : index
    %84 = vector.load %arg2[%83, %c0_25, %c0_26, %c0_27] : memref<4x3x2x32xf32, #tpu.memory_space<vmem>>, vector<1x3x2x32xf32>
    %85 = vector.shape_cast %84 : vector<1x3x2x32xf32> to vector<3x2x32xf32>
    %86 = arith.truncf %82 : vector<2x32xf32> to vector<2x32xbf16>
    %87 = vector.extract_strided_slice %85 {offsets = [0, 0, 0], sizes = [1, 2, 32], strides = [1, 1, 1]} : vector<3x2x32xf32> to vector<1x2x32xf32>
    %88 = vector.shape_cast %87 : vector<1x2x32xf32> to vector<2x32xf32>
    %cst_28 = arith.constant dense<0.000000e+00> : vector<2x32xf32>
    %89 = tpu.matmul %86, %6, %cst_28 {dimension_numbers = #tpu.dot_dimension_numbers<[1], [0], [0], [1], [0, 0, 1, 1], [], []>} : vector<2x32xbf16>, vector<32x32xbf16>, vector<2x32xf32> -> vector<2x32xf32>
    %90 = arith.addf %88, %89 : vector<2x32xf32>
    %91 = arith.negf %90 : vector<2x32xf32>
    %92 = math.exp %91 : vector<2x32xf32>
    %cst_29 = arith.constant 1.000000e+00 : f32
    %93 = vector.broadcast %cst_29 : f32 to vector<2x32xf32>
    %94 = arith.addf %93, %92 : vector<2x32xf32>
    %95 = arith.divf %93, %94 : vector<2x32xf32>
    %96 = vector.extract_strided_slice %85 {offsets = [1, 0, 0], sizes = [1, 2, 32], strides = [1, 1, 1]} : vector<3x2x32xf32> to vector<1x2x32xf32>
    %97 = vector.shape_cast %96 : vector<1x2x32xf32> to vector<2x32xf32>
    %cst_30 = arith.constant dense<0.000000e+00> : vector<2x32xf32>
    %98 = tpu.matmul %86, %8, %cst_30 {dimension_numbers = #tpu.dot_dimension_numbers<[1], [0], [0], [1], [0, 0, 1, 1], [], []>} : vector<2x32xbf16>, vector<32x32xbf16>, vector<2x32xf32> -> vector<2x32xf32>
    %99 = arith.addf %97, %98 : vector<2x32xf32>
    %100 = arith.negf %99 : vector<2x32xf32>
    %101 = math.exp %100 : vector<2x32xf32>
    %cst_31 = arith.constant 1.000000e+00 : f32
    %102 = vector.broadcast %cst_31 : f32 to vector<2x32xf32>
    %103 = arith.addf %102, %101 : vector<2x32xf32>
    %104 = arith.divf %102, %103 : vector<2x32xf32>
    %105 = vector.extract_strided_slice %85 {offsets = [2, 0, 0], sizes = [1, 2, 32], strides = [1, 1, 1]} : vector<3x2x32xf32> to vector<1x2x32xf32>
    %106 = vector.shape_cast %105 : vector<1x2x32xf32> to vector<2x32xf32>
    %cst_32 = arith.constant dense<0.000000e+00> : vector<2x32xf32>
    %107 = tpu.matmul %86, %10, %cst_32 {dimension_numbers = #tpu.dot_dimension_numbers<[1], [0], [0], [1], [0, 0, 1, 1], [], []>} : vector<2x32xbf16>, vector<32x32xbf16>, vector<2x32xf32> -> vector<2x32xf32>
    %108 = arith.addf %107, %13 : vector<2x32xf32>
    %109 = arith.mulf %95, %108 : vector<2x32xf32>
    %110 = arith.addf %106, %109 : vector<2x32xf32>
    %111 = math.tanh %110 : vector<2x32xf32>
    %cst_33 = arith.constant 1.000000e+00 : f32
    %112 = vector.broadcast %cst_33 : f32 to vector<2x32xf32>
    %113 = arith.subf %112, %104 : vector<2x32xf32>
    %114 = arith.mulf %113, %111 : vector<2x32xf32>
    %115 = arith.mulf %104, %82 : vector<2x32xf32>
    %116 = arith.addf %114, %115 : vector<2x32xf32>
    %c3_i32 = arith.constant 3 : i32
    %117 = arith.index_cast %c3_i32 : i32 to index
    %c0_34 = arith.constant 0 : index
    %c0_35 = arith.constant 0 : index
    %c0_36 = arith.constant 0 : index
    %118 = vector.load %arg2[%117, %c0_34, %c0_35, %c0_36] : memref<4x3x2x32xf32, #tpu.memory_space<vmem>>, vector<1x3x2x32xf32>
    %119 = vector.shape_cast %118 : vector<1x3x2x32xf32> to vector<3x2x32xf32>
    %120 = arith.truncf %116 : vector<2x32xf32> to vector<2x32xbf16>
    %121 = vector.extract_strided_slice %119 {offsets = [0, 0, 0], sizes = [1, 2, 32], strides = [1, 1, 1]} : vector<3x2x32xf32> to vector<1x2x32xf32>
    %122 = vector.shape_cast %121 : vector<1x2x32xf32> to vector<2x32xf32>
    %cst_37 = arith.constant dense<0.000000e+00> : vector<2x32xf32>
    %123 = tpu.matmul %120, %6, %cst_37 {dimension_numbers = #tpu.dot_dimension_numbers<[1], [0], [0], [1], [0, 0, 1, 1], [], []>} : vector<2x32xbf16>, vector<32x32xbf16>, vector<2x32xf32> -> vector<2x32xf32>
    %124 = arith.addf %122, %123 : vector<2x32xf32>
    %125 = arith.negf %124 : vector<2x32xf32>
    %126 = math.exp %125 : vector<2x32xf32>
    %cst_38 = arith.constant 1.000000e+00 : f32
    %127 = vector.broadcast %cst_38 : f32 to vector<2x32xf32>
    %128 = arith.addf %127, %126 : vector<2x32xf32>
    %129 = arith.divf %127, %128 : vector<2x32xf32>
    %130 = vector.extract_strided_slice %119 {offsets = [1, 0, 0], sizes = [1, 2, 32], strides = [1, 1, 1]} : vector<3x2x32xf32> to vector<1x2x32xf32>
    %131 = vector.shape_cast %130 : vector<1x2x32xf32> to vector<2x32xf32>
    %cst_39 = arith.constant dense<0.000000e+00> : vector<2x32xf32>
    %132 = tpu.matmul %120, %8, %cst_39 {dimension_numbers = #tpu.dot_dimension_numbers<[1], [0], [0], [1], [0, 0, 1, 1], [], []>} : vector<2x32xbf16>, vector<32x32xbf16>, vector<2x32xf32> -> vector<2x32xf32>
    %133 = arith.addf %131, %132 : vector<2x32xf32>
    %134 = arith.negf %133 : vector<2x32xf32>
    %135 = math.exp %134 : vector<2x32xf32>
    %cst_40 = arith.constant 1.000000e+00 : f32
    %136 = vector.broadcast %cst_40 : f32 to vector<2x32xf32>
    %137 = arith.addf %136, %135 : vector<2x32xf32>
    %138 = arith.divf %136, %137 : vector<2x32xf32>
    %139 = vector.extract_strided_slice %119 {offsets = [2, 0, 0], sizes = [1, 2, 32], strides = [1, 1, 1]} : vector<3x2x32xf32> to vector<1x2x32xf32>
    %140 = vector.shape_cast %139 : vector<1x2x32xf32> to vector<2x32xf32>
    %cst_41 = arith.constant dense<0.000000e+00> : vector<2x32xf32>
    %141 = tpu.matmul %120, %10, %cst_41 {dimension_numbers = #tpu.dot_dimension_numbers<[1], [0], [0], [1], [0, 0, 1, 1], [], []>} : vector<2x32xbf16>, vector<32x32xbf16>, vector<2x32xf32> -> vector<2x32xf32>
    %142 = arith.addf %141, %13 : vector<2x32xf32>
    %143 = arith.mulf %129, %142 : vector<2x32xf32>
    %144 = arith.addf %140, %143 : vector<2x32xf32>
    %145 = math.tanh %144 : vector<2x32xf32>
    %cst_42 = arith.constant 1.000000e+00 : f32
    %146 = vector.broadcast %cst_42 : f32 to vector<2x32xf32>
    %147 = arith.subf %146, %138 : vector<2x32xf32>
    %148 = arith.mulf %147, %145 : vector<2x32xf32>
    %149 = arith.mulf %138, %116 : vector<2x32xf32>
    %150 = arith.addf %148, %149 : vector<2x32xf32>
    %c4_i32 = arith.constant 4 : i32
    %c0_43 = arith.constant 0 : index
    %c0_44 = arith.constant 0 : index
    %151 = vector.load %arg6[%c0_43, %c0_44] : memref<2x32xf32, #tpu.memory_space<vmem>>, vector<2x32xf32>
    tpu.vector_store %arg6[%c0_43, %c0_44], %150 {strides = array<i32>} : memref<2x32xf32, #tpu.memory_space<vmem>>, vector<2x32xf32>,
    %c0_45 = arith.constant 0 : index
    %c0_46 = arith.constant 0 : index
    %152 = vector.load %arg5[%c0_45, %c0_46] : memref<2x32xf32, #tpu.memory_space<vmem>>, vector<2x32xf32>
    tpu.vector_store %arg5[%c0_45, %c0_46], %150 {strides = array<i32>} : memref<2x32xf32, #tpu.memory_space<vmem>>, vector<2x32xf32>,
    return
  }
  func.func @transform_0(%arg0: i32, %arg1: i32) -> (i32, i32, i32, i32) {
    %c0_i32 = arith.constant 0 : i32
    %c0_i32_0 = arith.constant 0 : i32
    %c0_i32_1 = arith.constant 0 : i32
    return %arg1, %c0_i32, %arg0, %c0_i32_0 : i32, i32, i32, i32
  }
  func.func @transform_1(%arg0: i32, %arg1: i32) -> (i32, i32, i32) {
    %c0_i32 = arith.constant 0 : i32
    %c0_i32_0 = arith.constant 0 : i32
    %c0_i32_1 = arith.constant 0 : i32
    %c0_i32_2 = arith.constant 0 : i32
    return %c0_i32, %c0_i32_0, %c0_i32_1 : i32, i32, i32
  }
  func.func @transform_2(%arg0: i32, %arg1: i32) -> (i32, i32) {
    %c0_i32 = arith.constant 0 : i32
    %c0_i32_0 = arith.constant 0 : i32
    %c0_i32_1 = arith.constant 0 : i32
    return %c0_i32, %c0_i32_0 : i32, i32
  }
  func.func @transform_3(%arg0: i32, %arg1: i32) -> (i32, i32) {
    %c0_i32 = arith.constant 0 : i32
    %c0_i32_0 = arith.constant 0 : i32
    return %arg0, %c0_i32 : i32, i32
  }
}

module attributes {stable_mosaic.version = 11 : i64} {
  func.func @_proj_kernel(%arg0: i32, %arg1: memref<8x2x32xf32, #tpu.memory_space<vmem>>, %arg2: memref<32x96xf32, #tpu.memory_space<vmem>>, %arg3: memref<1x96xf32, #tpu.memory_space<vmem>>, %arg4: memref<8x3x2x32xf32, #tpu.memory_space<vmem>>) attributes {dimension_semantics = [#tpu.dimension_semantics<parallel>], iteration_bounds = array<i64: 1>, scalar_prefetch = 0 : i64, scratch_operands = 0 : i64, tpu.core_type = #tpu.core_type<tc>, window_params = [{transform_indices = @transform_0, window_bounds = array<i64: 8, 2, 32>}, {pipeline_mode = #tpu.pipeline_mode<synchronous>, transform_indices = @transform_1, window_bounds = array<i64: 32, 96>}, {pipeline_mode = #tpu.pipeline_mode<synchronous>, transform_indices = @transform_2, window_bounds = array<i64: 1, 96>}, {transform_indices = @transform_3, window_bounds = array<i64: 8, 3, 2, 32>}]} {
    %c0 = arith.constant 0 : index
    %c0_0 = arith.constant 0 : index
    %0 = vector.load %arg2[%c0, %c0_0] : memref<32x96xf32, #tpu.memory_space<vmem>>, vector<32x96xf32>
    %1 = arith.truncf %0 : vector<32x96xf32> to vector<32x96xbf16>
    %c0_1 = arith.constant 0 : index
    %c0_2 = arith.constant 0 : index
    %2 = vector.load %arg3[%c0_1, %c0_2] : memref<1x96xf32, #tpu.memory_space<vmem>>, vector<1x96xf32>
    %3 = vector.shape_cast %2 : vector<1x96xf32> to vector<1x96xf32>
    %4 = vector.broadcast %3 : vector<1x96xf32> to vector<2x96xf32>
    %c0_3 = arith.constant 0 : index
    %c0_4 = arith.constant 0 : index
    %c0_5 = arith.constant 0 : index
    %5 = vector.load %arg1[%c0_3, %c0_4, %c0_5] : memref<8x2x32xf32, #tpu.memory_space<vmem>>, vector<1x2x32xf32>
    %6 = vector.shape_cast %5 : vector<1x2x32xf32> to vector<2x32xf32>
    %7 = arith.truncf %6 : vector<2x32xf32> to vector<2x32xbf16>
    %cst = arith.constant dense<0.000000e+00> : vector<2x96xf32>
    %8 = tpu.matmul %7, %1, %cst {dimension_numbers = #tpu.dot_dimension_numbers<[1], [0], [0], [1], [0, 0, 1, 1], [], []>} : vector<2x32xbf16>, vector<32x96xbf16>, vector<2x96xf32> -> vector<2x96xf32>
    %9 = arith.addf %8, %4 : vector<2x96xf32>
    %10 = vector.extract_strided_slice %9 {offsets = [0, 0], sizes = [2, 32], strides = [1, 1]} : vector<2x96xf32> to vector<2x32xf32>
    %c0_6 = arith.constant 0 : index
    %c0_7 = arith.constant 0 : index
    %c0_8 = arith.constant 0 : index
    %c0_9 = arith.constant 0 : index
    %11 = vector.load %arg4[%c0_6, %c0_7, %c0_8, %c0_9] : memref<8x3x2x32xf32, #tpu.memory_space<vmem>>, vector<1x1x2x32xf32>
    %12 = vector.shape_cast %11 : vector<1x1x2x32xf32> to vector<2x32xf32>
    %13 = vector.shape_cast %10 : vector<2x32xf32> to vector<1x1x2x32xf32>
    tpu.vector_store %arg4[%c0_6, %c0_7, %c0_8, %c0_9], %13 {strides = array<i32>} : memref<8x3x2x32xf32, #tpu.memory_space<vmem>>, vector<1x1x2x32xf32>,
    %14 = vector.extract_strided_slice %9 {offsets = [0, 32], sizes = [2, 32], strides = [1, 1]} : vector<2x96xf32> to vector<2x32xf32>
    %c0_10 = arith.constant 0 : index
    %c1 = arith.constant 1 : index
    %c0_11 = arith.constant 0 : index
    %c0_12 = arith.constant 0 : index
    %15 = vector.load %arg4[%c0_10, %c1, %c0_11, %c0_12] : memref<8x3x2x32xf32, #tpu.memory_space<vmem>>, vector<1x1x2x32xf32>
    %16 = vector.shape_cast %15 : vector<1x1x2x32xf32> to vector<2x32xf32>
    %17 = vector.shape_cast %14 : vector<2x32xf32> to vector<1x1x2x32xf32>
    tpu.vector_store %arg4[%c0_10, %c1, %c0_11, %c0_12], %17 {strides = array<i32>} : memref<8x3x2x32xf32, #tpu.memory_space<vmem>>, vector<1x1x2x32xf32>,
    %18 = vector.extract_strided_slice %9 {offsets = [0, 64], sizes = [2, 32], strides = [1, 1]} : vector<2x96xf32> to vector<2x32xf32>
    %c0_13 = arith.constant 0 : index
    %c2 = arith.constant 2 : index
    %c0_14 = arith.constant 0 : index
    %c0_15 = arith.constant 0 : index
    %19 = vector.load %arg4[%c0_13, %c2, %c0_14, %c0_15] : memref<8x3x2x32xf32, #tpu.memory_space<vmem>>, vector<1x1x2x32xf32>
    %20 = vector.shape_cast %19 : vector<1x1x2x32xf32> to vector<2x32xf32>
    %21 = vector.shape_cast %18 : vector<2x32xf32> to vector<1x1x2x32xf32>
    tpu.vector_store %arg4[%c0_13, %c2, %c0_14, %c0_15], %21 {strides = array<i32>} : memref<8x3x2x32xf32, #tpu.memory_space<vmem>>, vector<1x1x2x32xf32>,
    %c1_16 = arith.constant 1 : index
    %c0_17 = arith.constant 0 : index
    %c0_18 = arith.constant 0 : index
    %22 = vector.load %arg1[%c1_16, %c0_17, %c0_18] : memref<8x2x32xf32, #tpu.memory_space<vmem>>, vector<1x2x32xf32>
    %23 = vector.shape_cast %22 : vector<1x2x32xf32> to vector<2x32xf32>
    %24 = arith.truncf %23 : vector<2x32xf32> to vector<2x32xbf16>
    %cst_19 = arith.constant dense<0.000000e+00> : vector<2x96xf32>
    %25 = tpu.matmul %24, %1, %cst_19 {dimension_numbers = #tpu.dot_dimension_numbers<[1], [0], [0], [1], [0, 0, 1, 1], [], []>} : vector<2x32xbf16>, vector<32x96xbf16>, vector<2x96xf32> -> vector<2x96xf32>
    %26 = arith.addf %25, %4 : vector<2x96xf32>
    %27 = vector.extract_strided_slice %26 {offsets = [0, 0], sizes = [2, 32], strides = [1, 1]} : vector<2x96xf32> to vector<2x32xf32>
    %c1_20 = arith.constant 1 : index
    %c0_21 = arith.constant 0 : index
    %c0_22 = arith.constant 0 : index
    %c0_23 = arith.constant 0 : index
    %28 = vector.load %arg4[%c1_20, %c0_21, %c0_22, %c0_23] : memref<8x3x2x32xf32, #tpu.memory_space<vmem>>, vector<1x1x2x32xf32>
    %29 = vector.shape_cast %28 : vector<1x1x2x32xf32> to vector<2x32xf32>
    %30 = vector.shape_cast %27 : vector<2x32xf32> to vector<1x1x2x32xf32>
    tpu.vector_store %arg4[%c1_20, %c0_21, %c0_22, %c0_23], %30 {strides = array<i32>} : memref<8x3x2x32xf32, #tpu.memory_space<vmem>>, vector<1x1x2x32xf32>,
    %31 = vector.extract_strided_slice %26 {offsets = [0, 32], sizes = [2, 32], strides = [1, 1]} : vector<2x96xf32> to vector<2x32xf32>
    %c1_24 = arith.constant 1 : index
    %c1_25 = arith.constant 1 : index
    %c0_26 = arith.constant 0 : index
    %c0_27 = arith.constant 0 : index
    %32 = vector.load %arg4[%c1_24, %c1_25, %c0_26, %c0_27] : memref<8x3x2x32xf32, #tpu.memory_space<vmem>>, vector<1x1x2x32xf32>
    %33 = vector.shape_cast %32 : vector<1x1x2x32xf32> to vector<2x32xf32>
    %34 = vector.shape_cast %31 : vector<2x32xf32> to vector<1x1x2x32xf32>
    tpu.vector_store %arg4[%c1_24, %c1_25, %c0_26, %c0_27], %34 {strides = array<i32>} : memref<8x3x2x32xf32, #tpu.memory_space<vmem>>, vector<1x1x2x32xf32>,
    %35 = vector.extract_strided_slice %26 {offsets = [0, 64], sizes = [2, 32], strides = [1, 1]} : vector<2x96xf32> to vector<2x32xf32>
    %c1_28 = arith.constant 1 : index
    %c2_29 = arith.constant 2 : index
    %c0_30 = arith.constant 0 : index
    %c0_31 = arith.constant 0 : index
    %36 = vector.load %arg4[%c1_28, %c2_29, %c0_30, %c0_31] : memref<8x3x2x32xf32, #tpu.memory_space<vmem>>, vector<1x1x2x32xf32>
    %37 = vector.shape_cast %36 : vector<1x1x2x32xf32> to vector<2x32xf32>
    %38 = vector.shape_cast %35 : vector<2x32xf32> to vector<1x1x2x32xf32>
    tpu.vector_store %arg4[%c1_28, %c2_29, %c0_30, %c0_31], %38 {strides = array<i32>} : memref<8x3x2x32xf32, #tpu.memory_space<vmem>>, vector<1x1x2x32xf32>,
    %c2_32 = arith.constant 2 : index
    %c0_33 = arith.constant 0 : index
    %c0_34 = arith.constant 0 : index
    %39 = vector.load %arg1[%c2_32, %c0_33, %c0_34] : memref<8x2x32xf32, #tpu.memory_space<vmem>>, vector<1x2x32xf32>
    %40 = vector.shape_cast %39 : vector<1x2x32xf32> to vector<2x32xf32>
    %41 = arith.truncf %40 : vector<2x32xf32> to vector<2x32xbf16>
    %cst_35 = arith.constant dense<0.000000e+00> : vector<2x96xf32>
    %42 = tpu.matmul %41, %1, %cst_35 {dimension_numbers = #tpu.dot_dimension_numbers<[1], [0], [0], [1], [0, 0, 1, 1], [], []>} : vector<2x32xbf16>, vector<32x96xbf16>, vector<2x96xf32> -> vector<2x96xf32>
    %43 = arith.addf %42, %4 : vector<2x96xf32>
    %44 = vector.extract_strided_slice %43 {offsets = [0, 0], sizes = [2, 32], strides = [1, 1]} : vector<2x96xf32> to vector<2x32xf32>
    %c2_36 = arith.constant 2 : index
    %c0_37 = arith.constant 0 : index
    %c0_38 = arith.constant 0 : index
    %c0_39 = arith.constant 0 : index
    %45 = vector.load %arg4[%c2_36, %c0_37, %c0_38, %c0_39] : memref<8x3x2x32xf32, #tpu.memory_space<vmem>>, vector<1x1x2x32xf32>
    %46 = vector.shape_cast %45 : vector<1x1x2x32xf32> to vector<2x32xf32>
    %47 = vector.shape_cast %44 : vector<2x32xf32> to vector<1x1x2x32xf32>
    tpu.vector_store %arg4[%c2_36, %c0_37, %c0_38, %c0_39], %47 {strides = array<i32>} : memref<8x3x2x32xf32, #tpu.memory_space<vmem>>, vector<1x1x2x32xf32>,
    %48 = vector.extract_strided_slice %43 {offsets = [0, 32], sizes = [2, 32], strides = [1, 1]} : vector<2x96xf32> to vector<2x32xf32>
    %c2_40 = arith.constant 2 : index
    %c1_41 = arith.constant 1 : index
    %c0_42 = arith.constant 0 : index
    %c0_43 = arith.constant 0 : index
    %49 = vector.load %arg4[%c2_40, %c1_41, %c0_42, %c0_43] : memref<8x3x2x32xf32, #tpu.memory_space<vmem>>, vector<1x1x2x32xf32>
    %50 = vector.shape_cast %49 : vector<1x1x2x32xf32> to vector<2x32xf32>
    %51 = vector.shape_cast %48 : vector<2x32xf32> to vector<1x1x2x32xf32>
    tpu.vector_store %arg4[%c2_40, %c1_41, %c0_42, %c0_43], %51 {strides = array<i32>} : memref<8x3x2x32xf32, #tpu.memory_space<vmem>>, vector<1x1x2x32xf32>,
    %52 = vector.extract_strided_slice %43 {offsets = [0, 64], sizes = [2, 32], strides = [1, 1]} : vector<2x96xf32> to vector<2x32xf32>
    %c2_44 = arith.constant 2 : index
    %c2_45 = arith.constant 2 : index
    %c0_46 = arith.constant 0 : index
    %c0_47 = arith.constant 0 : index
    %53 = vector.load %arg4[%c2_44, %c2_45, %c0_46, %c0_47] : memref<8x3x2x32xf32, #tpu.memory_space<vmem>>, vector<1x1x2x32xf32>
    %54 = vector.shape_cast %53 : vector<1x1x2x32xf32> to vector<2x32xf32>
    %55 = vector.shape_cast %52 : vector<2x32xf32> to vector<1x1x2x32xf32>
    tpu.vector_store %arg4[%c2_44, %c2_45, %c0_46, %c0_47], %55 {strides = array<i32>} : memref<8x3x2x32xf32, #tpu.memory_space<vmem>>, vector<1x1x2x32xf32>,
    %c3 = arith.constant 3 : index
    %c0_48 = arith.constant 0 : index
    %c0_49 = arith.constant 0 : index
    %56 = vector.load %arg1[%c3, %c0_48, %c0_49] : memref<8x2x32xf32, #tpu.memory_space<vmem>>, vector<1x2x32xf32>
    %57 = vector.shape_cast %56 : vector<1x2x32xf32> to vector<2x32xf32>
    %58 = arith.truncf %57 : vector<2x32xf32> to vector<2x32xbf16>
    %cst_50 = arith.constant dense<0.000000e+00> : vector<2x96xf32>
    %59 = tpu.matmul %58, %1, %cst_50 {dimension_numbers = #tpu.dot_dimension_numbers<[1], [0], [0], [1], [0, 0, 1, 1], [], []>} : vector<2x32xbf16>, vector<32x96xbf16>, vector<2x96xf32> -> vector<2x96xf32>
    %60 = arith.addf %59, %4 : vector<2x96xf32>
    %61 = vector.extract_strided_slice %60 {offsets = [0, 0], sizes = [2, 32], strides = [1, 1]} : vector<2x96xf32> to vector<2x32xf32>
    %c3_51 = arith.constant 3 : index
    %c0_52 = arith.constant 0 : index
    %c0_53 = arith.constant 0 : index
    %c0_54 = arith.constant 0 : index
    %62 = vector.load %arg4[%c3_51, %c0_52, %c0_53, %c0_54] : memref<8x3x2x32xf32, #tpu.memory_space<vmem>>, vector<1x1x2x32xf32>
    %63 = vector.shape_cast %62 : vector<1x1x2x32xf32> to vector<2x32xf32>
    %64 = vector.shape_cast %61 : vector<2x32xf32> to vector<1x1x2x32xf32>
    tpu.vector_store %arg4[%c3_51, %c0_52, %c0_53, %c0_54], %64 {strides = array<i32>} : memref<8x3x2x32xf32, #tpu.memory_space<vmem>>, vector<1x1x2x32xf32>,
    %65 = vector.extract_strided_slice %60 {offsets = [0, 32], sizes = [2, 32], strides = [1, 1]} : vector<2x96xf32> to vector<2x32xf32>
    %c3_55 = arith.constant 3 : index
    %c1_56 = arith.constant 1 : index
    %c0_57 = arith.constant 0 : index
    %c0_58 = arith.constant 0 : index
    %66 = vector.load %arg4[%c3_55, %c1_56, %c0_57, %c0_58] : memref<8x3x2x32xf32, #tpu.memory_space<vmem>>, vector<1x1x2x32xf32>
    %67 = vector.shape_cast %66 : vector<1x1x2x32xf32> to vector<2x32xf32>
    %68 = vector.shape_cast %65 : vector<2x32xf32> to vector<1x1x2x32xf32>
    tpu.vector_store %arg4[%c3_55, %c1_56, %c0_57, %c0_58], %68 {strides = array<i32>} : memref<8x3x2x32xf32, #tpu.memory_space<vmem>>, vector<1x1x2x32xf32>,
    %69 = vector.extract_strided_slice %60 {offsets = [0, 64], sizes = [2, 32], strides = [1, 1]} : vector<2x96xf32> to vector<2x32xf32>
    %c3_59 = arith.constant 3 : index
    %c2_60 = arith.constant 2 : index
    %c0_61 = arith.constant 0 : index
    %c0_62 = arith.constant 0 : index
    %70 = vector.load %arg4[%c3_59, %c2_60, %c0_61, %c0_62] : memref<8x3x2x32xf32, #tpu.memory_space<vmem>>, vector<1x1x2x32xf32>
    %71 = vector.shape_cast %70 : vector<1x1x2x32xf32> to vector<2x32xf32>
    %72 = vector.shape_cast %69 : vector<2x32xf32> to vector<1x1x2x32xf32>
    tpu.vector_store %arg4[%c3_59, %c2_60, %c0_61, %c0_62], %72 {strides = array<i32>} : memref<8x3x2x32xf32, #tpu.memory_space<vmem>>, vector<1x1x2x32xf32>,
    %c4 = arith.constant 4 : index
    %c0_63 = arith.constant 0 : index
    %c0_64 = arith.constant 0 : index
    %73 = vector.load %arg1[%c4, %c0_63, %c0_64] : memref<8x2x32xf32, #tpu.memory_space<vmem>>, vector<1x2x32xf32>
    %74 = vector.shape_cast %73 : vector<1x2x32xf32> to vector<2x32xf32>
    %75 = arith.truncf %74 : vector<2x32xf32> to vector<2x32xbf16>
    %cst_65 = arith.constant dense<0.000000e+00> : vector<2x96xf32>
    %76 = tpu.matmul %75, %1, %cst_65 {dimension_numbers = #tpu.dot_dimension_numbers<[1], [0], [0], [1], [0, 0, 1, 1], [], []>} : vector<2x32xbf16>, vector<32x96xbf16>, vector<2x96xf32> -> vector<2x96xf32>
    %77 = arith.addf %76, %4 : vector<2x96xf32>
    %78 = vector.extract_strided_slice %77 {offsets = [0, 0], sizes = [2, 32], strides = [1, 1]} : vector<2x96xf32> to vector<2x32xf32>
    %c4_66 = arith.constant 4 : index
    %c0_67 = arith.constant 0 : index
    %c0_68 = arith.constant 0 : index
    %c0_69 = arith.constant 0 : index
    %79 = vector.load %arg4[%c4_66, %c0_67, %c0_68, %c0_69] : memref<8x3x2x32xf32, #tpu.memory_space<vmem>>, vector<1x1x2x32xf32>
    %80 = vector.shape_cast %79 : vector<1x1x2x32xf32> to vector<2x32xf32>
    %81 = vector.shape_cast %78 : vector<2x32xf32> to vector<1x1x2x32xf32>
    tpu.vector_store %arg4[%c4_66, %c0_67, %c0_68, %c0_69], %81 {strides = array<i32>} : memref<8x3x2x32xf32, #tpu.memory_space<vmem>>, vector<1x1x2x32xf32>,
    %82 = vector.extract_strided_slice %77 {offsets = [0, 32], sizes = [2, 32], strides = [1, 1]} : vector<2x96xf32> to vector<2x32xf32>
    %c4_70 = arith.constant 4 : index
    %c1_71 = arith.constant 1 : index
    %c0_72 = arith.constant 0 : index
    %c0_73 = arith.constant 0 : index
    %83 = vector.load %arg4[%c4_70, %c1_71, %c0_72, %c0_73] : memref<8x3x2x32xf32, #tpu.memory_space<vmem>>, vector<1x1x2x32xf32>
    %84 = vector.shape_cast %83 : vector<1x1x2x32xf32> to vector<2x32xf32>
    %85 = vector.shape_cast %82 : vector<2x32xf32> to vector<1x1x2x32xf32>
    tpu.vector_store %arg4[%c4_70, %c1_71, %c0_72, %c0_73], %85 {strides = array<i32>} : memref<8x3x2x32xf32, #tpu.memory_space<vmem>>, vector<1x1x2x32xf32>,
    %86 = vector.extract_strided_slice %77 {offsets = [0, 64], sizes = [2, 32], strides = [1, 1]} : vector<2x96xf32> to vector<2x32xf32>
    %c4_74 = arith.constant 4 : index
    %c2_75 = arith.constant 2 : index
    %c0_76 = arith.constant 0 : index
    %c0_77 = arith.constant 0 : index
    %87 = vector.load %arg4[%c4_74, %c2_75, %c0_76, %c0_77] : memref<8x3x2x32xf32, #tpu.memory_space<vmem>>, vector<1x1x2x32xf32>
    %88 = vector.shape_cast %87 : vector<1x1x2x32xf32> to vector<2x32xf32>
    %89 = vector.shape_cast %86 : vector<2x32xf32> to vector<1x1x2x32xf32>
    tpu.vector_store %arg4[%c4_74, %c2_75, %c0_76, %c0_77], %89 {strides = array<i32>} : memref<8x3x2x32xf32, #tpu.memory_space<vmem>>, vector<1x1x2x32xf32>,
    %c5 = arith.constant 5 : index
    %c0_78 = arith.constant 0 : index
    %c0_79 = arith.constant 0 : index
    %90 = vector.load %arg1[%c5, %c0_78, %c0_79] : memref<8x2x32xf32, #tpu.memory_space<vmem>>, vector<1x2x32xf32>
    %91 = vector.shape_cast %90 : vector<1x2x32xf32> to vector<2x32xf32>
    %92 = arith.truncf %91 : vector<2x32xf32> to vector<2x32xbf16>
    %cst_80 = arith.constant dense<0.000000e+00> : vector<2x96xf32>
    %93 = tpu.matmul %92, %1, %cst_80 {dimension_numbers = #tpu.dot_dimension_numbers<[1], [0], [0], [1], [0, 0, 1, 1], [], []>} : vector<2x32xbf16>, vector<32x96xbf16>, vector<2x96xf32> -> vector<2x96xf32>
    %94 = arith.addf %93, %4 : vector<2x96xf32>
    %95 = vector.extract_strided_slice %94 {offsets = [0, 0], sizes = [2, 32], strides = [1, 1]} : vector<2x96xf32> to vector<2x32xf32>
    %c5_81 = arith.constant 5 : index
    %c0_82 = arith.constant 0 : index
    %c0_83 = arith.constant 0 : index
    %c0_84 = arith.constant 0 : index
    %96 = vector.load %arg4[%c5_81, %c0_82, %c0_83, %c0_84] : memref<8x3x2x32xf32, #tpu.memory_space<vmem>>, vector<1x1x2x32xf32>
    %97 = vector.shape_cast %96 : vector<1x1x2x32xf32> to vector<2x32xf32>
    %98 = vector.shape_cast %95 : vector<2x32xf32> to vector<1x1x2x32xf32>
    tpu.vector_store %arg4[%c5_81, %c0_82, %c0_83, %c0_84], %98 {strides = array<i32>} : memref<8x3x2x32xf32, #tpu.memory_space<vmem>>, vector<1x1x2x32xf32>,
    %99 = vector.extract_strided_slice %94 {offsets = [0, 32], sizes = [2, 32], strides = [1, 1]} : vector<2x96xf32> to vector<2x32xf32>
    %c5_85 = arith.constant 5 : index
    %c1_86 = arith.constant 1 : index
    %c0_87 = arith.constant 0 : index
    %c0_88 = arith.constant 0 : index
    %100 = vector.load %arg4[%c5_85, %c1_86, %c0_87, %c0_88] : memref<8x3x2x32xf32, #tpu.memory_space<vmem>>, vector<1x1x2x32xf32>
    %101 = vector.shape_cast %100 : vector<1x1x2x32xf32> to vector<2x32xf32>
    %102 = vector.shape_cast %99 : vector<2x32xf32> to vector<1x1x2x32xf32>
    tpu.vector_store %arg4[%c5_85, %c1_86, %c0_87, %c0_88], %102 {strides = array<i32>} : memref<8x3x2x32xf32, #tpu.memory_space<vmem>>, vector<1x1x2x32xf32>,
    %103 = vector.extract_strided_slice %94 {offsets = [0, 64], sizes = [2, 32], strides = [1, 1]} : vector<2x96xf32> to vector<2x32xf32>
    %c5_89 = arith.constant 5 : index
    %c2_90 = arith.constant 2 : index
    %c0_91 = arith.constant 0 : index
    %c0_92 = arith.constant 0 : index
    %104 = vector.load %arg4[%c5_89, %c2_90, %c0_91, %c0_92] : memref<8x3x2x32xf32, #tpu.memory_space<vmem>>, vector<1x1x2x32xf32>
    %105 = vector.shape_cast %104 : vector<1x1x2x32xf32> to vector<2x32xf32>
    %106 = vector.shape_cast %103 : vector<2x32xf32> to vector<1x1x2x32xf32>
    tpu.vector_store %arg4[%c5_89, %c2_90, %c0_91, %c0_92], %106 {strides = array<i32>} : memref<8x3x2x32xf32, #tpu.memory_space<vmem>>, vector<1x1x2x32xf32>,
    %c6 = arith.constant 6 : index
    %c0_93 = arith.constant 0 : index
    %c0_94 = arith.constant 0 : index
    %107 = vector.load %arg1[%c6, %c0_93, %c0_94] : memref<8x2x32xf32, #tpu.memory_space<vmem>>, vector<1x2x32xf32>
    %108 = vector.shape_cast %107 : vector<1x2x32xf32> to vector<2x32xf32>
    %109 = arith.truncf %108 : vector<2x32xf32> to vector<2x32xbf16>
    %cst_95 = arith.constant dense<0.000000e+00> : vector<2x96xf32>
    %110 = tpu.matmul %109, %1, %cst_95 {dimension_numbers = #tpu.dot_dimension_numbers<[1], [0], [0], [1], [0, 0, 1, 1], [], []>} : vector<2x32xbf16>, vector<32x96xbf16>, vector<2x96xf32> -> vector<2x96xf32>
    %111 = arith.addf %110, %4 : vector<2x96xf32>
    %112 = vector.extract_strided_slice %111 {offsets = [0, 0], sizes = [2, 32], strides = [1, 1]} : vector<2x96xf32> to vector<2x32xf32>
    %c6_96 = arith.constant 6 : index
    %c0_97 = arith.constant 0 : index
    %c0_98 = arith.constant 0 : index
    %c0_99 = arith.constant 0 : index
    %113 = vector.load %arg4[%c6_96, %c0_97, %c0_98, %c0_99] : memref<8x3x2x32xf32, #tpu.memory_space<vmem>>, vector<1x1x2x32xf32>
    %114 = vector.shape_cast %113 : vector<1x1x2x32xf32> to vector<2x32xf32>
    %115 = vector.shape_cast %112 : vector<2x32xf32> to vector<1x1x2x32xf32>
    tpu.vector_store %arg4[%c6_96, %c0_97, %c0_98, %c0_99], %115 {strides = array<i32>} : memref<8x3x2x32xf32, #tpu.memory_space<vmem>>, vector<1x1x2x32xf32>,
    %116 = vector.extract_strided_slice %111 {offsets = [0, 32], sizes = [2, 32], strides = [1, 1]} : vector<2x96xf32> to vector<2x32xf32>
    %c6_100 = arith.constant 6 : index
    %c1_101 = arith.constant 1 : index
    %c0_102 = arith.constant 0 : index
    %c0_103 = arith.constant 0 : index
    %117 = vector.load %arg4[%c6_100, %c1_101, %c0_102, %c0_103] : memref<8x3x2x32xf32, #tpu.memory_space<vmem>>, vector<1x1x2x32xf32>
    %118 = vector.shape_cast %117 : vector<1x1x2x32xf32> to vector<2x32xf32>
    %119 = vector.shape_cast %116 : vector<2x32xf32> to vector<1x1x2x32xf32>
    tpu.vector_store %arg4[%c6_100, %c1_101, %c0_102, %c0_103], %119 {strides = array<i32>} : memref<8x3x2x32xf32, #tpu.memory_space<vmem>>, vector<1x1x2x32xf32>,
    %120 = vector.extract_strided_slice %111 {offsets = [0, 64], sizes = [2, 32], strides = [1, 1]} : vector<2x96xf32> to vector<2x32xf32>
    %c6_104 = arith.constant 6 : index
    %c2_105 = arith.constant 2 : index
    %c0_106 = arith.constant 0 : index
    %c0_107 = arith.constant 0 : index
    %121 = vector.load %arg4[%c6_104, %c2_105, %c0_106, %c0_107] : memref<8x3x2x32xf32, #tpu.memory_space<vmem>>, vector<1x1x2x32xf32>
    %122 = vector.shape_cast %121 : vector<1x1x2x32xf32> to vector<2x32xf32>
    %123 = vector.shape_cast %120 : vector<2x32xf32> to vector<1x1x2x32xf32>
    tpu.vector_store %arg4[%c6_104, %c2_105, %c0_106, %c0_107], %123 {strides = array<i32>} : memref<8x3x2x32xf32, #tpu.memory_space<vmem>>, vector<1x1x2x32xf32>,
    %c7 = arith.constant 7 : index
    %c0_108 = arith.constant 0 : index
    %c0_109 = arith.constant 0 : index
    %124 = vector.load %arg1[%c7, %c0_108, %c0_109] : memref<8x2x32xf32, #tpu.memory_space<vmem>>, vector<1x2x32xf32>
    %125 = vector.shape_cast %124 : vector<1x2x32xf32> to vector<2x32xf32>
    %126 = arith.truncf %125 : vector<2x32xf32> to vector<2x32xbf16>
    %cst_110 = arith.constant dense<0.000000e+00> : vector<2x96xf32>
    %127 = tpu.matmul %126, %1, %cst_110 {dimension_numbers = #tpu.dot_dimension_numbers<[1], [0], [0], [1], [0, 0, 1, 1], [], []>} : vector<2x32xbf16>, vector<32x96xbf16>, vector<2x96xf32> -> vector<2x96xf32>
    %128 = arith.addf %127, %4 : vector<2x96xf32>
    %129 = vector.extract_strided_slice %128 {offsets = [0, 0], sizes = [2, 32], strides = [1, 1]} : vector<2x96xf32> to vector<2x32xf32>
    %c7_111 = arith.constant 7 : index
    %c0_112 = arith.constant 0 : index
    %c0_113 = arith.constant 0 : index
    %c0_114 = arith.constant 0 : index
    %130 = vector.load %arg4[%c7_111, %c0_112, %c0_113, %c0_114] : memref<8x3x2x32xf32, #tpu.memory_space<vmem>>, vector<1x1x2x32xf32>
    %131 = vector.shape_cast %130 : vector<1x1x2x32xf32> to vector<2x32xf32>
    %132 = vector.shape_cast %129 : vector<2x32xf32> to vector<1x1x2x32xf32>
    tpu.vector_store %arg4[%c7_111, %c0_112, %c0_113, %c0_114], %132 {strides = array<i32>} : memref<8x3x2x32xf32, #tpu.memory_space<vmem>>, vector<1x1x2x32xf32>,
    %133 = vector.extract_strided_slice %128 {offsets = [0, 32], sizes = [2, 32], strides = [1, 1]} : vector<2x96xf32> to vector<2x32xf32>
    %c7_115 = arith.constant 7 : index
    %c1_116 = arith.constant 1 : index
    %c0_117 = arith.constant 0 : index
    %c0_118 = arith.constant 0 : index
    %134 = vector.load %arg4[%c7_115, %c1_116, %c0_117, %c0_118] : memref<8x3x2x32xf32, #tpu.memory_space<vmem>>, vector<1x1x2x32xf32>
    %135 = vector.shape_cast %134 : vector<1x1x2x32xf32> to vector<2x32xf32>
    %136 = vector.shape_cast %133 : vector<2x32xf32> to vector<1x1x2x32xf32>
    tpu.vector_store %arg4[%c7_115, %c1_116, %c0_117, %c0_118], %136 {strides = array<i32>} : memref<8x3x2x32xf32, #tpu.memory_space<vmem>>, vector<1x1x2x32xf32>,
    %137 = vector.extract_strided_slice %128 {offsets = [0, 64], sizes = [2, 32], strides = [1, 1]} : vector<2x96xf32> to vector<2x32xf32>
    %c7_119 = arith.constant 7 : index
    %c2_120 = arith.constant 2 : index
    %c0_121 = arith.constant 0 : index
    %c0_122 = arith.constant 0 : index
    %138 = vector.load %arg4[%c7_119, %c2_120, %c0_121, %c0_122] : memref<8x3x2x32xf32, #tpu.memory_space<vmem>>, vector<1x1x2x32xf32>
    %139 = vector.shape_cast %138 : vector<1x1x2x32xf32> to vector<2x32xf32>
    %140 = vector.shape_cast %137 : vector<2x32xf32> to vector<1x1x2x32xf32>
    tpu.vector_store %arg4[%c7_119, %c2_120, %c0_121, %c0_122], %140 {strides = array<i32>} : memref<8x3x2x32xf32, #tpu.memory_space<vmem>>, vector<1x1x2x32xf32>,
    return
  }
  func.func @transform_0(%arg0: i32) -> (i32, i32, i32) {
    %c0_i32 = arith.constant 0 : i32
    %c0_i32_0 = arith.constant 0 : i32
    %c0_i32_1 = arith.constant 0 : i32
    return %arg0, %c0_i32, %c0_i32_0 : i32, i32, i32
  }
  func.func @transform_1(%arg0: i32) -> (i32, i32) {
    %c0_i32 = arith.constant 0 : i32
    %c0_i32_0 = arith.constant 0 : i32
    %c0_i32_1 = arith.constant 0 : i32
    return %c0_i32, %c0_i32_0 : i32, i32
  }
  func.func @transform_2(%arg0: i32) -> (i32, i32) {
    %c0_i32 = arith.constant 0 : i32
    %c0_i32_0 = arith.constant 0 : i32
    %c0_i32_1 = arith.constant 0 : i32
    return %c0_i32, %c0_i32_0 : i32, i32
  }
  func.func @transform_3(%arg0: i32) -> (i32, i32, i32, i32) {
    %c0_i32 = arith.constant 0 : i32
    %c0_i32_0 = arith.constant 0 : i32
    %c0_i32_1 = arith.constant 0 : i32
    %c0_i32_2 = arith.constant 0 : i32
    return %arg0, %c0_i32, %c0_i32_0, %c0_i32_1 : i32, i32, i32, i32
  }
}

module attributes {stable_mosaic.version = 11 : i64} {
  func.func @_proj_kernel(%arg0: i32, %arg1: memref<8x2x32xf32, #tpu.memory_space<vmem>>, %arg2: memref<32x96xf32, #tpu.memory_space<vmem>>, %arg3: memref<2x96xf32, #tpu.memory_space<vmem>>, %arg4: memref<8x3x2x32xf32, #tpu.memory_space<vmem>>) attributes {dimension_semantics = [#tpu.dimension_semantics<parallel>], iteration_bounds = array<i64: 1>, scalar_prefetch = 0 : i64, scratch_operands = 0 : i64, tpu.core_type = #tpu.core_type<tc>, window_params = [{transform_indices = @transform_0, window_bounds = array<i64: 8, 2, 32>}, {pipeline_mode = #tpu.pipeline_mode<synchronous>, transform_indices = @transform_1, window_bounds = array<i64: 32, 96>}, {pipeline_mode = #tpu.pipeline_mode<synchronous>, transform_indices = @transform_2, window_bounds = array<i64: 2, 96>}, {transform_indices = @transform_3, window_bounds = array<i64: 8, 3, 2, 32>}]} {
    %c0 = arith.constant 0 : index
    %c0_0 = arith.constant 0 : index
    %0 = vector.load %arg2[%c0, %c0_0] : memref<32x96xf32, #tpu.memory_space<vmem>>, vector<32x96xf32>
    %1 = arith.truncf %0 : vector<32x96xf32> to vector<32x96xbf16>
    %c0_1 = arith.constant 0 : index
    %c0_2 = arith.constant 0 : index
    %2 = vector.load %arg3[%c0_1, %c0_2] : memref<2x96xf32, #tpu.memory_space<vmem>>, vector<2x96xf32>
    %c0_3 = arith.constant 0 : index
    %c0_4 = arith.constant 0 : index
    %c0_5 = arith.constant 0 : index
    %3 = vector.load %arg1[%c0_3, %c0_4, %c0_5] : memref<8x2x32xf32, #tpu.memory_space<vmem>>, vector<1x2x32xf32>
    %4 = vector.shape_cast %3 : vector<1x2x32xf32> to vector<2x32xf32>
    %5 = arith.truncf %4 : vector<2x32xf32> to vector<2x32xbf16>
    %cst = arith.constant dense<0.000000e+00> : vector<2x96xf32>
    %6 = tpu.matmul %5, %1, %cst {dimension_numbers = #tpu.dot_dimension_numbers<[1], [0], [0], [1], [0, 0, 1, 1], [], []>} : vector<2x32xbf16>, vector<32x96xbf16>, vector<2x96xf32> -> vector<2x96xf32>
    %7 = arith.addf %6, %2 : vector<2x96xf32>
    %8 = vector.extract_strided_slice %7 {offsets = [0, 0], sizes = [2, 32], strides = [1, 1]} : vector<2x96xf32> to vector<2x32xf32>
    %c0_6 = arith.constant 0 : index
    %c0_7 = arith.constant 0 : index
    %c0_8 = arith.constant 0 : index
    %c0_9 = arith.constant 0 : index
    %9 = vector.load %arg4[%c0_6, %c0_7, %c0_8, %c0_9] : memref<8x3x2x32xf32, #tpu.memory_space<vmem>>, vector<1x1x2x32xf32>
    %10 = vector.shape_cast %9 : vector<1x1x2x32xf32> to vector<2x32xf32>
    %11 = vector.shape_cast %8 : vector<2x32xf32> to vector<1x1x2x32xf32>
    tpu.vector_store %arg4[%c0_6, %c0_7, %c0_8, %c0_9], %11 {strides = array<i32>} : memref<8x3x2x32xf32, #tpu.memory_space<vmem>>, vector<1x1x2x32xf32>,
    %12 = vector.extract_strided_slice %7 {offsets = [0, 32], sizes = [2, 32], strides = [1, 1]} : vector<2x96xf32> to vector<2x32xf32>
    %c0_10 = arith.constant 0 : index
    %c1 = arith.constant 1 : index
    %c0_11 = arith.constant 0 : index
    %c0_12 = arith.constant 0 : index
    %13 = vector.load %arg4[%c0_10, %c1, %c0_11, %c0_12] : memref<8x3x2x32xf32, #tpu.memory_space<vmem>>, vector<1x1x2x32xf32>
    %14 = vector.shape_cast %13 : vector<1x1x2x32xf32> to vector<2x32xf32>
    %15 = vector.shape_cast %12 : vector<2x32xf32> to vector<1x1x2x32xf32>
    tpu.vector_store %arg4[%c0_10, %c1, %c0_11, %c0_12], %15 {strides = array<i32>} : memref<8x3x2x32xf32, #tpu.memory_space<vmem>>, vector<1x1x2x32xf32>,
    %16 = vector.extract_strided_slice %7 {offsets = [0, 64], sizes = [2, 32], strides = [1, 1]} : vector<2x96xf32> to vector<2x32xf32>
    %c0_13 = arith.constant 0 : index
    %c2 = arith.constant 2 : index
    %c0_14 = arith.constant 0 : index
    %c0_15 = arith.constant 0 : index
    %17 = vector.load %arg4[%c0_13, %c2, %c0_14, %c0_15] : memref<8x3x2x32xf32, #tpu.memory_space<vmem>>, vector<1x1x2x32xf32>
    %18 = vector.shape_cast %17 : vector<1x1x2x32xf32> to vector<2x32xf32>
    %19 = vector.shape_cast %16 : vector<2x32xf32> to vector<1x1x2x32xf32>
    tpu.vector_store %arg4[%c0_13, %c2, %c0_14, %c0_15], %19 {strides = array<i32>} : memref<8x3x2x32xf32, #tpu.memory_space<vmem>>, vector<1x1x2x32xf32>,
    %c1_16 = arith.constant 1 : index
    %c0_17 = arith.constant 0 : index
    %c0_18 = arith.constant 0 : index
    %20 = vector.load %arg1[%c1_16, %c0_17, %c0_18] : memref<8x2x32xf32, #tpu.memory_space<vmem>>, vector<1x2x32xf32>
    %21 = vector.shape_cast %20 : vector<1x2x32xf32> to vector<2x32xf32>
    %22 = arith.truncf %21 : vector<2x32xf32> to vector<2x32xbf16>
    %cst_19 = arith.constant dense<0.000000e+00> : vector<2x96xf32>
    %23 = tpu.matmul %22, %1, %cst_19 {dimension_numbers = #tpu.dot_dimension_numbers<[1], [0], [0], [1], [0, 0, 1, 1], [], []>} : vector<2x32xbf16>, vector<32x96xbf16>, vector<2x96xf32> -> vector<2x96xf32>
    %24 = arith.addf %23, %2 : vector<2x96xf32>
    %25 = vector.extract_strided_slice %24 {offsets = [0, 0], sizes = [2, 32], strides = [1, 1]} : vector<2x96xf32> to vector<2x32xf32>
    %c1_20 = arith.constant 1 : index
    %c0_21 = arith.constant 0 : index
    %c0_22 = arith.constant 0 : index
    %c0_23 = arith.constant 0 : index
    %26 = vector.load %arg4[%c1_20, %c0_21, %c0_22, %c0_23] : memref<8x3x2x32xf32, #tpu.memory_space<vmem>>, vector<1x1x2x32xf32>
    %27 = vector.shape_cast %26 : vector<1x1x2x32xf32> to vector<2x32xf32>
    %28 = vector.shape_cast %25 : vector<2x32xf32> to vector<1x1x2x32xf32>
    tpu.vector_store %arg4[%c1_20, %c0_21, %c0_22, %c0_23], %28 {strides = array<i32>} : memref<8x3x2x32xf32, #tpu.memory_space<vmem>>, vector<1x1x2x32xf32>,
    %29 = vector.extract_strided_slice %24 {offsets = [0, 32], sizes = [2, 32], strides = [1, 1]} : vector<2x96xf32> to vector<2x32xf32>
    %c1_24 = arith.constant 1 : index
    %c1_25 = arith.constant 1 : index
    %c0_26 = arith.constant 0 : index
    %c0_27 = arith.constant 0 : index
    %30 = vector.load %arg4[%c1_24, %c1_25, %c0_26, %c0_27] : memref<8x3x2x32xf32, #tpu.memory_space<vmem>>, vector<1x1x2x32xf32>
    %31 = vector.shape_cast %30 : vector<1x1x2x32xf32> to vector<2x32xf32>
    %32 = vector.shape_cast %29 : vector<2x32xf32> to vector<1x1x2x32xf32>
    tpu.vector_store %arg4[%c1_24, %c1_25, %c0_26, %c0_27], %32 {strides = array<i32>} : memref<8x3x2x32xf32, #tpu.memory_space<vmem>>, vector<1x1x2x32xf32>,
    %33 = vector.extract_strided_slice %24 {offsets = [0, 64], sizes = [2, 32], strides = [1, 1]} : vector<2x96xf32> to vector<2x32xf32>
    %c1_28 = arith.constant 1 : index
    %c2_29 = arith.constant 2 : index
    %c0_30 = arith.constant 0 : index
    %c0_31 = arith.constant 0 : index
    %34 = vector.load %arg4[%c1_28, %c2_29, %c0_30, %c0_31] : memref<8x3x2x32xf32, #tpu.memory_space<vmem>>, vector<1x1x2x32xf32>
    %35 = vector.shape_cast %34 : vector<1x1x2x32xf32> to vector<2x32xf32>
    %36 = vector.shape_cast %33 : vector<2x32xf32> to vector<1x1x2x32xf32>
    tpu.vector_store %arg4[%c1_28, %c2_29, %c0_30, %c0_31], %36 {strides = array<i32>} : memref<8x3x2x32xf32, #tpu.memory_space<vmem>>, vector<1x1x2x32xf32>,
    %c2_32 = arith.constant 2 : index
    %c0_33 = arith.constant 0 : index
    %c0_34 = arith.constant 0 : index
    %37 = vector.load %arg1[%c2_32, %c0_33, %c0_34] : memref<8x2x32xf32, #tpu.memory_space<vmem>>, vector<1x2x32xf32>
    %38 = vector.shape_cast %37 : vector<1x2x32xf32> to vector<2x32xf32>
    %39 = arith.truncf %38 : vector<2x32xf32> to vector<2x32xbf16>
    %cst_35 = arith.constant dense<0.000000e+00> : vector<2x96xf32>
    %40 = tpu.matmul %39, %1, %cst_35 {dimension_numbers = #tpu.dot_dimension_numbers<[1], [0], [0], [1], [0, 0, 1, 1], [], []>} : vector<2x32xbf16>, vector<32x96xbf16>, vector<2x96xf32> -> vector<2x96xf32>
    %41 = arith.addf %40, %2 : vector<2x96xf32>
    %42 = vector.extract_strided_slice %41 {offsets = [0, 0], sizes = [2, 32], strides = [1, 1]} : vector<2x96xf32> to vector<2x32xf32>
    %c2_36 = arith.constant 2 : index
    %c0_37 = arith.constant 0 : index
    %c0_38 = arith.constant 0 : index
    %c0_39 = arith.constant 0 : index
    %43 = vector.load %arg4[%c2_36, %c0_37, %c0_38, %c0_39] : memref<8x3x2x32xf32, #tpu.memory_space<vmem>>, vector<1x1x2x32xf32>
    %44 = vector.shape_cast %43 : vector<1x1x2x32xf32> to vector<2x32xf32>
    %45 = vector.shape_cast %42 : vector<2x32xf32> to vector<1x1x2x32xf32>
    tpu.vector_store %arg4[%c2_36, %c0_37, %c0_38, %c0_39], %45 {strides = array<i32>} : memref<8x3x2x32xf32, #tpu.memory_space<vmem>>, vector<1x1x2x32xf32>,
    %46 = vector.extract_strided_slice %41 {offsets = [0, 32], sizes = [2, 32], strides = [1, 1]} : vector<2x96xf32> to vector<2x32xf32>
    %c2_40 = arith.constant 2 : index
    %c1_41 = arith.constant 1 : index
    %c0_42 = arith.constant 0 : index
    %c0_43 = arith.constant 0 : index
    %47 = vector.load %arg4[%c2_40, %c1_41, %c0_42, %c0_43] : memref<8x3x2x32xf32, #tpu.memory_space<vmem>>, vector<1x1x2x32xf32>
    %48 = vector.shape_cast %47 : vector<1x1x2x32xf32> to vector<2x32xf32>
    %49 = vector.shape_cast %46 : vector<2x32xf32> to vector<1x1x2x32xf32>
    tpu.vector_store %arg4[%c2_40, %c1_41, %c0_42, %c0_43], %49 {strides = array<i32>} : memref<8x3x2x32xf32, #tpu.memory_space<vmem>>, vector<1x1x2x32xf32>,
    %50 = vector.extract_strided_slice %41 {offsets = [0, 64], sizes = [2, 32], strides = [1, 1]} : vector<2x96xf32> to vector<2x32xf32>
    %c2_44 = arith.constant 2 : index
    %c2_45 = arith.constant 2 : index
    %c0_46 = arith.constant 0 : index
    %c0_47 = arith.constant 0 : index
    %51 = vector.load %arg4[%c2_44, %c2_45, %c0_46, %c0_47] : memref<8x3x2x32xf32, #tpu.memory_space<vmem>>, vector<1x1x2x32xf32>
    %52 = vector.shape_cast %51 : vector<1x1x2x32xf32> to vector<2x32xf32>
    %53 = vector.shape_cast %50 : vector<2x32xf32> to vector<1x1x2x32xf32>
    tpu.vector_store %arg4[%c2_44, %c2_45, %c0_46, %c0_47], %53 {strides = array<i32>} : memref<8x3x2x32xf32, #tpu.memory_space<vmem>>, vector<1x1x2x32xf32>,
    %c3 = arith.constant 3 : index
    %c0_48 = arith.constant 0 : index
    %c0_49 = arith.constant 0 : index
    %54 = vector.load %arg1[%c3, %c0_48, %c0_49] : memref<8x2x32xf32, #tpu.memory_space<vmem>>, vector<1x2x32xf32>
    %55 = vector.shape_cast %54 : vector<1x2x32xf32> to vector<2x32xf32>
    %56 = arith.truncf %55 : vector<2x32xf32> to vector<2x32xbf16>
    %cst_50 = arith.constant dense<0.000000e+00> : vector<2x96xf32>
    %57 = tpu.matmul %56, %1, %cst_50 {dimension_numbers = #tpu.dot_dimension_numbers<[1], [0], [0], [1], [0, 0, 1, 1], [], []>} : vector<2x32xbf16>, vector<32x96xbf16>, vector<2x96xf32> -> vector<2x96xf32>
    %58 = arith.addf %57, %2 : vector<2x96xf32>
    %59 = vector.extract_strided_slice %58 {offsets = [0, 0], sizes = [2, 32], strides = [1, 1]} : vector<2x96xf32> to vector<2x32xf32>
    %c3_51 = arith.constant 3 : index
    %c0_52 = arith.constant 0 : index
    %c0_53 = arith.constant 0 : index
    %c0_54 = arith.constant 0 : index
    %60 = vector.load %arg4[%c3_51, %c0_52, %c0_53, %c0_54] : memref<8x3x2x32xf32, #tpu.memory_space<vmem>>, vector<1x1x2x32xf32>
    %61 = vector.shape_cast %60 : vector<1x1x2x32xf32> to vector<2x32xf32>
    %62 = vector.shape_cast %59 : vector<2x32xf32> to vector<1x1x2x32xf32>
    tpu.vector_store %arg4[%c3_51, %c0_52, %c0_53, %c0_54], %62 {strides = array<i32>} : memref<8x3x2x32xf32, #tpu.memory_space<vmem>>, vector<1x1x2x32xf32>,
    %63 = vector.extract_strided_slice %58 {offsets = [0, 32], sizes = [2, 32], strides = [1, 1]} : vector<2x96xf32> to vector<2x32xf32>
    %c3_55 = arith.constant 3 : index
    %c1_56 = arith.constant 1 : index
    %c0_57 = arith.constant 0 : index
    %c0_58 = arith.constant 0 : index
    %64 = vector.load %arg4[%c3_55, %c1_56, %c0_57, %c0_58] : memref<8x3x2x32xf32, #tpu.memory_space<vmem>>, vector<1x1x2x32xf32>
    %65 = vector.shape_cast %64 : vector<1x1x2x32xf32> to vector<2x32xf32>
    %66 = vector.shape_cast %63 : vector<2x32xf32> to vector<1x1x2x32xf32>
    tpu.vector_store %arg4[%c3_55, %c1_56, %c0_57, %c0_58], %66 {strides = array<i32>} : memref<8x3x2x32xf32, #tpu.memory_space<vmem>>, vector<1x1x2x32xf32>,
    %67 = vector.extract_strided_slice %58 {offsets = [0, 64], sizes = [2, 32], strides = [1, 1]} : vector<2x96xf32> to vector<2x32xf32>
    %c3_59 = arith.constant 3 : index
    %c2_60 = arith.constant 2 : index
    %c0_61 = arith.constant 0 : index
    %c0_62 = arith.constant 0 : index
    %68 = vector.load %arg4[%c3_59, %c2_60, %c0_61, %c0_62] : memref<8x3x2x32xf32, #tpu.memory_space<vmem>>, vector<1x1x2x32xf32>
    %69 = vector.shape_cast %68 : vector<1x1x2x32xf32> to vector<2x32xf32>
    %70 = vector.shape_cast %67 : vector<2x32xf32> to vector<1x1x2x32xf32>
    tpu.vector_store %arg4[%c3_59, %c2_60, %c0_61, %c0_62], %70 {strides = array<i32>} : memref<8x3x2x32xf32, #tpu.memory_space<vmem>>, vector<1x1x2x32xf32>,
    %c4 = arith.constant 4 : index
    %c0_63 = arith.constant 0 : index
    %c0_64 = arith.constant 0 : index
    %71 = vector.load %arg1[%c4, %c0_63, %c0_64] : memref<8x2x32xf32, #tpu.memory_space<vmem>>, vector<1x2x32xf32>
    %72 = vector.shape_cast %71 : vector<1x2x32xf32> to vector<2x32xf32>
    %73 = arith.truncf %72 : vector<2x32xf32> to vector<2x32xbf16>
    %cst_65 = arith.constant dense<0.000000e+00> : vector<2x96xf32>
    %74 = tpu.matmul %73, %1, %cst_65 {dimension_numbers = #tpu.dot_dimension_numbers<[1], [0], [0], [1], [0, 0, 1, 1], [], []>} : vector<2x32xbf16>, vector<32x96xbf16>, vector<2x96xf32> -> vector<2x96xf32>
    %75 = arith.addf %74, %2 : vector<2x96xf32>
    %76 = vector.extract_strided_slice %75 {offsets = [0, 0], sizes = [2, 32], strides = [1, 1]} : vector<2x96xf32> to vector<2x32xf32>
    %c4_66 = arith.constant 4 : index
    %c0_67 = arith.constant 0 : index
    %c0_68 = arith.constant 0 : index
    %c0_69 = arith.constant 0 : index
    %77 = vector.load %arg4[%c4_66, %c0_67, %c0_68, %c0_69] : memref<8x3x2x32xf32, #tpu.memory_space<vmem>>, vector<1x1x2x32xf32>
    %78 = vector.shape_cast %77 : vector<1x1x2x32xf32> to vector<2x32xf32>
    %79 = vector.shape_cast %76 : vector<2x32xf32> to vector<1x1x2x32xf32>
    tpu.vector_store %arg4[%c4_66, %c0_67, %c0_68, %c0_69], %79 {strides = array<i32>} : memref<8x3x2x32xf32, #tpu.memory_space<vmem>>, vector<1x1x2x32xf32>,
    %80 = vector.extract_strided_slice %75 {offsets = [0, 32], sizes = [2, 32], strides = [1, 1]} : vector<2x96xf32> to vector<2x32xf32>
    %c4_70 = arith.constant 4 : index
    %c1_71 = arith.constant 1 : index
    %c0_72 = arith.constant 0 : index
    %c0_73 = arith.constant 0 : index
    %81 = vector.load %arg4[%c4_70, %c1_71, %c0_72, %c0_73] : memref<8x3x2x32xf32, #tpu.memory_space<vmem>>, vector<1x1x2x32xf32>
    %82 = vector.shape_cast %81 : vector<1x1x2x32xf32> to vector<2x32xf32>
    %83 = vector.shape_cast %80 : vector<2x32xf32> to vector<1x1x2x32xf32>
    tpu.vector_store %arg4[%c4_70, %c1_71, %c0_72, %c0_73], %83 {strides = array<i32>} : memref<8x3x2x32xf32, #tpu.memory_space<vmem>>, vector<1x1x2x32xf32>,
    %84 = vector.extract_strided_slice %75 {offsets = [0, 64], sizes = [2, 32], strides = [1, 1]} : vector<2x96xf32> to vector<2x32xf32>
    %c4_74 = arith.constant 4 : index
    %c2_75 = arith.constant 2 : index
    %c0_76 = arith.constant 0 : index
    %c0_77 = arith.constant 0 : index
    %85 = vector.load %arg4[%c4_74, %c2_75, %c0_76, %c0_77] : memref<8x3x2x32xf32, #tpu.memory_space<vmem>>, vector<1x1x2x32xf32>
    %86 = vector.shape_cast %85 : vector<1x1x2x32xf32> to vector<2x32xf32>
    %87 = vector.shape_cast %84 : vector<2x32xf32> to vector<1x1x2x32xf32>
    tpu.vector_store %arg4[%c4_74, %c2_75, %c0_76, %c0_77], %87 {strides = array<i32>} : memref<8x3x2x32xf32, #tpu.memory_space<vmem>>, vector<1x1x2x32xf32>,
    %c5 = arith.constant 5 : index
    %c0_78 = arith.constant 0 : index
    %c0_79 = arith.constant 0 : index
    %88 = vector.load %arg1[%c5, %c0_78, %c0_79] : memref<8x2x32xf32, #tpu.memory_space<vmem>>, vector<1x2x32xf32>
    %89 = vector.shape_cast %88 : vector<1x2x32xf32> to vector<2x32xf32>
    %90 = arith.truncf %89 : vector<2x32xf32> to vector<2x32xbf16>
    %cst_80 = arith.constant dense<0.000000e+00> : vector<2x96xf32>
    %91 = tpu.matmul %90, %1, %cst_80 {dimension_numbers = #tpu.dot_dimension_numbers<[1], [0], [0], [1], [0, 0, 1, 1], [], []>} : vector<2x32xbf16>, vector<32x96xbf16>, vector<2x96xf32> -> vector<2x96xf32>
    %92 = arith.addf %91, %2 : vector<2x96xf32>
    %93 = vector.extract_strided_slice %92 {offsets = [0, 0], sizes = [2, 32], strides = [1, 1]} : vector<2x96xf32> to vector<2x32xf32>
    %c5_81 = arith.constant 5 : index
    %c0_82 = arith.constant 0 : index
    %c0_83 = arith.constant 0 : index
    %c0_84 = arith.constant 0 : index
    %94 = vector.load %arg4[%c5_81, %c0_82, %c0_83, %c0_84] : memref<8x3x2x32xf32, #tpu.memory_space<vmem>>, vector<1x1x2x32xf32>
    %95 = vector.shape_cast %94 : vector<1x1x2x32xf32> to vector<2x32xf32>
    %96 = vector.shape_cast %93 : vector<2x32xf32> to vector<1x1x2x32xf32>
    tpu.vector_store %arg4[%c5_81, %c0_82, %c0_83, %c0_84], %96 {strides = array<i32>} : memref<8x3x2x32xf32, #tpu.memory_space<vmem>>, vector<1x1x2x32xf32>,
    %97 = vector.extract_strided_slice %92 {offsets = [0, 32], sizes = [2, 32], strides = [1, 1]} : vector<2x96xf32> to vector<2x32xf32>
    %c5_85 = arith.constant 5 : index
    %c1_86 = arith.constant 1 : index
    %c0_87 = arith.constant 0 : index
    %c0_88 = arith.constant 0 : index
    %98 = vector.load %arg4[%c5_85, %c1_86, %c0_87, %c0_88] : memref<8x3x2x32xf32, #tpu.memory_space<vmem>>, vector<1x1x2x32xf32>
    %99 = vector.shape_cast %98 : vector<1x1x2x32xf32> to vector<2x32xf32>
    %100 = vector.shape_cast %97 : vector<2x32xf32> to vector<1x1x2x32xf32>
    tpu.vector_store %arg4[%c5_85, %c1_86, %c0_87, %c0_88], %100 {strides = array<i32>} : memref<8x3x2x32xf32, #tpu.memory_space<vmem>>, vector<1x1x2x32xf32>,
    %101 = vector.extract_strided_slice %92 {offsets = [0, 64], sizes = [2, 32], strides = [1, 1]} : vector<2x96xf32> to vector<2x32xf32>
    %c5_89 = arith.constant 5 : index
    %c2_90 = arith.constant 2 : index
    %c0_91 = arith.constant 0 : index
    %c0_92 = arith.constant 0 : index
    %102 = vector.load %arg4[%c5_89, %c2_90, %c0_91, %c0_92] : memref<8x3x2x32xf32, #tpu.memory_space<vmem>>, vector<1x1x2x32xf32>
    %103 = vector.shape_cast %102 : vector<1x1x2x32xf32> to vector<2x32xf32>
    %104 = vector.shape_cast %101 : vector<2x32xf32> to vector<1x1x2x32xf32>
    tpu.vector_store %arg4[%c5_89, %c2_90, %c0_91, %c0_92], %104 {strides = array<i32>} : memref<8x3x2x32xf32, #tpu.memory_space<vmem>>, vector<1x1x2x32xf32>,
    %c6 = arith.constant 6 : index
    %c0_93 = arith.constant 0 : index
    %c0_94 = arith.constant 0 : index
    %105 = vector.load %arg1[%c6, %c0_93, %c0_94] : memref<8x2x32xf32, #tpu.memory_space<vmem>>, vector<1x2x32xf32>
    %106 = vector.shape_cast %105 : vector<1x2x32xf32> to vector<2x32xf32>
    %107 = arith.truncf %106 : vector<2x32xf32> to vector<2x32xbf16>
    %cst_95 = arith.constant dense<0.000000e+00> : vector<2x96xf32>
    %108 = tpu.matmul %107, %1, %cst_95 {dimension_numbers = #tpu.dot_dimension_numbers<[1], [0], [0], [1], [0, 0, 1, 1], [], []>} : vector<2x32xbf16>, vector<32x96xbf16>, vector<2x96xf32> -> vector<2x96xf32>
    %109 = arith.addf %108, %2 : vector<2x96xf32>
    %110 = vector.extract_strided_slice %109 {offsets = [0, 0], sizes = [2, 32], strides = [1, 1]} : vector<2x96xf32> to vector<2x32xf32>
    %c6_96 = arith.constant 6 : index
    %c0_97 = arith.constant 0 : index
    %c0_98 = arith.constant 0 : index
    %c0_99 = arith.constant 0 : index
    %111 = vector.load %arg4[%c6_96, %c0_97, %c0_98, %c0_99] : memref<8x3x2x32xf32, #tpu.memory_space<vmem>>, vector<1x1x2x32xf32>
    %112 = vector.shape_cast %111 : vector<1x1x2x32xf32> to vector<2x32xf32>
    %113 = vector.shape_cast %110 : vector<2x32xf32> to vector<1x1x2x32xf32>
    tpu.vector_store %arg4[%c6_96, %c0_97, %c0_98, %c0_99], %113 {strides = array<i32>} : memref<8x3x2x32xf32, #tpu.memory_space<vmem>>, vector<1x1x2x32xf32>,
    %114 = vector.extract_strided_slice %109 {offsets = [0, 32], sizes = [2, 32], strides = [1, 1]} : vector<2x96xf32> to vector<2x32xf32>
    %c6_100 = arith.constant 6 : index
    %c1_101 = arith.constant 1 : index
    %c0_102 = arith.constant 0 : index
    %c0_103 = arith.constant 0 : index
    %115 = vector.load %arg4[%c6_100, %c1_101, %c0_102, %c0_103] : memref<8x3x2x32xf32, #tpu.memory_space<vmem>>, vector<1x1x2x32xf32>
    %116 = vector.shape_cast %115 : vector<1x1x2x32xf32> to vector<2x32xf32>
    %117 = vector.shape_cast %114 : vector<2x32xf32> to vector<1x1x2x32xf32>
    tpu.vector_store %arg4[%c6_100, %c1_101, %c0_102, %c0_103], %117 {strides = array<i32>} : memref<8x3x2x32xf32, #tpu.memory_space<vmem>>, vector<1x1x2x32xf32>,
    %118 = vector.extract_strided_slice %109 {offsets = [0, 64], sizes = [2, 32], strides = [1, 1]} : vector<2x96xf32> to vector<2x32xf32>
    %c6_104 = arith.constant 6 : index
    %c2_105 = arith.constant 2 : index
    %c0_106 = arith.constant 0 : index
    %c0_107 = arith.constant 0 : index
    %119 = vector.load %arg4[%c6_104, %c2_105, %c0_106, %c0_107] : memref<8x3x2x32xf32, #tpu.memory_space<vmem>>, vector<1x1x2x32xf32>
    %120 = vector.shape_cast %119 : vector<1x1x2x32xf32> to vector<2x32xf32>
    %121 = vector.shape_cast %118 : vector<2x32xf32> to vector<1x1x2x32xf32>
    tpu.vector_store %arg4[%c6_104, %c2_105, %c0_106, %c0_107], %121 {strides = array<i32>} : memref<8x3x2x32xf32, #tpu.memory_space<vmem>>, vector<1x1x2x32xf32>,
    %c7 = arith.constant 7 : index
    %c0_108 = arith.constant 0 : index
    %c0_109 = arith.constant 0 : index
    %122 = vector.load %arg1[%c7, %c0_108, %c0_109] : memref<8x2x32xf32, #tpu.memory_space<vmem>>, vector<1x2x32xf32>
    %123 = vector.shape_cast %122 : vector<1x2x32xf32> to vector<2x32xf32>
    %124 = arith.truncf %123 : vector<2x32xf32> to vector<2x32xbf16>
    %cst_110 = arith.constant dense<0.000000e+00> : vector<2x96xf32>
    %125 = tpu.matmul %124, %1, %cst_110 {dimension_numbers = #tpu.dot_dimension_numbers<[1], [0], [0], [1], [0, 0, 1, 1], [], []>} : vector<2x32xbf16>, vector<32x96xbf16>, vector<2x96xf32> -> vector<2x96xf32>
    %126 = arith.addf %125, %2 : vector<2x96xf32>
    %127 = vector.extract_strided_slice %126 {offsets = [0, 0], sizes = [2, 32], strides = [1, 1]} : vector<2x96xf32> to vector<2x32xf32>
    %c7_111 = arith.constant 7 : index
    %c0_112 = arith.constant 0 : index
    %c0_113 = arith.constant 0 : index
    %c0_114 = arith.constant 0 : index
    %128 = vector.load %arg4[%c7_111, %c0_112, %c0_113, %c0_114] : memref<8x3x2x32xf32, #tpu.memory_space<vmem>>, vector<1x1x2x32xf32>
    %129 = vector.shape_cast %128 : vector<1x1x2x32xf32> to vector<2x32xf32>
    %130 = vector.shape_cast %127 : vector<2x32xf32> to vector<1x1x2x32xf32>
    tpu.vector_store %arg4[%c7_111, %c0_112, %c0_113, %c0_114], %130 {strides = array<i32>} : memref<8x3x2x32xf32, #tpu.memory_space<vmem>>, vector<1x1x2x32xf32>,
    %131 = vector.extract_strided_slice %126 {offsets = [0, 32], sizes = [2, 32], strides = [1, 1]} : vector<2x96xf32> to vector<2x32xf32>
    %c7_115 = arith.constant 7 : index
    %c1_116 = arith.constant 1 : index
    %c0_117 = arith.constant 0 : index
    %c0_118 = arith.constant 0 : index
    %132 = vector.load %arg4[%c7_115, %c1_116, %c0_117, %c0_118] : memref<8x3x2x32xf32, #tpu.memory_space<vmem>>, vector<1x1x2x32xf32>
    %133 = vector.shape_cast %132 : vector<1x1x2x32xf32> to vector<2x32xf32>
    %134 = vector.shape_cast %131 : vector<2x32xf32> to vector<1x1x2x32xf32>
    tpu.vector_store %arg4[%c7_115, %c1_116, %c0_117, %c0_118], %134 {strides = array<i32>} : memref<8x3x2x32xf32, #tpu.memory_space<vmem>>, vector<1x1x2x32xf32>,
    %135 = vector.extract_strided_slice %126 {offsets = [0, 64], sizes = [2, 32], strides = [1, 1]} : vector<2x96xf32> to vector<2x32xf32>
    %c7_119 = arith.constant 7 : index
    %c2_120 = arith.constant 2 : index
    %c0_121 = arith.constant 0 : index
    %c0_122 = arith.constant 0 : index
    %136 = vector.load %arg4[%c7_119, %c2_120, %c0_121, %c0_122] : memref<8x3x2x32xf32, #tpu.memory_space<vmem>>, vector<1x1x2x32xf32>
    %137 = vector.shape_cast %136 : vector<1x1x2x32xf32> to vector<2x32xf32>
    %138 = vector.shape_cast %135 : vector<2x32xf32> to vector<1x1x2x32xf32>
    tpu.vector_store %arg4[%c7_119, %c2_120, %c0_121, %c0_122], %138 {strides = array<i32>} : memref<8x3x2x32xf32, #tpu.memory_space<vmem>>, vector<1x1x2x32xf32>,
    return
  }
  func.func @transform_0(%arg0: i32) -> (i32, i32, i32) {
    %c0_i32 = arith.constant 0 : i32
    %c0_i32_0 = arith.constant 0 : i32
    %c0_i32_1 = arith.constant 0 : i32
    return %arg0, %c0_i32, %c0_i32_0 : i32, i32, i32
  }
  func.func @transform_1(%arg0: i32) -> (i32, i32) {
    %c0_i32 = arith.constant 0 : i32
    %c0_i32_0 = arith.constant 0 : i32
    %c0_i32_1 = arith.constant 0 : i32
    return %c0_i32, %c0_i32_0 : i32, i32
  }
  func.func @transform_2(%arg0: i32) -> (i32, i32) {
    %c0_i32 = arith.constant 0 : i32
    %c0_i32_0 = arith.constant 0 : i32
    %c0_i32_1 = arith.constant 0 : i32
    return %c0_i32, %c0_i32_0 : i32, i32
  }
  func.func @transform_3(%arg0: i32) -> (i32, i32, i32, i32) {
    %c0_i32 = arith.constant 0 : i32
    %c0_i32_0 = arith.constant 0 : i32
    %c0_i32_1 = arith.constant 0 : i32
    %c0_i32_2 = arith.constant 0 : i32
    return %arg0, %c0_i32, %c0_i32_0, %c0_i32_1 : i32, i32, i32, i32
  }
}

module attributes {stable_mosaic.version = 11 : i64} {
  func.func @_gru_decoder_scan_kernel(%arg0: i32, %arg1: i32, %arg2: memref<4x3x2x32xf32, #tpu.memory_space<vmem>>, %arg3: memref<2x32xf32, #tpu.memory_space<vmem>>, %arg4: memref<3x32x32xf32, #tpu.memory_space<vmem>>, %arg5: memref<1x32xf32, #tpu.memory_space<vmem>>, %arg6: memref<4x2x32xf32, #tpu.memory_space<vmem>>, %arg7: memref<2x32xf32, #tpu.memory_space<vmem>>) attributes {dimension_semantics = [#tpu.dimension_semantics<parallel>, #tpu.dimension_semantics<arbitrary>], iteration_bounds = array<i64: 1, 2>, scalar_prefetch = 0 : i64, scratch_operands = 1 : i64, tpu.core_type = #tpu.core_type<tc>, window_params = [{transform_indices = @transform_0, window_bounds = array<i64: 4, 3, 2, 32>}, {transform_indices = @transform_1, window_bounds = array<i64: 2, 32>}, {pipeline_mode = #tpu.pipeline_mode<synchronous>, transform_indices = @transform_2, window_bounds = array<i64: 3, 32, 32>}, {pipeline_mode = #tpu.pipeline_mode<synchronous>, transform_indices = @transform_3, window_bounds = array<i64: 1, 32>}, {transform_indices = @transform_4, window_bounds = array<i64: 4, 2, 32>}]} {
    %c0_i32 = arith.constant 0 : i32
    %0 = arith.cmpi eq, %arg1, %c0_i32 : i32
    %1 = arith.extui %0 : i1 to i32
    %c0_i32_0 = arith.constant 0 : i32
    %2 = arith.cmpi ne, %1, %c0_i32_0 : i32
    scf.if %2 {
      %c0_53 = arith.constant 0 : index
      %c0_54 = arith.constant 0 : index
      %168 = vector.load %arg3[%c0_53, %c0_54] : memref<2x32xf32, #tpu.memory_space<vmem>>, vector<2x32xf32>
      %c0_55 = arith.constant 0 : index
      %c0_56 = arith.constant 0 : index
      %169 = vector.load %arg7[%c0_55, %c0_56] : memref<2x32xf32, #tpu.memory_space<vmem>>, vector<2x32xf32>
      tpu.vector_store %arg7[%c0_55, %c0_56], %168 {strides = array<i32>} : memref<2x32xf32, #tpu.memory_space<vmem>>, vector<2x32xf32>,
    } else {
    }
    %c0 = arith.constant 0 : index
    %c0_1 = arith.constant 0 : index
    %c0_2 = arith.constant 0 : index
    %3 = vector.load %arg4[%c0, %c0_1, %c0_2] : memref<3x32x32xf32, #tpu.memory_space<vmem>>, vector<3x32x32xf32>
    %4 = arith.truncf %3 : vector<3x32x32xf32> to vector<3x32x32xbf16>
    %5 = vector.extract_strided_slice %4 {offsets = [0, 0, 0], sizes = [1, 32, 32], strides = [1, 1, 1]} : vector<3x32x32xbf16> to vector<1x32x32xbf16>
    %6 = vector.shape_cast %5 : vector<1x32x32xbf16> to vector<32x32xbf16>
    %7 = vector.extract_strided_slice %4 {offsets = [1, 0, 0], sizes = [1, 32, 32], strides = [1, 1, 1]} : vector<3x32x32xbf16> to vector<1x32x32xbf16>
    %8 = vector.shape_cast %7 : vector<1x32x32xbf16> to vector<32x32xbf16>
    %9 = vector.extract_strided_slice %4 {offsets = [2, 0, 0], sizes = [1, 32, 32], strides = [1, 1, 1]} : vector<3x32x32xbf16> to vector<1x32x32xbf16>
    %10 = vector.shape_cast %9 : vector<1x32x32xbf16> to vector<32x32xbf16>
    %c0_3 = arith.constant 0 : index
    %c0_4 = arith.constant 0 : index
    %11 = vector.load %arg5[%c0_3, %c0_4] : memref<1x32xf32, #tpu.memory_space<vmem>>, vector<1x32xf32>
    %12 = vector.shape_cast %11 : vector<1x32xf32> to vector<1x32xf32>
    %13 = vector.broadcast %12 : vector<1x32xf32> to vector<2x32xf32>
    %c0_5 = arith.constant 0 : index
    %c0_6 = arith.constant 0 : index
    %14 = vector.load %arg7[%c0_5, %c0_6] : memref<2x32xf32, #tpu.memory_space<vmem>>, vector<2x32xf32>
    %c0_i32_7 = arith.constant 0 : i32
    %15 = arith.index_cast %c0_i32_7 : i32 to index
    %c0_8 = arith.constant 0 : index
    %c0_9 = arith.constant 0 : index
    %c0_10 = arith.constant 0 : index
    %16 = vector.load %arg2[%15, %c0_8, %c0_9, %c0_10] : memref<4x3x2x32xf32, #tpu.memory_space<vmem>>, vector<1x3x2x32xf32>
    %17 = vector.shape_cast %16 : vector<1x3x2x32xf32> to vector<3x2x32xf32>
    %18 = arith.truncf %14 : vector<2x32xf32> to vector<2x32xbf16>
    %19 = vector.extract_strided_slice %17 {offsets = [0, 0, 0], sizes = [1, 2, 32], strides = [1, 1, 1]} : vector<3x2x32xf32> to vector<1x2x32xf32>
    %20 = vector.shape_cast %19 : vector<1x2x32xf32> to vector<2x32xf32>
    %cst = arith.constant dense<0.000000e+00> : vector<2x32xf32>
    %21 = tpu.matmul %18, %6, %cst {dimension_numbers = #tpu.dot_dimension_numbers<[1], [0], [0], [1], [0, 0, 1, 1], [], []>} : vector<2x32xbf16>, vector<32x32xbf16>, vector<2x32xf32> -> vector<2x32xf32>
    %22 = arith.addf %20, %21 : vector<2x32xf32>
    %23 = arith.negf %22 : vector<2x32xf32>
    %24 = math.exp %23 : vector<2x32xf32>
    %cst_11 = arith.constant 1.000000e+00 : f32
    %25 = vector.broadcast %cst_11 : f32 to vector<2x32xf32>
    %26 = arith.addf %25, %24 : vector<2x32xf32>
    %27 = arith.divf %25, %26 : vector<2x32xf32>
    %28 = vector.extract_strided_slice %17 {offsets = [1, 0, 0], sizes = [1, 2, 32], strides = [1, 1, 1]} : vector<3x2x32xf32> to vector<1x2x32xf32>
    %29 = vector.shape_cast %28 : vector<1x2x32xf32> to vector<2x32xf32>
    %cst_12 = arith.constant dense<0.000000e+00> : vector<2x32xf32>
    %30 = tpu.matmul %18, %8, %cst_12 {dimension_numbers = #tpu.dot_dimension_numbers<[1], [0], [0], [1], [0, 0, 1, 1], [], []>} : vector<2x32xbf16>, vector<32x32xbf16>, vector<2x32xf32> -> vector<2x32xf32>
    %31 = arith.addf %29, %30 : vector<2x32xf32>
    %32 = arith.negf %31 : vector<2x32xf32>
    %33 = math.exp %32 : vector<2x32xf32>
    %cst_13 = arith.constant 1.000000e+00 : f32
    %34 = vector.broadcast %cst_13 : f32 to vector<2x32xf32>
    %35 = arith.addf %34, %33 : vector<2x32xf32>
    %36 = arith.divf %34, %35 : vector<2x32xf32>
    %37 = vector.extract_strided_slice %17 {offsets = [2, 0, 0], sizes = [1, 2, 32], strides = [1, 1, 1]} : vector<3x2x32xf32> to vector<1x2x32xf32>
    %38 = vector.shape_cast %37 : vector<1x2x32xf32> to vector<2x32xf32>
    %cst_14 = arith.constant dense<0.000000e+00> : vector<2x32xf32>
    %39 = tpu.matmul %18, %10, %cst_14 {dimension_numbers = #tpu.dot_dimension_numbers<[1], [0], [0], [1], [0, 0, 1, 1], [], []>} : vector<2x32xbf16>, vector<32x32xbf16>, vector<2x32xf32> -> vector<2x32xf32>
    %40 = arith.addf %39, %13 : vector<2x32xf32>
    %41 = arith.mulf %27, %40 : vector<2x32xf32>
    %42 = arith.addf %38, %41 : vector<2x32xf32>
    %43 = math.tanh %42 : vector<2x32xf32>
    %cst_15 = arith.constant 1.000000e+00 : f32
    %44 = vector.broadcast %cst_15 : f32 to vector<2x32xf32>
    %45 = arith.subf %44, %36 : vector<2x32xf32>
    %46 = arith.mulf %45, %43 : vector<2x32xf32>
    %47 = arith.mulf %36, %14 : vector<2x32xf32>
    %48 = arith.addf %46, %47 : vector<2x32xf32>
    %49 = arith.index_cast %c0_i32_7 : i32 to index
    %c0_16 = arith.constant 0 : index
    %c0_17 = arith.constant 0 : index
    %50 = vector.load %arg6[%49, %c0_16, %c0_17] : memref<4x2x32xf32, #tpu.memory_space<vmem>>, vector<1x2x32xf32>
    %51 = vector.shape_cast %50 : vector<1x2x32xf32> to vector<2x32xf32>
    %52 = vector.shape_cast %48 : vector<2x32xf32> to vector<1x2x32xf32>
    tpu.vector_store %arg6[%49, %c0_16, %c0_17], %52 {strides = array<i32>} : memref<4x2x32xf32, #tpu.memory_space<vmem>>, vector<1x2x32xf32>,
    %c1_i32 = arith.constant 1 : i32
    %53 = arith.index_cast %c1_i32 : i32 to index
    %c0_18 = arith.constant 0 : index
    %c0_19 = arith.constant 0 : index
    %c0_20 = arith.constant 0 : index
    %54 = vector.load %arg2[%53, %c0_18, %c0_19, %c0_20] : memref<4x3x2x32xf32, #tpu.memory_space<vmem>>, vector<1x3x2x32xf32>
    %55 = vector.shape_cast %54 : vector<1x3x2x32xf32> to vector<3x2x32xf32>
    %56 = arith.truncf %48 : vector<2x32xf32> to vector<2x32xbf16>
    %57 = vector.extract_strided_slice %55 {offsets = [0, 0, 0], sizes = [1, 2, 32], strides = [1, 1, 1]} : vector<3x2x32xf32> to vector<1x2x32xf32>
    %58 = vector.shape_cast %57 : vector<1x2x32xf32> to vector<2x32xf32>
    %cst_21 = arith.constant dense<0.000000e+00> : vector<2x32xf32>
    %59 = tpu.matmul %56, %6, %cst_21 {dimension_numbers = #tpu.dot_dimension_numbers<[1], [0], [0], [1], [0, 0, 1, 1], [], []>} : vector<2x32xbf16>, vector<32x32xbf16>, vector<2x32xf32> -> vector<2x32xf32>
    %60 = arith.addf %58, %59 : vector<2x32xf32>
    %61 = arith.negf %60 : vector<2x32xf32>
    %62 = math.exp %61 : vector<2x32xf32>
    %cst_22 = arith.constant 1.000000e+00 : f32
    %63 = vector.broadcast %cst_22 : f32 to vector<2x32xf32>
    %64 = arith.addf %63, %62 : vector<2x32xf32>
    %65 = arith.divf %63, %64 : vector<2x32xf32>
    %66 = vector.extract_strided_slice %55 {offsets = [1, 0, 0], sizes = [1, 2, 32], strides = [1, 1, 1]} : vector<3x2x32xf32> to vector<1x2x32xf32>
    %67 = vector.shape_cast %66 : vector<1x2x32xf32> to vector<2x32xf32>
    %cst_23 = arith.constant dense<0.000000e+00> : vector<2x32xf32>
    %68 = tpu.matmul %56, %8, %cst_23 {dimension_numbers = #tpu.dot_dimension_numbers<[1], [0], [0], [1], [0, 0, 1, 1], [], []>} : vector<2x32xbf16>, vector<32x32xbf16>, vector<2x32xf32> -> vector<2x32xf32>
    %69 = arith.addf %67, %68 : vector<2x32xf32>
    %70 = arith.negf %69 : vector<2x32xf32>
    %71 = math.exp %70 : vector<2x32xf32>
    %cst_24 = arith.constant 1.000000e+00 : f32
    %72 = vector.broadcast %cst_24 : f32 to vector<2x32xf32>
    %73 = arith.addf %72, %71 : vector<2x32xf32>
    %74 = arith.divf %72, %73 : vector<2x32xf32>
    %75 = vector.extract_strided_slice %55 {offsets = [2, 0, 0], sizes = [1, 2, 32], strides = [1, 1, 1]} : vector<3x2x32xf32> to vector<1x2x32xf32>
    %76 = vector.shape_cast %75 : vector<1x2x32xf32> to vector<2x32xf32>
    %cst_25 = arith.constant dense<0.000000e+00> : vector<2x32xf32>
    %77 = tpu.matmul %56, %10, %cst_25 {dimension_numbers = #tpu.dot_dimension_numbers<[1], [0], [0], [1], [0, 0, 1, 1], [], []>} : vector<2x32xbf16>, vector<32x32xbf16>, vector<2x32xf32> -> vector<2x32xf32>
    %78 = arith.addf %77, %13 : vector<2x32xf32>
    %79 = arith.mulf %65, %78 : vector<2x32xf32>
    %80 = arith.addf %76, %79 : vector<2x32xf32>
    %81 = math.tanh %80 : vector<2x32xf32>
    %cst_26 = arith.constant 1.000000e+00 : f32
    %82 = vector.broadcast %cst_26 : f32 to vector<2x32xf32>
    %83 = arith.subf %82, %74 : vector<2x32xf32>
    %84 = arith.mulf %83, %81 : vector<2x32xf32>
    %85 = arith.mulf %74, %48 : vector<2x32xf32>
    %86 = arith.addf %84, %85 : vector<2x32xf32>
    %87 = arith.index_cast %c1_i32 : i32 to index
    %c0_27 = arith.constant 0 : index
    %c0_28 = arith.constant 0 : index
    %88 = vector.load %arg6[%87, %c0_27, %c0_28] : memref<4x2x32xf32, #tpu.memory_space<vmem>>, vector<1x2x32xf32>
    %89 = vector.shape_cast %88 : vector<1x2x32xf32> to vector<2x32xf32>
    %90 = vector.shape_cast %86 : vector<2x32xf32> to vector<1x2x32xf32>
    tpu.vector_store %arg6[%87, %c0_27, %c0_28], %90 {strides = array<i32>} : memref<4x2x32xf32, #tpu.memory_space<vmem>>, vector<1x2x32xf32>,
    %c2_i32 = arith.constant 2 : i32
    %91 = arith.index_cast %c2_i32 : i32 to index
    %c0_29 = arith.constant 0 : index
    %c0_30 = arith.constant 0 : index
    %c0_31 = arith.constant 0 : index
    %92 = vector.load %arg2[%91, %c0_29, %c0_30, %c0_31] : memref<4x3x2x32xf32, #tpu.memory_space<vmem>>, vector<1x3x2x32xf32>
    %93 = vector.shape_cast %92 : vector<1x3x2x32xf32> to vector<3x2x32xf32>
    %94 = arith.truncf %86 : vector<2x32xf32> to vector<2x32xbf16>
    %95 = vector.extract_strided_slice %93 {offsets = [0, 0, 0], sizes = [1, 2, 32], strides = [1, 1, 1]} : vector<3x2x32xf32> to vector<1x2x32xf32>
    %96 = vector.shape_cast %95 : vector<1x2x32xf32> to vector<2x32xf32>
    %cst_32 = arith.constant dense<0.000000e+00> : vector<2x32xf32>
    %97 = tpu.matmul %94, %6, %cst_32 {dimension_numbers = #tpu.dot_dimension_numbers<[1], [0], [0], [1], [0, 0, 1, 1], [], []>} : vector<2x32xbf16>, vector<32x32xbf16>, vector<2x32xf32> -> vector<2x32xf32>
    %98 = arith.addf %96, %97 : vector<2x32xf32>
    %99 = arith.negf %98 : vector<2x32xf32>
    %100 = math.exp %99 : vector<2x32xf32>
    %cst_33 = arith.constant 1.000000e+00 : f32
    %101 = vector.broadcast %cst_33 : f32 to vector<2x32xf32>
    %102 = arith.addf %101, %100 : vector<2x32xf32>
    %103 = arith.divf %101, %102 : vector<2x32xf32>
    %104 = vector.extract_strided_slice %93 {offsets = [1, 0, 0], sizes = [1, 2, 32], strides = [1, 1, 1]} : vector<3x2x32xf32> to vector<1x2x32xf32>
    %105 = vector.shape_cast %104 : vector<1x2x32xf32> to vector<2x32xf32>
    %cst_34 = arith.constant dense<0.000000e+00> : vector<2x32xf32>
    %106 = tpu.matmul %94, %8, %cst_34 {dimension_numbers = #tpu.dot_dimension_numbers<[1], [0], [0], [1], [0, 0, 1, 1], [], []>} : vector<2x32xbf16>, vector<32x32xbf16>, vector<2x32xf32> -> vector<2x32xf32>
    %107 = arith.addf %105, %106 : vector<2x32xf32>
    %108 = arith.negf %107 : vector<2x32xf32>
    %109 = math.exp %108 : vector<2x32xf32>
    %cst_35 = arith.constant 1.000000e+00 : f32
    %110 = vector.broadcast %cst_35 : f32 to vector<2x32xf32>
    %111 = arith.addf %110, %109 : vector<2x32xf32>
    %112 = arith.divf %110, %111 : vector<2x32xf32>
    %113 = vector.extract_strided_slice %93 {offsets = [2, 0, 0], sizes = [1, 2, 32], strides = [1, 1, 1]} : vector<3x2x32xf32> to vector<1x2x32xf32>
    %114 = vector.shape_cast %113 : vector<1x2x32xf32> to vector<2x32xf32>
    %cst_36 = arith.constant dense<0.000000e+00> : vector<2x32xf32>
    %115 = tpu.matmul %94, %10, %cst_36 {dimension_numbers = #tpu.dot_dimension_numbers<[1], [0], [0], [1], [0, 0, 1, 1], [], []>} : vector<2x32xbf16>, vector<32x32xbf16>, vector<2x32xf32> -> vector<2x32xf32>
    %116 = arith.addf %115, %13 : vector<2x32xf32>
    %117 = arith.mulf %103, %116 : vector<2x32xf32>
    %118 = arith.addf %114, %117 : vector<2x32xf32>
    %119 = math.tanh %118 : vector<2x32xf32>
    %cst_37 = arith.constant 1.000000e+00 : f32
    %120 = vector.broadcast %cst_37 : f32 to vector<2x32xf32>
    %121 = arith.subf %120, %112 : vector<2x32xf32>
    %122 = arith.mulf %121, %119 : vector<2x32xf32>
    %123 = arith.mulf %112, %86 : vector<2x32xf32>
    %124 = arith.addf %122, %123 : vector<2x32xf32>
    %125 = arith.index_cast %c2_i32 : i32 to index
    %c0_38 = arith.constant 0 : index
    %c0_39 = arith.constant 0 : index
    %126 = vector.load %arg6[%125, %c0_38, %c0_39] : memref<4x2x32xf32, #tpu.memory_space<vmem>>, vector<1x2x32xf32>
    %127 = vector.shape_cast %126 : vector<1x2x32xf32> to vector<2x32xf32>
    %128 = vector.shape_cast %124 : vector<2x32xf32> to vector<1x2x32xf32>
    tpu.vector_store %arg6[%125, %c0_38, %c0_39], %128 {strides = array<i32>} : memref<4x2x32xf32, #tpu.memory_space<vmem>>, vector<1x2x32xf32>,
    %c3_i32 = arith.constant 3 : i32
    %129 = arith.index_cast %c3_i32 : i32 to index
    %c0_40 = arith.constant 0 : index
    %c0_41 = arith.constant 0 : index
    %c0_42 = arith.constant 0 : index
    %130 = vector.load %arg2[%129, %c0_40, %c0_41, %c0_42] : memref<4x3x2x32xf32, #tpu.memory_space<vmem>>, vector<1x3x2x32xf32>
    %131 = vector.shape_cast %130 : vector<1x3x2x32xf32> to vector<3x2x32xf32>
    %132 = arith.truncf %124 : vector<2x32xf32> to vector<2x32xbf16>
    %133 = vector.extract_strided_slice %131 {offsets = [0, 0, 0], sizes = [1, 2, 32], strides = [1, 1, 1]} : vector<3x2x32xf32> to vector<1x2x32xf32>
    %134 = vector.shape_cast %133 : vector<1x2x32xf32> to vector<2x32xf32>
    %cst_43 = arith.constant dense<0.000000e+00> : vector<2x32xf32>
    %135 = tpu.matmul %132, %6, %cst_43 {dimension_numbers = #tpu.dot_dimension_numbers<[1], [0], [0], [1], [0, 0, 1, 1], [], []>} : vector<2x32xbf16>, vector<32x32xbf16>, vector<2x32xf32> -> vector<2x32xf32>
    %136 = arith.addf %134, %135 : vector<2x32xf32>
    %137 = arith.negf %136 : vector<2x32xf32>
    %138 = math.exp %137 : vector<2x32xf32>
    %cst_44 = arith.constant 1.000000e+00 : f32
    %139 = vector.broadcast %cst_44 : f32 to vector<2x32xf32>
    %140 = arith.addf %139, %138 : vector<2x32xf32>
    %141 = arith.divf %139, %140 : vector<2x32xf32>
    %142 = vector.extract_strided_slice %131 {offsets = [1, 0, 0], sizes = [1, 2, 32], strides = [1, 1, 1]} : vector<3x2x32xf32> to vector<1x2x32xf32>
    %143 = vector.shape_cast %142 : vector<1x2x32xf32> to vector<2x32xf32>
    %cst_45 = arith.constant dense<0.000000e+00> : vector<2x32xf32>
    %144 = tpu.matmul %132, %8, %cst_45 {dimension_numbers = #tpu.dot_dimension_numbers<[1], [0], [0], [1], [0, 0, 1, 1], [], []>} : vector<2x32xbf16>, vector<32x32xbf16>, vector<2x32xf32> -> vector<2x32xf32>
    %145 = arith.addf %143, %144 : vector<2x32xf32>
    %146 = arith.negf %145 : vector<2x32xf32>
    %147 = math.exp %146 : vector<2x32xf32>
    %cst_46 = arith.constant 1.000000e+00 : f32
    %148 = vector.broadcast %cst_46 : f32 to vector<2x32xf32>
    %149 = arith.addf %148, %147 : vector<2x32xf32>
    %150 = arith.divf %148, %149 : vector<2x32xf32>
    %151 = vector.extract_strided_slice %131 {offsets = [2, 0, 0], sizes = [1, 2, 32], strides = [1, 1, 1]} : vector<3x2x32xf32> to vector<1x2x32xf32>
    %152 = vector.shape_cast %151 : vector<1x2x32xf32> to vector<2x32xf32>
    %cst_47 = arith.constant dense<0.000000e+00> : vector<2x32xf32>
    %153 = tpu.matmul %132, %10, %cst_47 {dimension_numbers = #tpu.dot_dimension_numbers<[1], [0], [0], [1], [0, 0, 1, 1], [], []>} : vector<2x32xbf16>, vector<32x32xbf16>, vector<2x32xf32> -> vector<2x32xf32>
    %154 = arith.addf %153, %13 : vector<2x32xf32>
    %155 = arith.mulf %141, %154 : vector<2x32xf32>
    %156 = arith.addf %152, %155 : vector<2x32xf32>
    %157 = math.tanh %156 : vector<2x32xf32>
    %cst_48 = arith.constant 1.000000e+00 : f32
    %158 = vector.broadcast %cst_48 : f32 to vector<2x32xf32>
    %159 = arith.subf %158, %150 : vector<2x32xf32>
    %160 = arith.mulf %159, %157 : vector<2x32xf32>
    %161 = arith.mulf %150, %124 : vector<2x32xf32>
    %162 = arith.addf %160, %161 : vector<2x32xf32>
    %163 = arith.index_cast %c3_i32 : i32 to index
    %c0_49 = arith.constant 0 : index
    %c0_50 = arith.constant 0 : index
    %164 = vector.load %arg6[%163, %c0_49, %c0_50] : memref<4x2x32xf32, #tpu.memory_space<vmem>>, vector<1x2x32xf32>
    %165 = vector.shape_cast %164 : vector<1x2x32xf32> to vector<2x32xf32>
    %166 = vector.shape_cast %162 : vector<2x32xf32> to vector<1x2x32xf32>
    tpu.vector_store %arg6[%163, %c0_49, %c0_50], %166 {strides = array<i32>} : memref<4x2x32xf32, #tpu.memory_space<vmem>>, vector<1x2x32xf32>,
    %c4_i32 = arith.constant 4 : i32
    %c0_51 = arith.constant 0 : index
    %c0_52 = arith.constant 0 : index
    %167 = vector.load %arg7[%c0_51, %c0_52] : memref<2x32xf32, #tpu.memory_space<vmem>>, vector<2x32xf32>
    tpu.vector_store %arg7[%c0_51, %c0_52], %162 {strides = array<i32>} : memref<2x32xf32, #tpu.memory_space<vmem>>, vector<2x32xf32>,
    return
  }
  func.func @transform_0(%arg0: i32, %arg1: i32) -> (i32, i32, i32, i32) {
    %c0_i32 = arith.constant 0 : i32
    %c0_i32_0 = arith.constant 0 : i32
    %c0_i32_1 = arith.constant 0 : i32
    return %arg1, %c0_i32, %arg0, %c0_i32_0 : i32, i32, i32, i32
  }
  func.func @transform_1(%arg0: i32, %arg1: i32) -> (i32, i32) {
    %c0_i32 = arith.constant 0 : i32
    %c0_i32_0 = arith.constant 0 : i32
    return %arg0, %c0_i32 : i32, i32
  }
  func.func @transform_2(%arg0: i32, %arg1: i32) -> (i32, i32, i32) {
    %c0_i32 = arith.constant 0 : i32
    %c0_i32_0 = arith.constant 0 : i32
    %c0_i32_1 = arith.constant 0 : i32
    %c0_i32_2 = arith.constant 0 : i32
    return %c0_i32, %c0_i32_0, %c0_i32_1 : i32, i32, i32
  }
  func.func @transform_3(%arg0: i32, %arg1: i32) -> (i32, i32) {
    %c0_i32 = arith.constant 0 : i32
    %c0_i32_0 = arith.constant 0 : i32
    %c0_i32_1 = arith.constant 0 : i32
    return %c0_i32, %c0_i32_0 : i32, i32
  }
  func.func @transform_4(%arg0: i32, %arg1: i32) -> (i32, i32, i32) {
    %c0_i32 = arith.constant 0 : i32
    %c0_i32_0 = arith.constant 0 : i32
    return %arg1, %arg0, %c0_i32 : i32, i32, i32
  }
}

module attributes {stable_mosaic.version = 11 : i64} {
  func.func @_head_kernel(%arg0: i32, %arg1: i32, %arg2: memref<8x2x32xf32, #tpu.memory_space<vmem>>, %arg3: memref<32x16xf32, #tpu.memory_space<vmem>>, %arg4: memref<1x16xf32, #tpu.memory_space<vmem>>, %arg5: memref<2x8x16xf32, #tpu.memory_space<vmem>>) attributes {dimension_semantics = [#tpu.dimension_semantics<parallel>, #tpu.dimension_semantics<parallel>], iteration_bounds = array<i64: 1, 1>, scalar_prefetch = 0 : i64, scratch_operands = 0 : i64, tpu.core_type = #tpu.core_type<tc>, window_params = [{transform_indices = @transform_0, window_bounds = array<i64: 8, 2, 32>}, {transform_indices = @transform_1, window_bounds = array<i64: 32, 16>}, {transform_indices = @transform_2, window_bounds = array<i64: 1, 16>}, {transform_indices = @transform_3, window_bounds = array<i64: 2, 8, 16>}]} {
    %c0 = arith.constant 0 : index
    %c0_0 = arith.constant 0 : index
    %0 = vector.load %arg3[%c0, %c0_0] : memref<32x16xf32, #tpu.memory_space<vmem>>, vector<32x16xf32>
    %1 = arith.truncf %0 : vector<32x16xf32> to vector<32x16xbf16>
    %c0_1 = arith.constant 0 : index
    %c0_2 = arith.constant 0 : index
    %2 = vector.load %arg4[%c0_1, %c0_2] : memref<1x16xf32, #tpu.memory_space<vmem>>, vector<1x16xf32>
    %3 = vector.shape_cast %2 : vector<1x16xf32> to vector<1x16xf32>
    %4 = vector.broadcast %3 : vector<1x16xf32> to vector<2x16xf32>
    %c0_3 = arith.constant 0 : index
    %c0_4 = arith.constant 0 : index
    %c0_5 = arith.constant 0 : index
    %5 = vector.load %arg2[%c0_3, %c0_4, %c0_5] : memref<8x2x32xf32, #tpu.memory_space<vmem>>, vector<1x2x32xf32>
    %6 = vector.shape_cast %5 : vector<1x2x32xf32> to vector<2x32xf32>
    %7 = arith.truncf %6 : vector<2x32xf32> to vector<2x32xbf16>
    %cst = arith.constant dense<0.000000e+00> : vector<2x16xf32>
    %8 = tpu.matmul %7, %1, %cst {dimension_numbers = #tpu.dot_dimension_numbers<[1], [0], [0], [1], [0, 0, 1, 1], [], []>} : vector<2x32xbf16>, vector<32x16xbf16>, vector<2x16xf32> -> vector<2x16xf32>
    %9 = arith.addf %8, %4 : vector<2x16xf32>
    %c0_6 = arith.constant 0 : index
    %c0_7 = arith.constant 0 : index
    %c0_8 = arith.constant 0 : index
    %10 = vector.load %arg5[%c0_6, %c0_7, %c0_8] : memref<2x8x16xf32, #tpu.memory_space<vmem>>, vector<2x1x16xf32>
    %11 = vector.shape_cast %10 : vector<2x1x16xf32> to vector<2x16xf32>
    %12 = vector.shape_cast %9 : vector<2x16xf32> to vector<2x1x16xf32>
    tpu.vector_store %arg5[%c0_6, %c0_7, %c0_8], %12 {strides = array<i32>} : memref<2x8x16xf32, #tpu.memory_space<vmem>>, vector<2x1x16xf32>,
    %c1 = arith.constant 1 : index
    %c0_9 = arith.constant 0 : index
    %c0_10 = arith.constant 0 : index
    %13 = vector.load %arg2[%c1, %c0_9, %c0_10] : memref<8x2x32xf32, #tpu.memory_space<vmem>>, vector<1x2x32xf32>
    %14 = vector.shape_cast %13 : vector<1x2x32xf32> to vector<2x32xf32>
    %15 = arith.truncf %14 : vector<2x32xf32> to vector<2x32xbf16>
    %cst_11 = arith.constant dense<0.000000e+00> : vector<2x16xf32>
    %16 = tpu.matmul %15, %1, %cst_11 {dimension_numbers = #tpu.dot_dimension_numbers<[1], [0], [0], [1], [0, 0, 1, 1], [], []>} : vector<2x32xbf16>, vector<32x16xbf16>, vector<2x16xf32> -> vector<2x16xf32>
    %17 = arith.addf %16, %4 : vector<2x16xf32>
    %c0_12 = arith.constant 0 : index
    %c1_13 = arith.constant 1 : index
    %c0_14 = arith.constant 0 : index
    %18 = vector.load %arg5[%c0_12, %c1_13, %c0_14] : memref<2x8x16xf32, #tpu.memory_space<vmem>>, vector<2x1x16xf32>
    %19 = vector.shape_cast %18 : vector<2x1x16xf32> to vector<2x16xf32>
    %20 = vector.shape_cast %17 : vector<2x16xf32> to vector<2x1x16xf32>
    tpu.vector_store %arg5[%c0_12, %c1_13, %c0_14], %20 {strides = array<i32>} : memref<2x8x16xf32, #tpu.memory_space<vmem>>, vector<2x1x16xf32>,
    %c2 = arith.constant 2 : index
    %c0_15 = arith.constant 0 : index
    %c0_16 = arith.constant 0 : index
    %21 = vector.load %arg2[%c2, %c0_15, %c0_16] : memref<8x2x32xf32, #tpu.memory_space<vmem>>, vector<1x2x32xf32>
    %22 = vector.shape_cast %21 : vector<1x2x32xf32> to vector<2x32xf32>
    %23 = arith.truncf %22 : vector<2x32xf32> to vector<2x32xbf16>
    %cst_17 = arith.constant dense<0.000000e+00> : vector<2x16xf32>
    %24 = tpu.matmul %23, %1, %cst_17 {dimension_numbers = #tpu.dot_dimension_numbers<[1], [0], [0], [1], [0, 0, 1, 1], [], []>} : vector<2x32xbf16>, vector<32x16xbf16>, vector<2x16xf32> -> vector<2x16xf32>
    %25 = arith.addf %24, %4 : vector<2x16xf32>
    %c0_18 = arith.constant 0 : index
    %c2_19 = arith.constant 2 : index
    %c0_20 = arith.constant 0 : index
    %26 = vector.load %arg5[%c0_18, %c2_19, %c0_20] : memref<2x8x16xf32, #tpu.memory_space<vmem>>, vector<2x1x16xf32>
    %27 = vector.shape_cast %26 : vector<2x1x16xf32> to vector<2x16xf32>
    %28 = vector.shape_cast %25 : vector<2x16xf32> to vector<2x1x16xf32>
    tpu.vector_store %arg5[%c0_18, %c2_19, %c0_20], %28 {strides = array<i32>} : memref<2x8x16xf32, #tpu.memory_space<vmem>>, vector<2x1x16xf32>,
    %c3 = arith.constant 3 : index
    %c0_21 = arith.constant 0 : index
    %c0_22 = arith.constant 0 : index
    %29 = vector.load %arg2[%c3, %c0_21, %c0_22] : memref<8x2x32xf32, #tpu.memory_space<vmem>>, vector<1x2x32xf32>
    %30 = vector.shape_cast %29 : vector<1x2x32xf32> to vector<2x32xf32>
    %31 = arith.truncf %30 : vector<2x32xf32> to vector<2x32xbf16>
    %cst_23 = arith.constant dense<0.000000e+00> : vector<2x16xf32>
    %32 = tpu.matmul %31, %1, %cst_23 {dimension_numbers = #tpu.dot_dimension_numbers<[1], [0], [0], [1], [0, 0, 1, 1], [], []>} : vector<2x32xbf16>, vector<32x16xbf16>, vector<2x16xf32> -> vector<2x16xf32>
    %33 = arith.addf %32, %4 : vector<2x16xf32>
    %c0_24 = arith.constant 0 : index
    %c3_25 = arith.constant 3 : index
    %c0_26 = arith.constant 0 : index
    %34 = vector.load %arg5[%c0_24, %c3_25, %c0_26] : memref<2x8x16xf32, #tpu.memory_space<vmem>>, vector<2x1x16xf32>
    %35 = vector.shape_cast %34 : vector<2x1x16xf32> to vector<2x16xf32>
    %36 = vector.shape_cast %33 : vector<2x16xf32> to vector<2x1x16xf32>
    tpu.vector_store %arg5[%c0_24, %c3_25, %c0_26], %36 {strides = array<i32>} : memref<2x8x16xf32, #tpu.memory_space<vmem>>, vector<2x1x16xf32>,
    %c4 = arith.constant 4 : index
    %c0_27 = arith.constant 0 : index
    %c0_28 = arith.constant 0 : index
    %37 = vector.load %arg2[%c4, %c0_27, %c0_28] : memref<8x2x32xf32, #tpu.memory_space<vmem>>, vector<1x2x32xf32>
    %38 = vector.shape_cast %37 : vector<1x2x32xf32> to vector<2x32xf32>
    %39 = arith.truncf %38 : vector<2x32xf32> to vector<2x32xbf16>
    %cst_29 = arith.constant dense<0.000000e+00> : vector<2x16xf32>
    %40 = tpu.matmul %39, %1, %cst_29 {dimension_numbers = #tpu.dot_dimension_numbers<[1], [0], [0], [1], [0, 0, 1, 1], [], []>} : vector<2x32xbf16>, vector<32x16xbf16>, vector<2x16xf32> -> vector<2x16xf32>
    %41 = arith.addf %40, %4 : vector<2x16xf32>
    %c0_30 = arith.constant 0 : index
    %c4_31 = arith.constant 4 : index
    %c0_32 = arith.constant 0 : index
    %42 = vector.load %arg5[%c0_30, %c4_31, %c0_32] : memref<2x8x16xf32, #tpu.memory_space<vmem>>, vector<2x1x16xf32>
    %43 = vector.shape_cast %42 : vector<2x1x16xf32> to vector<2x16xf32>
    %44 = vector.shape_cast %41 : vector<2x16xf32> to vector<2x1x16xf32>
    tpu.vector_store %arg5[%c0_30, %c4_31, %c0_32], %44 {strides = array<i32>} : memref<2x8x16xf32, #tpu.memory_space<vmem>>, vector<2x1x16xf32>,
    %c5 = arith.constant 5 : index
    %c0_33 = arith.constant 0 : index
    %c0_34 = arith.constant 0 : index
    %45 = vector.load %arg2[%c5, %c0_33, %c0_34] : memref<8x2x32xf32, #tpu.memory_space<vmem>>, vector<1x2x32xf32>
    %46 = vector.shape_cast %45 : vector<1x2x32xf32> to vector<2x32xf32>
    %47 = arith.truncf %46 : vector<2x32xf32> to vector<2x32xbf16>
    %cst_35 = arith.constant dense<0.000000e+00> : vector<2x16xf32>
    %48 = tpu.matmul %47, %1, %cst_35 {dimension_numbers = #tpu.dot_dimension_numbers<[1], [0], [0], [1], [0, 0, 1, 1], [], []>} : vector<2x32xbf16>, vector<32x16xbf16>, vector<2x16xf32> -> vector<2x16xf32>
    %49 = arith.addf %48, %4 : vector<2x16xf32>
    %c0_36 = arith.constant 0 : index
    %c5_37 = arith.constant 5 : index
    %c0_38 = arith.constant 0 : index
    %50 = vector.load %arg5[%c0_36, %c5_37, %c0_38] : memref<2x8x16xf32, #tpu.memory_space<vmem>>, vector<2x1x16xf32>
    %51 = vector.shape_cast %50 : vector<2x1x16xf32> to vector<2x16xf32>
    %52 = vector.shape_cast %49 : vector<2x16xf32> to vector<2x1x16xf32>
    tpu.vector_store %arg5[%c0_36, %c5_37, %c0_38], %52 {strides = array<i32>} : memref<2x8x16xf32, #tpu.memory_space<vmem>>, vector<2x1x16xf32>,
    %c6 = arith.constant 6 : index
    %c0_39 = arith.constant 0 : index
    %c0_40 = arith.constant 0 : index
    %53 = vector.load %arg2[%c6, %c0_39, %c0_40] : memref<8x2x32xf32, #tpu.memory_space<vmem>>, vector<1x2x32xf32>
    %54 = vector.shape_cast %53 : vector<1x2x32xf32> to vector<2x32xf32>
    %55 = arith.truncf %54 : vector<2x32xf32> to vector<2x32xbf16>
    %cst_41 = arith.constant dense<0.000000e+00> : vector<2x16xf32>
    %56 = tpu.matmul %55, %1, %cst_41 {dimension_numbers = #tpu.dot_dimension_numbers<[1], [0], [0], [1], [0, 0, 1, 1], [], []>} : vector<2x32xbf16>, vector<32x16xbf16>, vector<2x16xf32> -> vector<2x16xf32>
    %57 = arith.addf %56, %4 : vector<2x16xf32>
    %c0_42 = arith.constant 0 : index
    %c6_43 = arith.constant 6 : index
    %c0_44 = arith.constant 0 : index
    %58 = vector.load %arg5[%c0_42, %c6_43, %c0_44] : memref<2x8x16xf32, #tpu.memory_space<vmem>>, vector<2x1x16xf32>
    %59 = vector.shape_cast %58 : vector<2x1x16xf32> to vector<2x16xf32>
    %60 = vector.shape_cast %57 : vector<2x16xf32> to vector<2x1x16xf32>
    tpu.vector_store %arg5[%c0_42, %c6_43, %c0_44], %60 {strides = array<i32>} : memref<2x8x16xf32, #tpu.memory_space<vmem>>, vector<2x1x16xf32>,
    %c7 = arith.constant 7 : index
    %c0_45 = arith.constant 0 : index
    %c0_46 = arith.constant 0 : index
    %61 = vector.load %arg2[%c7, %c0_45, %c0_46] : memref<8x2x32xf32, #tpu.memory_space<vmem>>, vector<1x2x32xf32>
    %62 = vector.shape_cast %61 : vector<1x2x32xf32> to vector<2x32xf32>
    %63 = arith.truncf %62 : vector<2x32xf32> to vector<2x32xbf16>
    %cst_47 = arith.constant dense<0.000000e+00> : vector<2x16xf32>
    %64 = tpu.matmul %63, %1, %cst_47 {dimension_numbers = #tpu.dot_dimension_numbers<[1], [0], [0], [1], [0, 0, 1, 1], [], []>} : vector<2x32xbf16>, vector<32x16xbf16>, vector<2x16xf32> -> vector<2x16xf32>
    %65 = arith.addf %64, %4 : vector<2x16xf32>
    %c0_48 = arith.constant 0 : index
    %c7_49 = arith.constant 7 : index
    %c0_50 = arith.constant 0 : index
    %66 = vector.load %arg5[%c0_48, %c7_49, %c0_50] : memref<2x8x16xf32, #tpu.memory_space<vmem>>, vector<2x1x16xf32>
    %67 = vector.shape_cast %66 : vector<2x1x16xf32> to vector<2x16xf32>
    %68 = vector.shape_cast %65 : vector<2x16xf32> to vector<2x1x16xf32>
    tpu.vector_store %arg5[%c0_48, %c7_49, %c0_50], %68 {strides = array<i32>} : memref<2x8x16xf32, #tpu.memory_space<vmem>>, vector<2x1x16xf32>,
    return
  }
  func.func @transform_0(%arg0: i32, %arg1: i32) -> (i32, i32, i32) {
    %c0_i32 = arith.constant 0 : i32
    %c0_i32_0 = arith.constant 0 : i32
    %c0_i32_1 = arith.constant 0 : i32
    return %arg0, %c0_i32, %c0_i32_0 : i32, i32, i32
  }
  func.func @transform_1(%arg0: i32, %arg1: i32) -> (i32, i32) {
    %c0_i32 = arith.constant 0 : i32
    %c0_i32_0 = arith.constant 0 : i32
    return %c0_i32, %arg1 : i32, i32
  }
  func.func @transform_2(%arg0: i32, %arg1: i32) -> (i32, i32) {
    %c0_i32 = arith.constant 0 : i32
    %c0_i32_0 = arith.constant 0 : i32
    return %c0_i32, %arg1 : i32, i32
  }
  func.func @transform_3(%arg0: i32, %arg1: i32) -> (i32, i32, i32) {
    %c0_i32 = arith.constant 0 : i32
    %c0_i32_0 = arith.constant 0 : i32
    return %c0_i32, %arg0, %arg1 : i32, i32, i32
  }
}

</mosaic_0001>

<bundles_post_ra>
// kernel: encoder_decoder_forward.8
= control target key start
LH: loop header
LB: loop body
LE: loop exit
PB: predicated region body
PF: predicated region fallthrough
CT: control target
= control target key end

     0   :  { %vm19_vm0 = vcmask 779264   ;;  %v109_v0 = vmov 0.0   ;;  %vm110_vm1 = vmmov 0   ;;  %vm30_vm2 = vcmask 261120   ;;  %s155_s1 = inlined_call_operand.vmem [shape: f32[32,96], index: 1, kind: input, shape index: {}]   ;;  %s156_s0 = inlined_call_operand.vmem [shape: f32[2,32], index: 0, kind: input, shape index: {}]   ;;  %s157_s2 = inlined_call_operand.vmem [shape: f32[1,96], index: 2, kind: input, shape index: {}]   ;;  %s158_s3 = inlined_call_operand.vmem [shape: f32[2,96], index: 3, kind: output, shape index: {}]  }
   0x1   :  { %20 = vst.msk [vmem:[#allocation2] sm:$0x3] %vm19_vm0, %v109_v0  ;;  %99 = vmatprep.subr.bf16.mxu0 %v109_v0  ;;  %v24_v1 = vld [vmem:[%s155_s1] sm:$0xff]  ;;  %v25_v2 = vld [vmem:[%s155_s1 + $0x8] sm:$0xff]  ;;  %v26_v3 = vld [vmem:[%s155_s1 + $0x10] sm:$0xff]  ;;  %103 = vmatprep.mubr.msk.bf16.mxu0 %vm110_vm1, %v109_v0 }
   0x2   :  { %v28_v4 = vpack.c.bf16 %v25_v2, %v24_v1  ;;  %v27_v5 = vld [vmem:[%s155_s1 + $0x18] sm:$0xff]  ;;  %v22_v7 = vld [vmem:[%s156_s0] sm:$0x3] }
   0x3   :  { %v29_v6 = vpack.c.bf16 %v27_v5, %v26_v3  ;;  %v23_v8 = vpack.c.bf16 %v22_v7, %v22_v7  ;;  %v95_v15 = vld [vmem:[%s157_s2] ss:$0 sm:$0xff] }
   0x4   :  { %100 = vmatpush3.bf16.msra.mxu0 %v28_v4 }
   0x5   :  { %101 = vmatprep.subr.bf16.mxu0 %v109_v0 }
   0x8   :  { %102 = vmatpush3.bf16.msra.mxu0 %v29_v6  ;;  %v21_v9 = vld [vmem:[#allocation2] sm:$0x3] }
   0xb   :  { %104 = vmatmul.mubr.msk.bf16.vlgmr.msra.gmra.mrb[0].mxu0 %vm30_vm2, %v23_v8 }
  0xde   :  { %v68_v10 = vpop.f32.mrb[0].mxu0 }
  0xdf   :  { %v74_v11 = vadd.f32 %v68_v10, %v21_v9  ;;  %v105_v12 = vpop.f32.mrb[1].mxu0 }
  0xe0   :  { %v71_v13 = vpop.f32.mrb[2].mxu0 }
  0xe1   :  { %76 = vst.msk [vmem:[#allocation2] sm:$0x3] %vm19_vm0, %v74_v11  ;;  %v106_v14 = vpop.f32.mrb[3].mxu0 }
  0xe8   :  { %v80_v16 = vld [vmem:[#allocation2] sm:$0x3] }
  0xe9   :  { %v88_v17 = vadd.f32 %v95_v15, %v80_v16 }
  0xeb   :  { %89 = vst.msk [vmem:[%s158_s3] sm:$0x3] %vm19_vm0, %v88_v17 }

// kernel: encoder_decoder_forward.9
= control target key start
LH: loop header
LB: loop body
LE: loop exit
PB: predicated region body
PF: predicated region fallthrough
CT: control target
= control target key end

     0   :  { %v628_v0 = vmov 0.0   ;;  %vm629_vm0 = vmmov 0   ;;  %vm24_vm1 = vcmask 261120   ;;  %vm68_vm2 = vcmask 254976   ;;  %s631_s13 = smov 64   ;;  %s843_s1 = inlined_call_operand.vmem [shape: f32[32,96], index: 1, kind: input, shape index: {}]   ;;  %s844_s0 = inlined_call_operand.vmem [shape: f32[8,2,32], index: 0, kind: input, shape index: {}]   ;;  %s845_s2 = inlined_call_operand.vmem [shape: f32[2,96], index: 2, kind: input, shape index: {}]   ;;  %s846_s3 = inlined_call_operand.vmem [shape: f32[8,3,2,32], index: 3, kind: output, shape index: {}]  }
   0x1   :  { %560 = vmatprep.subr.bf16.mxu0 %v628_v0  ;;  %568 = vmatprep.subr.bf16.mxu1 %v628_v0  ;;  %v15_v1 = vld [vmem:[%s843_s1] sm:$0xff]  ;;  %v16_v2 = vld [vmem:[%s843_s1 + $0x8] sm:$0xff]  ;;  %v17_v3 = vld [vmem:[%s843_s1 + $0x10] sm:$0xff] }
   0x2   :  { %v19_v4 = vpack.c.bf16 %v16_v2, %v15_v1  ;;  %v18_v5 = vld [vmem:[%s843_s1 + $0x18] sm:$0xff]  ;;  %564 = vmatprep.mubr.msk.bf16.mxu0 %vm629_vm0, %v628_v0  ;;  %572 = vmatprep.mubr.msk.bf16.mxu1 %vm629_vm0, %v628_v0  ;;  %v22_v7 = vld [vmem:[%s844_s0] sm:$0x3]  ;;  %v501_v8 = vld [vmem:[%s844_s0 + $0x2] sm:$0x3] }
   0x3   :  { %v20_v6 = vpack.c.bf16 %v18_v5, %v17_v3  ;;  %v23_v9 = vpack.c.bf16 %v22_v7, %v22_v7  ;;  %v83_v10 = vpack.c.bf16 %v501_v8, %v501_v8  ;;  %v506_v11 = vld [vmem:[%s844_s0 + $0x4] sm:$0x3]  ;;  %v511_v12 = vld [vmem:[%s844_s0 + $0x6] sm:$0x3]  ;;  %v516_v15 = vld [vmem:[%s844_s0 + $0x8] sm:$0x3] }
   0x4   :  { %561 = vmatpush3.bf16.msra.mxu0 %v19_v4  ;;  %569 = vmatpush3.bf16.msra.mxu1 %v19_v4  ;;  %v142_v13 = vpack.c.bf16 %v506_v11, %v506_v11  ;;  %v201_v14 = vpack.c.bf16 %v511_v12, %v511_v12  ;;  %v521_v16 = vld [vmem:[%s844_s0 + $0xa] sm:$0x3]  ;;  %v260_v17 = vpack.c.bf16 %v516_v15, %v516_v15  ;;  %v526_v19 = vld [vmem:[%s844_s0 + $0xc] sm:$0x3]  ;;  %v531_v20 = vld [vmem:[%s844_s0 + $0xe] sm:$0x3] }
   0x5   :  { %562 = vmatprep.subr.bf16.mxu0 %v628_v0  ;;  %570 = vmatprep.subr.bf16.mxu1 %v628_v0  ;;  %v319_v18 = vpack.c.bf16 %v521_v16, %v521_v16  ;;  %v378_v21 = vpack.c.bf16 %v526_v19, %v526_v19  ;;  %v437_v22 = vpack.c.bf16 %v531_v20, %v531_v20  ;;  %v21_v23 = vld [vmem:[%s845_s2] sm:$0x3]  ;;  %s630_s2 = smov 96  }
   0x8   :  { %563 = vmatpush3.bf16.msra.mxu0 %v20_v6  ;;  %571 = vmatpush3.bf16.msra.mxu1 %v20_v6 }
   0x9   :  { %576 = vmatprep.subr.bf16.mxu0 %v628_v0  ;;  %584 = vmatprep.subr.bf16.mxu1 %v628_v0 }
   0xb   :  { %565 = vmatmul.mubr.msk.bf16.vlgmr.msra.gmra.mrb[0].mxu0 %vm24_vm1, %v23_v9  ;;  %573 = vmatmul.mubr.msk.bf16.vlgmr.msra.gmra.mrb[0].mxu1 %vm24_vm1, %v83_v10 }
   0xc   :  { %577 = vmatpush3.bf16.msra.mxu0 %v19_v4  ;;  %585 = vmatpush3.bf16.msra.mxu1 %v19_v4 }
   0xd   :  { %578 = vmatprep.subr.bf16.mxu0 %v628_v0  ;;  %586 = vmatprep.subr.bf16.mxu1 %v628_v0 }
   0xe   :  { %580 = vmatprep.mubr.msk.bf16.mxu0 %vm629_vm0, %v628_v0  ;;  %588 = vmatprep.mubr.msk.bf16.mxu1 %vm629_vm0, %v628_v0 }
  0x10   :  { %579 = vmatpush3.bf16.msra.mxu0 %v20_v6  ;;  %587 = vmatpush3.bf16.msra.mxu1 %v20_v6 }
  0x11   :  { %592 = vmatprep.subr.bf16.mxu0 %v628_v0  ;;  %600 = vmatprep.subr.bf16.mxu1 %v628_v0 }
  0x13   :  { %581 = vmatmul.mubr.msk.bf16.vlgmr.msra.gmra.mrb[4].mxu0 %vm24_vm1, %v142_v13  ;;  %589 = vmatmul.mubr.msk.bf16.vlgmr.msra.gmra.mrb[4].mxu1 %vm24_vm1, %v201_v14 }
  0x14   :  { %593 = vmatpush3.bf16.msra.mxu0 %v19_v4  ;;  %601 = vmatpush3.bf16.msra.mxu1 %v19_v4 }
  0x15   :  { %594 = vmatprep.subr.bf16.mxu0 %v628_v0  ;;  %602 = vmatprep.subr.bf16.mxu1 %v628_v0 }
  0x16   :  { %596 = vmatprep.mubr.msk.bf16.mxu0 %vm629_vm0, %v628_v0  ;;  %604 = vmatprep.mubr.msk.bf16.mxu1 %vm629_vm0, %v628_v0 }
  0x18   :  { %595 = vmatpush3.bf16.msra.mxu0 %v20_v6  ;;  %603 = vmatpush3.bf16.msra.mxu1 %v20_v6 }
  0x19   :  { %608 = vmatprep.subr.bf16.mxu0 %v628_v0  ;;  %616 = vmatprep.subr.bf16.mxu1 %v628_v0 }
  0x1b   :  { %597 = vmatmul.mubr.msk.bf16.vlgmr.msra.gmra.mrb[8].mxu0 %vm24_vm1, %v260_v17  ;;  %605 = vmatmul.mubr.msk.bf16.vlgmr.msra.gmra.mrb[8].mxu1 %vm24_vm1, %v319_v18 }
  0x1c   :  { %609 = vmatpush3.bf16.msra.mxu0 %v19_v4  ;;  %617 = vmatpush3.bf16.msra.mxu1 %v19_v4 }
  0x1d   :  { %610 = vmatprep.subr.bf16.mxu0 %v628_v0  ;;  %618 = vmatprep.subr.bf16.mxu1 %v628_v0 }
  0x1e   :  { %612 = vmatprep.mubr.msk.bf16.mxu0 %vm629_vm0, %v628_v0  ;;  %620 = vmatprep.mubr.msk.bf16.mxu1 %vm629_vm0, %v628_v0 }
  0x20   :  { %611 = vmatpush3.bf16.msra.mxu0 %v20_v6  ;;  %619 = vmatpush3.bf16.msra.mxu1 %v20_v6 }
  0x23   :  { %613 = vmatmul.mubr.msk.bf16.vlgmr.msra.gmra.mrb[12].mxu0 %vm24_vm1, %v378_v21  ;;  %621 = vmatmul.mubr.msk.bf16.vlgmr.msra.gmra.mrb[12].mxu1 %vm24_vm1, %v437_v22 }
  0xde   :  { %v62_v24 = vpop.f32.mrb[0].mxu0  ;;  %v121_v25 = vpop.f32.mrb[0].mxu1 }
  0xdf   :  { %v63_v26 = vadd.f32 %v62_v24, %v21_v23  ;;  %v122_v27 = vadd.f32 %v121_v25, %v21_v23  ;;  %v566_v28 = vpop.f32.mrb[1].mxu0  ;;  %v574_v29 = vpop.f32.mrb[1].mxu1 }
  0xe0   :  { %v65_v30 = vpop.f32.mrb[2].mxu0  ;;  %v124_v31 = vpop.f32.mrb[2].mxu1 }
  0xe1   :  { %69 = vst.msk [vmem:[%s846_s3] sm:$0x3] %vm68_vm2, %v63_v26  ;;  %503 = vst.msk [vmem:[%s846_s3 + $0x6] sm:$0x3] %vm68_vm2, %v122_v27  ;;  %130 = vrot.lane.b32.xlu1 %v122_v27, %s630_s2  ;;  %v575_v32 = vpop.f32.mrb[3].mxu1  ;;  %71 = vrot.lane.b32.xlu0 %v63_v26, %s630_s2  ;;  %v567_v33 = vpop.f32.mrb[3].mxu0 }
  0xe5   :  { %135 = vrot.lane.b32.xlu1 %v122_v27, %s631_s13  ;;  %76 = vrot.lane.b32.xlu0 %v63_v26, %s631_s13 }
  0xe6   :  { %v180_v34 = vpop.f32.mrb[4].mxu0  ;;  %v239_v35 = vpop.f32.mrb[4].mxu1 }
  0xe7   :  { %v181_v36 = vadd.f32 %v180_v34, %v21_v23  ;;  %v582_v37 = vpop.f32.mrb[5].mxu0  ;;  %v240_v38 = vadd.f32 %v239_v35, %v21_v23  ;;  %v590_v39 = vpop.f32.mrb[5].mxu1 }
  0xe8   :  { %v183_v40 = vpop.f32.mrb[6].mxu0  ;;  %v242_v41 = vpop.f32.mrb[6].mxu1 }
  0xe9   :  { %508 = vst.msk [vmem:[%s846_s3 + $0xc] sm:$0x3] %vm68_vm2, %v181_v36  ;;  %513 = vst.msk [vmem:[%s846_s3 + $0x12] sm:$0x3] %vm68_vm2, %v240_v38  ;;  %v583_v42 = vpop.f32.mrb[7].mxu0  ;;  %194 = vrot.lane.b32.xlu1 %v181_v36, %s631_s13  ;;  %189 = vrot.lane.b32.xlu0 %v181_v36, %s630_s2  ;;  %v591_v43 = vpop.f32.mrb[7].mxu1 }
  0xed   :  { %253 = vrot.lane.b32.xlu1 %v240_v38, %s631_s13  ;;  %248 = vrot.lane.b32.xlu0 %v240_v38, %s630_s2 }
  0xee   :  { %v298_v44 = vpop.f32.mrb[8].mxu0  ;;  %v357_v45 = vpop.f32.mrb[8].mxu1 }
  0xef   :  { %v299_v46 = vadd.f32 %v298_v44, %v21_v23  ;;  %v598_v47 = vpop.f32.mrb[9].mxu0  ;;  %v358_v48 = vadd.f32 %v357_v45, %v21_v23  ;;  %v606_v49 = vpop.f32.mrb[9].mxu1 }
  0xf0   :  { %v301_v50 = vpop.f32.mrb[10].mxu0  ;;  %v360_v51 = vpop.f32.mrb[10].mxu1 }
  0xf1   :  { %518 = vst.msk [vmem:[%s846_s3 + $0x18] sm:$0x3] %vm68_vm2, %v299_v46  ;;  %523 = vst.msk [vmem:[%s846_s3 + $0x1e] sm:$0x3] %vm68_vm2, %v358_v48  ;;  %v599_v52 = vpop.f32.mrb[11].mxu0  ;;  %312 = vrot.lane.b32.xlu1 %v299_v46, %s631_s13  ;;  %307 = vrot.lane.b32.xlu0 %v299_v46, %s630_s2  ;;  %v607_v53 = vpop.f32.mrb[11].mxu1 }
  0xf5   :  { %371 = vrot.lane.b32.xlu1 %v358_v48, %s631_s13  ;;  %366 = vrot.lane.b32.xlu0 %v358_v48, %s630_s2 }
  0xf6   :  { %v416_v54 = vpop.f32.mrb[12].mxu0  ;;  %v475_v55 = vpop.f32.mrb[12].mxu1 }
  0xf7   :  { %v417_v56 = vadd.f32 %v416_v54, %v21_v23  ;;  %v614_v57 = vpop.f32.mrb[13].mxu0  ;;  %v476_v58 = vadd.f32 %v475_v55, %v21_v23  ;;  %v622_v59 = vpop.f32.mrb[13].mxu1 }
  0xf8   :  { %v419_v60 = vpop.f32.mrb[14].mxu0  ;;  %v478_v61 = vpop.f32.mrb[14].mxu1 }
  0xf9   :  { %528 = vst.msk [vmem:[%s846_s3 + $0x24] sm:$0x3] %vm68_vm2, %v417_v56  ;;  %533 = vst.msk [vmem:[%s846_s3 + $0x2a] sm:$0x3] %vm68_vm2, %v476_v58  ;;  %v615_v62 = vpop.f32.mrb[15].mxu0  ;;  %430 = vrot.lane.b32.xlu1 %v417_v56, %s631_s13  ;;  %425 = vrot.lane.b32.xlu0 %v417_v56, %s630_s2  ;;  %v623_v63 = vpop.f32.mrb[15].mxu1 }
  0xfd   :  { %489 = vrot.lane.b32.xlu1 %v476_v58, %s631_s13  ;;  %484 = vrot.lane.b32.xlu0 %v476_v58, %s630_s2 }
 0x153   :  { %v131_v0 = vpop.permute.xlu1 %130  ;;  %v72_v1 = vpop.permute.xlu0 %71 }
 0x154   :  { %504 = vst.msk [vmem:[%s846_s3 + $0x8] sm:$0x3] %vm68_vm2, %v131_v0  ;;  %499 = vst.msk [vmem:[%s846_s3 + $0x2] sm:$0x3] %vm68_vm2, %v72_v1 }
 0x157   :  { %v136_v2 = vpop.permute.xlu1 %135  ;;  %v77_v3 = vpop.permute.xlu0 %76 }
 0x158   :  { %505 = vst.msk [vmem:[%s846_s3 + $0xa] sm:$0x3] %vm68_vm2, %v136_v2  ;;  %500 = vst.msk [vmem:[%s846_s3 + $0x4] sm:$0x3] %vm68_vm2, %v77_v3 }
 0x15b   :  { %v195_v4 = vpop.permute.xlu1 %194  ;;  %v190_v5 = vpop.permute.xlu0 %189 }
 0x15c   :  { %510 = vst.msk [vmem:[%s846_s3 + $0x10] sm:$0x3] %vm68_vm2, %v195_v4  ;;  %509 = vst.msk [vmem:[%s846_s3 + $0xe] sm:$0x3] %vm68_vm2, %v190_v5 }
 0x15f   :  { %v254_v6 = vpop.permute.xlu1 %253  ;;  %v249_v7 = vpop.permute.xlu0 %248 }
 0x160   :  { %515 = vst.msk [vmem:[%s846_s3 + $0x16] sm:$0x3] %vm68_vm2, %v254_v6  ;;  %514 = vst.msk [vmem:[%s846_s3 + $0x14] sm:$0x3] %vm68_vm2, %v249_v7 }
 0x163   :  { %v313_v8 = vpop.permute.xlu1 %312  ;;  %v308_v9 = vpop.permute.xlu0 %307 }
 0x164   :  { %520 = vst.msk [vmem:[%s846_s3 + $0x1c] sm:$0x3] %vm68_vm2, %v313_v8  ;;  %519 = vst.msk [vmem:[%s846_s3 + $0x1a] sm:$0x3] %vm68_vm2, %v308_v9 }
 0x167   :  { %v372_v10 = vpop.permute.xlu1 %371  ;;  %v367_v11 = vpop.permute.xlu0 %366 }
 0x168   :  { %525 = vst.msk [vmem:[%s846_s3 + $0x22] sm:$0x3] %vm68_vm2, %v372_v10  ;;  %524 = vst.msk [vmem:[%s846_s3 + $0x20] sm:$0x3] %vm68_vm2, %v367_v11 }
 0x16b   :  { %v431_v12 = vpop.permute.xlu1 %430  ;;  %v426_v13 = vpop.permute.xlu0 %425 }
 0x16c   :  { %530 = vst.msk [vmem:[%s846_s3 + $0x28] sm:$0x3] %vm68_vm2, %v431_v12  ;;  %529 = vst.msk [vmem:[%s846_s3 + $0x26] sm:$0x3] %vm68_vm2, %v426_v13 }
 0x16f   :  { %v490_v14 = vpop.permute.xlu1 %489  ;;  %v485_v15 = vpop.permute.xlu0 %484 }
 0x170   :  { %535 = vst.msk [vmem:[%s846_s3 + $0x2e] sm:$0x3] %vm68_vm2, %v490_v14  ;;  %534 = vst.msk [vmem:[%s846_s3 + $0x2c] sm:$0x3] %vm68_vm2, %v485_v15 }

// kernel: encoder_decoder_forward.6
= control target key start
LH: loop header
LB: loop body
LE: loop exit
PB: predicated region body
PF: predicated region fallthrough
CT: control target
= control target key end

     0   :  { %v635_v0 = vmov 0.0   ;;  %vm636_vm0 = vmmov 0   ;;  %vm30_vm1 = vcmask 261120   ;;  %vm74_vm2 = vcmask 254976   ;;  %s638_s13 = smov 64   ;;  %s850_s1 = inlined_call_operand.vmem [shape: f32[32,96], index: 1, kind: input, shape index: {}]   ;;  %s851_s0 = inlined_call_operand.vmem [shape: f32[8,2,32], index: 0, kind: input, shape index: {}]   ;;  %s852_s2 = inlined_call_operand.vmem [shape: f32[1,96], index: 2, kind: input, shape index: {}]   ;;  %s853_s3 = inlined_call_operand.vmem [shape: f32[8,3,2,32], index: 3, kind: output, shape index: {}]  }
   0x1   :  { %567 = vmatprep.subr.bf16.mxu0 %v635_v0  ;;  %575 = vmatprep.subr.bf16.mxu1 %v635_v0  ;;  %v15_v1 = vld [vmem:[%s850_s1] sm:$0xff]  ;;  %v16_v2 = vld [vmem:[%s850_s1 + $0x8] sm:$0xff]  ;;  %v17_v3 = vld [vmem:[%s850_s1 + $0x10] sm:$0xff] }
   0x2   :  { %v19_v4 = vpack.c.bf16 %v16_v2, %v15_v1  ;;  %v18_v5 = vld [vmem:[%s850_s1 + $0x18] sm:$0xff]  ;;  %571 = vmatprep.mubr.msk.bf16.mxu0 %vm636_vm0, %v635_v0  ;;  %579 = vmatprep.mubr.msk.bf16.mxu1 %vm636_vm0, %v635_v0  ;;  %v28_v7 = vld [vmem:[%s851_s0] sm:$0x3]  ;;  %v508_v8 = vld [vmem:[%s851_s0 + $0x2] sm:$0x3] }
   0x3   :  { %v20_v6 = vpack.c.bf16 %v18_v5, %v17_v3  ;;  %v29_v9 = vpack.c.bf16 %v28_v7, %v28_v7  ;;  %v89_v10 = vpack.c.bf16 %v508_v8, %v508_v8  ;;  %v513_v11 = vld [vmem:[%s851_s0 + $0x4] sm:$0x3]  ;;  %v518_v12 = vld [vmem:[%s851_s0 + $0x6] sm:$0x3]  ;;  %v523_v15 = vld [vmem:[%s851_s0 + $0x8] sm:$0x3] }
   0x4   :  { %568 = vmatpush3.bf16.msra.mxu0 %v19_v4  ;;  %576 = vmatpush3.bf16.msra.mxu1 %v19_v4  ;;  %v148_v13 = vpack.c.bf16 %v513_v11, %v513_v11  ;;  %v207_v14 = vpack.c.bf16 %v518_v12, %v518_v12  ;;  %v528_v16 = vld [vmem:[%s851_s0 + $0xa] sm:$0x3]  ;;  %v266_v17 = vpack.c.bf16 %v523_v15, %v523_v15  ;;  %v533_v19 = vld [vmem:[%s851_s0 + $0xc] sm:$0x3]  ;;  %v538_v20 = vld [vmem:[%s851_s0 + $0xe] sm:$0x3] }
   0x5   :  { %569 = vmatprep.subr.bf16.mxu0 %v635_v0  ;;  %577 = vmatprep.subr.bf16.mxu1 %v635_v0  ;;  %v325_v18 = vpack.c.bf16 %v528_v16, %v528_v16  ;;  %v384_v21 = vpack.c.bf16 %v533_v19, %v533_v19  ;;  %v443_v22 = vpack.c.bf16 %v538_v20, %v538_v20  ;;  %v504_v23 = vld [vmem:[%s852_s2] ss:$0 sm:$0xff]  ;;  %s637_s2 = smov 96  }
   0x8   :  { %570 = vmatpush3.bf16.msra.mxu0 %v20_v6  ;;  %578 = vmatpush3.bf16.msra.mxu1 %v20_v6 }
   0x9   :  { %583 = vmatprep.subr.bf16.mxu0 %v635_v0  ;;  %591 = vmatprep.subr.bf16.mxu1 %v635_v0 }
   0xb   :  { %572 = vmatmul.mubr.msk.bf16.vlgmr.msra.gmra.mrb[0].mxu0 %vm30_vm1, %v29_v9  ;;  %580 = vmatmul.mubr.msk.bf16.vlgmr.msra.gmra.mrb[0].mxu1 %vm30_vm1, %v89_v10 }
   0xc   :  { %584 = vmatpush3.bf16.msra.mxu0 %v19_v4  ;;  %592 = vmatpush3.bf16.msra.mxu1 %v19_v4 }
   0xd   :  { %585 = vmatprep.subr.bf16.mxu0 %v635_v0  ;;  %593 = vmatprep.subr.bf16.mxu1 %v635_v0 }
   0xe   :  { %587 = vmatprep.mubr.msk.bf16.mxu0 %vm636_vm0, %v635_v0  ;;  %595 = vmatprep.mubr.msk.bf16.mxu1 %vm636_vm0, %v635_v0 }
  0x10   :  { %586 = vmatpush3.bf16.msra.mxu0 %v20_v6  ;;  %594 = vmatpush3.bf16.msra.mxu1 %v20_v6 }
  0x11   :  { %599 = vmatprep.subr.bf16.mxu0 %v635_v0  ;;  %607 = vmatprep.subr.bf16.mxu1 %v635_v0 }
  0x13   :  { %588 = vmatmul.mubr.msk.bf16.vlgmr.msra.gmra.mrb[4].mxu0 %vm30_vm1, %v148_v13  ;;  %596 = vmatmul.mubr.msk.bf16.vlgmr.msra.gmra.mrb[4].mxu1 %vm30_vm1, %v207_v14 }
  0x14   :  { %600 = vmatpush3.bf16.msra.mxu0 %v19_v4  ;;  %608 = vmatpush3.bf16.msra.mxu1 %v19_v4 }
  0x15   :  { %601 = vmatprep.subr.bf16.mxu0 %v635_v0  ;;  %609 = vmatprep.subr.bf16.mxu1 %v635_v0 }
  0x16   :  { %603 = vmatprep.mubr.msk.bf16.mxu0 %vm636_vm0, %v635_v0  ;;  %611 = vmatprep.mubr.msk.bf16.mxu1 %vm636_vm0, %v635_v0 }
  0x18   :  { %602 = vmatpush3.bf16.msra.mxu0 %v20_v6  ;;  %610 = vmatpush3.bf16.msra.mxu1 %v20_v6 }
  0x19   :  { %615 = vmatprep.subr.bf16.mxu0 %v635_v0  ;;  %623 = vmatprep.subr.bf16.mxu1 %v635_v0 }
  0x1b   :  { %604 = vmatmul.mubr.msk.bf16.vlgmr.msra.gmra.mrb[8].mxu0 %vm30_vm1, %v266_v17  ;;  %612 = vmatmul.mubr.msk.bf16.vlgmr.msra.gmra.mrb[8].mxu1 %vm30_vm1, %v325_v18 }
  0x1c   :  { %616 = vmatpush3.bf16.msra.mxu0 %v19_v4  ;;  %624 = vmatpush3.bf16.msra.mxu1 %v19_v4 }
  0x1d   :  { %617 = vmatprep.subr.bf16.mxu0 %v635_v0  ;;  %625 = vmatprep.subr.bf16.mxu1 %v635_v0 }
  0x1e   :  { %619 = vmatprep.mubr.msk.bf16.mxu0 %vm636_vm0, %v635_v0  ;;  %627 = vmatprep.mubr.msk.bf16.mxu1 %vm636_vm0, %v635_v0 }
  0x20   :  { %618 = vmatpush3.bf16.msra.mxu0 %v20_v6  ;;  %626 = vmatpush3.bf16.msra.mxu1 %v20_v6 }
  0x23   :  { %620 = vmatmul.mubr.msk.bf16.vlgmr.msra.gmra.mrb[12].mxu0 %vm30_vm1, %v384_v21  ;;  %628 = vmatmul.mubr.msk.bf16.vlgmr.msra.gmra.mrb[12].mxu1 %vm30_vm1, %v443_v22 }
  0xde   :  { %v68_v24 = vpop.f32.mrb[0].mxu0  ;;  %v127_v25 = vpop.f32.mrb[0].mxu1 }
  0xdf   :  { %v69_v26 = vadd.f32 %v504_v23, %v68_v24  ;;  %v128_v27 = vadd.f32 %v504_v23, %v127_v25  ;;  %v573_v28 = vpop.f32.mrb[1].mxu0  ;;  %v581_v29 = vpop.f32.mrb[1].mxu1 }
  0xe0   :  { %v71_v30 = vpop.f32.mrb[2].mxu0  ;;  %v130_v31 = vpop.f32.mrb[2].mxu1 }
  0xe1   :  { %75 = vst.msk [vmem:[%s853_s3] sm:$0x3] %vm74_vm2, %v69_v26  ;;  %510 = vst.msk [vmem:[%s853_s3 + $0x6] sm:$0x3] %vm74_vm2, %v128_v27  ;;  %136 = vrot.lane.b32.xlu1 %v128_v27, %s637_s2  ;;  %v582_v32 = vpop.f32.mrb[3].mxu1  ;;  %77 = vrot.lane.b32.xlu0 %v69_v26, %s637_s2  ;;  %v574_v33 = vpop.f32.mrb[3].mxu0 }
  0xe5   :  { %141 = vrot.lane.b32.xlu1 %v128_v27, %s638_s13  ;;  %82 = vrot.lane.b32.xlu0 %v69_v26, %s638_s13 }
  0xe6   :  { %v186_v34 = vpop.f32.mrb[4].mxu0  ;;  %v245_v35 = vpop.f32.mrb[4].mxu1 }
  0xe7   :  { %v187_v36 = vadd.f32 %v504_v23, %v186_v34  ;;  %v589_v37 = vpop.f32.mrb[5].mxu0  ;;  %v246_v38 = vadd.f32 %v504_v23, %v245_v35  ;;  %v597_v39 = vpop.f32.mrb[5].mxu1 }
  0xe8   :  { %v189_v40 = vpop.f32.mrb[6].mxu0  ;;  %v248_v41 = vpop.f32.mrb[6].mxu1 }
  0xe9   :  { %515 = vst.msk [vmem:[%s853_s3 + $0xc] sm:$0x3] %vm74_vm2, %v187_v36  ;;  %520 = vst.msk [vmem:[%s853_s3 + $0x12] sm:$0x3] %vm74_vm2, %v246_v38  ;;  %v590_v42 = vpop.f32.mrb[7].mxu0  ;;  %200 = vrot.lane.b32.xlu1 %v187_v36, %s638_s13  ;;  %195 = vrot.lane.b32.xlu0 %v187_v36, %s637_s2  ;;  %v598_v43 = vpop.f32.mrb[7].mxu1 }
  0xed   :  { %259 = vrot.lane.b32.xlu1 %v246_v38, %s638_s13  ;;  %254 = vrot.lane.b32.xlu0 %v246_v38, %s637_s2 }
  0xee   :  { %v304_v44 = vpop.f32.mrb[8].mxu0  ;;  %v363_v45 = vpop.f32.mrb[8].mxu1 }
  0xef   :  { %v305_v46 = vadd.f32 %v504_v23, %v304_v44  ;;  %v605_v47 = vpop.f32.mrb[9].mxu0  ;;  %v364_v48 = vadd.f32 %v504_v23, %v363_v45  ;;  %v613_v49 = vpop.f32.mrb[9].mxu1 }
  0xf0   :  { %v307_v50 = vpop.f32.mrb[10].mxu0  ;;  %v366_v51 = vpop.f32.mrb[10].mxu1 }
  0xf1   :  { %525 = vst.msk [vmem:[%s853_s3 + $0x18] sm:$0x3] %vm74_vm2, %v305_v46  ;;  %530 = vst.msk [vmem:[%s853_s3 + $0x1e] sm:$0x3] %vm74_vm2, %v364_v48  ;;  %v606_v52 = vpop.f32.mrb[11].mxu0  ;;  %318 = vrot.lane.b32.xlu1 %v305_v46, %s638_s13  ;;  %313 = vrot.lane.b32.xlu0 %v305_v46, %s637_s2  ;;  %v614_v53 = vpop.f32.mrb[11].mxu1 }
  0xf5   :  { %377 = vrot.lane.b32.xlu1 %v364_v48, %s638_s13  ;;  %372 = vrot.lane.b32.xlu0 %v364_v48, %s637_s2 }
  0xf6   :  { %v422_v54 = vpop.f32.mrb[12].mxu0  ;;  %v481_v55 = vpop.f32.mrb[12].mxu1 }
  0xf7   :  { %v423_v56 = vadd.f32 %v504_v23, %v422_v54  ;;  %v621_v57 = vpop.f32.mrb[13].mxu0  ;;  %v482_v58 = vadd.f32 %v504_v23, %v481_v55  ;;  %v629_v59 = vpop.f32.mrb[13].mxu1 }
  0xf8   :  { %v425_v60 = vpop.f32.mrb[14].mxu0  ;;  %v484_v61 = vpop.f32.mrb[14].mxu1 }
  0xf9   :  { %535 = vst.msk [vmem:[%s853_s3 + $0x24] sm:$0x3] %vm74_vm2, %v423_v56  ;;  %540 = vst.msk [vmem:[%s853_s3 + $0x2a] sm:$0x3] %vm74_vm2, %v482_v58  ;;  %v622_v62 = vpop.f32.mrb[15].mxu0  ;;  %436 = vrot.lane.b32.xlu1 %v423_v56, %s638_s13  ;;  %431 = vrot.lane.b32.xlu0 %v423_v56, %s637_s2  ;;  %v630_v63 = vpop.f32.mrb[15].mxu1 }
  0xfd   :  { %495 = vrot.lane.b32.xlu1 %v482_v58, %s638_s13  ;;  %490 = vrot.lane.b32.xlu0 %v482_v58, %s637_s2 }
 0x153   :  { %v137_v0 = vpop.permute.xlu1 %136  ;;  %v78_v1 = vpop.permute.xlu0 %77 }
 0x154   :  { %511 = vst.msk [vmem:[%s853_s3 + $0x8] sm:$0x3] %vm74_vm2, %v137_v0  ;;  %506 = vst.msk [vmem:[%s853_s3 + $0x2] sm:$0x3] %vm74_vm2, %v78_v1 }
 0x157   :  { %v142_v2 = vpop.permute.xlu1 %141  ;;  %v83_v3 = vpop.permute.xlu0 %82 }
 0x158   :  { %512 = vst.msk [vmem:[%s853_s3 + $0xa] sm:$0x3] %vm74_vm2, %v142_v2  ;;  %507 = vst.msk [vmem:[%s853_s3 + $0x4] sm:$0x3] %vm74_vm2, %v83_v3 }
 0x15b   :  { %v201_v4 = vpop.permute.xlu1 %200  ;;  %v196_v5 = vpop.permute.xlu0 %195 }
 0x15c   :  { %517 = vst.msk [vmem:[%s853_s3 + $0x10] sm:$0x3] %vm74_vm2, %v201_v4  ;;  %516 = vst.msk [vmem:[%s853_s3 + $0xe] sm:$0x3] %vm74_vm2, %v196_v5 }
 0x15f   :  { %v260_v6 = vpop.permute.xlu1 %259  ;;  %v255_v7 = vpop.permute.xlu0 %254 }
 0x160   :  { %522 = vst.msk [vmem:[%s853_s3 + $0x16] sm:$0x3] %vm74_vm2, %v260_v6  ;;  %521 = vst.msk [vmem:[%s853_s3 + $0x14] sm:$0x3] %vm74_vm2, %v255_v7 }
 0x163   :  { %v319_v8 = vpop.permute.xlu1 %318  ;;  %v314_v9 = vpop.permute.xlu0 %313 }
 0x164   :  { %527 = vst.msk [vmem:[%s853_s3 + $0x1c] sm:$0x3] %vm74_vm2, %v319_v8  ;;  %526 = vst.msk [vmem:[%s853_s3 + $0x1a] sm:$0x3] %vm74_vm2, %v314_v9 }
 0x167   :  { %v378_v10 = vpop.permute.xlu1 %377  ;;  %v373_v11 = vpop.permute.xlu0 %372 }
 0x168   :  { %532 = vst.msk [vmem:[%s853_s3 + $0x22] sm:$0x3] %vm74_vm2, %v378_v10  ;;  %531 = vst.msk [vmem:[%s853_s3 + $0x20] sm:$0x3] %vm74_vm2, %v373_v11 }
 0x16b   :  { %v437_v12 = vpop.permute.xlu1 %436  ;;  %v432_v13 = vpop.permute.xlu0 %431 }
 0x16c   :  { %537 = vst.msk [vmem:[%s853_s3 + $0x28] sm:$0x3] %vm74_vm2, %v437_v12  ;;  %536 = vst.msk [vmem:[%s853_s3 + $0x26] sm:$0x3] %vm74_vm2, %v432_v13 }
 0x16f   :  { %v496_v14 = vpop.permute.xlu1 %495  ;;  %v491_v15 = vpop.permute.xlu0 %490 }
 0x170   :  { %542 = vst.msk [vmem:[%s853_s3 + $0x2e] sm:$0x3] %vm74_vm2, %v496_v14  ;;  %541 = vst.msk [vmem:[%s853_s3 + $0x2c] sm:$0x3] %vm74_vm2, %v491_v15 }

// kernel: encoder_decoder_forward.7
= control target key start
LH: loop header
LB: loop body
LE: loop exit
PB: predicated region body
PF: predicated region fallthrough
CT: control target
= control target key end

     0   :  { %s1181_s12 = smov 0   ;;  %s1183_s13 = smov 0   ;;  %s1374_s0 = inlined_call_operand.vmem [shape: f32[8,3,2,32], index: 0, kind: input, shape index: {}]   ;;  %s1375_s1 = inlined_call_operand.vmem [shape: f32[3,32,32], index: 1, kind: input, shape index: {}]   ;;  %s1376_s2 = inlined_call_operand.vmem [shape: f32[1,32], index: 2, kind: input, shape index: {}]   ;;  %s1377_s3 = inlined_call_operand.vmem [shape: f32[2,32], index: 3, kind: output, shape index: {}]  }
   0x1   :  { %s1185_s14 = smov 0  }
   0x2 LB: > { %s22_s15 = sadd.s32 1, %s1152_s13  ;;  %p897_p0 = scmp.ge.s32.totalorder %s1156_s14, 1  ;;  %s1156_s14 = sphi %s1185_s14, %s13_s14   ;;  %s1152_s13 = sphi %s1183_s13, %s1379_s13   ;;  %s1148_s12 = sphi %s1181_s12, %s1378_s12  }
   0x3   : > { %p23_p1 = scmp.ge.s32.totalorder %s22_s15, 2  ;;  %p156_p2 = scmp.lt.s32.totalorder %s1156_s14, 3 }
   0x5   : > { %s1381_s15 = smov (%p23_p1, %s22_s15), 0  ;;  %p157_p3 = pnand %p897_p0, %p156_p2 }
   0x6   : > { %s898_s16 = sshll.u32 (!%p157_p3), %s1148_s12, 2  ;;  %p900_p5 = scmp.ne.s32.totalorder (!%p157_p3), %s1148_s12, 0 }
   0x7   : > { %160 = sbr.rel (%p157_p3) target bundleno = 1074 (0x432), region = 32  ;;  %p184_p4 = scmp.lt.s32.totalorder (!%p157_p3), %s898_s16, 7 }
   0xe   : > { %s1383_s16 = smov (!%p184_p4, %s898_s16), 7  ;;  %201 = sbr.rel (%p900_p5) target bundleno = 21 (0x15), region = 36 }
   0xf   : > { %s1066_s17 = smul.u32 6, %s1383_s16  ;;  %vm202_vm0 = vcmask (!%p900_p5), 254976   ;;  %v1158_v0 = vmov (!%p900_p5), 0.0  }
  0x10   : > { %203 = vst.msk [vmem:[#allocation2] sm:$0x3] (!%p900_p5), %vm202_vm0, %v1158_v0 }
  0x11   : > { %s1202_s20 = scalar_lea.vmem %s1374_s0, %s1066_s17 }
  0x15 PF: > { %v204_v1 = vld [vmem:[%s1375_s1] sm:$0xff]  ;;  %v205_v2 = vld [vmem:[%s1375_s1 + $0x8] sm:$0xff]  ;;  %v206_v3 = vld [vmem:[%s1375_s1 + $0x10] sm:$0xff]  ;;  %v1159_v4 = vmov 0.0   ;;  %vm1160_vm1 = vmmov 0   ;;  %vm234_vm2 = vcmask 261120  }
  0x16   : > { %970 = vmatprep.subr.bf16.mxu0 %v1159_v4  ;;  %v1214_v5 = vpack.c.bf16 %v205_v2, %v204_v1  ;;  %v207_v6 = vld [vmem:[%s1375_s1 + $0x18] sm:$0xff]  ;;  %974 = vmatprep.mubr.msk.bf16.mxu0 %vm1160_vm1, %v1159_v4  ;;  %v208_v7 = vld [vmem:[%s1375_s1 + $0x20] sm:$0xff]  ;;  %v209_v8 = vld [vmem:[%s1375_s1 + $0x28] sm:$0xff]  ;;  %vm826_vm3 = vcmask 254976  }
  0x17   : > { %978 = vmatprep.subr.bf16.mxu1 %v1159_v4  ;;  %v210_v9 = vld [vmem:[%s1375_s1 + $0x30] sm:$0xff]  ;;  %v211_v10 = vld [vmem:[%s1375_s1 + $0x38] sm:$0xff]  ;;  %982 = vmatprep.mubr.msk.bf16.mxu1 %vm1160_vm1, %v1159_v4  ;;  %v1237_v11 = vpack.c.bf16 %v207_v6, %v206_v3  ;;  %v1239_v12 = vld [vmem:[#allocation2] sm:$0x3]  ;;  %v1241_v13 = vpack.c.bf16 %v209_v8, %v208_v7 }
  0x18   : > { %971 = vmatpush3.bf16.msra.mxu0 %v1214_v5  ;;  %v212_v14 = vld [vmem:[%s1375_s1 + $0x40] sm:$0xff]  ;;  %v213_v15 = vld [vmem:[%s1375_s1 + $0x48] sm:$0xff]  ;;  %v1251_v16 = vpack.c.bf16 %v211_v10, %v210_v9  ;;  %v233_v17 = vpack.c.bf16 %v1239_v12, %v1239_v12  ;;  %v214_v19 = vld [vmem:[%s1375_s1 + $0x50] sm:$0xff] }
  0x19   : > { %972 = vmatprep.subr.bf16.mxu0 %v1159_v4  ;;  %979 = vmatpush3.bf16.msra.mxu1 %v1241_v13  ;;  %v1257_v18 = vpack.c.bf16 %v213_v15, %v212_v14  ;;  %v215_v20 = vld [vmem:[%s1375_s1 + $0x58] sm:$0xff]  ;;  %v230_v22 = vld [vmem:[%s1202_s20] sm:$0x3]  ;;  %v231_v24 = vld [vmem:[%s1202_s20 + $0x2] sm:$0x3] }
  0x1a   : > { %980 = vmatprep.subr.bf16.mxu1 %v1159_v4  ;;  %v1270_v21 = vpack.c.bf16 %v215_v20, %v214_v19  ;;  %v1296_v43 = vld [vmem:[%s1376_s2] ss:$0 sm:$0xff]  ;;  %v232_v47 = vld [vmem:[%s1202_s20 + $0x4] sm:$0x3]  ;;  %v907_v57 = vld [vmem:[%s1202_s20 + $0x6] sm:$0x3] }
  0x1b   : > { %v908_v61 = vld [vmem:[%s1202_s20 + $0x8] sm:$0x3] }
  0x1c   : > { %973 = vmatpush3.bf16.msra.mxu0 %v1237_v11 }
  0x1d   : > { %986 = vmatprep.subr.bf16.mxu0 %v1159_v4  ;;  %981 = vmatpush3.bf16.msra.mxu1 %v1251_v16 }
  0x1e   : > { %994 = vmatprep.subr.bf16.mxu1 %v1159_v4 }
  0x1f   : > { %975 = vmatmul.mubr.msk.bf16.vlgmr.msra.gmra.mrb[0].mxu0 %vm234_vm2, %v233_v17 }
  0x20   : > { %987 = vmatpush3.bf16.msra.mxu0 %v1257_v18  ;;  %990 = vmatprep.mubr.msk.bf16.mxu0 %vm1160_vm1, %v1159_v4 }
  0x21   : > { %983 = vmatmul.mubr.msk.bf16.vlgmr.msra.gmra.mrb[0].mxu1 %vm234_vm2, %v233_v17  ;;  %988 = vmatprep.subr.bf16.mxu0 %v1159_v4 }
  0x22   : > { %995 = vmatpush3.bf16.msra.mxu1 %v1214_v5  ;;  %998 = vmatprep.mubr.msk.bf16.mxu1 %vm1160_vm1, %v1159_v4 }
  0x23   : > { %996 = vmatprep.subr.bf16.mxu1 %v1159_v4 }
  0x24   : > { %989 = vmatpush3.bf16.msra.mxu0 %v1270_v21 }
  0x25   : > { %1002 = vmatprep.subr.bf16.mxu0 %v1159_v4 }
  0x26   : > { %997 = vmatpush3.bf16.msra.mxu1 %v1237_v11 }
  0x27   : > { %991 = vmatmul.mubr.msk.bf16.vlgmr.msra.gmra.mrb[4].mxu0 %vm234_vm2, %v233_v17  ;;  %1010 = vmatprep.subr.bf16.mxu1 %v1159_v4 }
  0x28   : > { %1003 = vmatpush3.bf16.msra.mxu0 %v1241_v13  ;;  %1006 = vmatprep.mubr.msk.bf16.mxu0 %vm1160_vm1, %v1159_v4 }
  0x29   : > { %1004 = vmatprep.subr.bf16.mxu0 %v1159_v4 }
  0x2c   : > { %1005 = vmatpush3.bf16.msra.mxu0 %v1251_v16 }
  0x2d   : > { %1018 = vmatprep.subr.bf16.mxu0 %v1159_v4 }
  0xf2   : > { %v272_v23 = vpop.f32.mrb[0].mxu0 }
  0xf3   : > { %v278_v25 = vadd.f32 %v272_v23, %v230_v22  ;;  %v976_v26 = vpop.f32.mrb[1].mxu0 }
  0xf4   : > { %v275_v27 = vpop.f32.mrb[2].mxu0  ;;  %v319_v28 = vpop.f32.mrb[0].mxu1 }
  0xf5   : > { %v903_v29 = vmul.f32 -1.442695, %v278_v25  ;;  %v977_v30 = vpop.f32.mrb[3].mxu0  ;;  %v325_v31 = vadd.f32 %v319_v28, %v231_v24  ;;  %v984_v32 = vpop.f32.mrb[1].mxu1  ;;  %v909_v24 = vld [vmem:[%s1202_s20 + $0xa] sm:$0x3] }
  0xf6   : > { %v322_v33 = vpop.f32.mrb[2].mxu1 }
  0xf7   : > { %1094 = vpow2.f32 %v903_v29  ;;  %v985_v34 = vpop.f32.mrb[3].mxu1  ;;  %v905_v35 = vmul.f32 -1.442695, %v325_v31 }
  0xf9   : > { %1096 = vpow2.f32 %v905_v35 }
  0xfa   : > { %v366_v36 = vpop.f32.mrb[4].mxu0 }
  0xfb   : > { %v992_v37 = vpop.f32.mrb[5].mxu0  ;;  %v367_v45 = vadd.f32 %v1296_v43, %v366_v36 }
  0xfc   : > { %v369_v38 = vpop.f32.mrb[6].mxu0  ;;  %v916_v37 = vld [vmem:[%s1202_s20 + $0xe] sm:$0x3] }
  0xfd   : > { %v993_v39 = vpop.f32.mrb[7].mxu0 }
 0x101   : > { %v1095_v40 = vpop.eup %1094 }
 0x102   : > { %v282_v41 = vadd.f32 1.0, %v1095_v40 }
 0x103   : > { %v1097_v42 = vpop.eup %1096 }
 0x104   : > { %1098 = vrcp.f32 %v282_v41  ;;  %v329_v44 = vadd.f32 1.0, %v1097_v42 }
 0x106   : > { %1100 = vrcp.f32 %v329_v44 }
 0x10e   : > { %v1099_v46 = vpop.eup %1098 }
 0x10f   : > { %v372_v48 = vmul.f32 %v1099_v46, %v367_v45 }
 0x110   : > { %v1101_v50 = vpop.eup %1100 }
 0x111   : > { %v373_v49 = vadd.f32 %v372_v48, %v232_v47  ;;  %v375_v51 = vsub.f32 1.0, %v1101_v50  ;;  %v377_v53 = vmul.f32 %v1101_v50, %v1239_v12 }
 0x113   : > { %1102 = vtanh.f32 %v373_v49 }
 0x11d   : > { %v1103_v52 = vpop.eup %1102 }
 0x11e   : > { %v376_v54 = vmul.f32 %v1103_v52, %v375_v51 }
 0x120   : > { %v378_v55 = vadd.f32 %v377_v53, %v376_v54 }
 0x122   : > { %v383_v56 = vpack.c.bf16 %v378_v55, %v378_v55 }
 0x124   : > { %999 = vmatmul.mubr.msk.bf16.vlgmr.msra.gmra.mrb[4].mxu1 %vm234_vm2, %v383_v56  ;;  %1007 = vmatmul.mubr.msk.bf16.vlgmr.msra.gmra.mrb[8].mxu0 %vm234_vm2, %v383_v56 }
 0x125   : > { %1011 = vmatpush3.bf16.msra.mxu1 %v1257_v18  ;;  %1014 = vmatprep.mubr.msk.bf16.mxu1 %vm1160_vm1, %v1159_v4 }
 0x126   : > { %1012 = vmatprep.subr.bf16.mxu1 %v1159_v4  ;;  %1019 = vmatpush3.bf16.msra.mxu0 %v1214_v5 }
 0x127   : > { %1020 = vmatprep.subr.bf16.mxu0 %v1159_v4  ;;  %1022 = vmatprep.mubr.msk.bf16.mxu0 %vm1160_vm1, %v1159_v4 }
 0x129   : > { %1013 = vmatpush3.bf16.msra.mxu1 %v1270_v21 }
 0x12a   : > { %1026 = vmatprep.subr.bf16.mxu1 %v1159_v4  ;;  %1021 = vmatpush3.bf16.msra.mxu0 %v1237_v11 }
 0x12b   : > { %1034 = vmatprep.subr.bf16.mxu0 %v1159_v4 }
 0x12c   : > { %1015 = vmatmul.mubr.msk.bf16.vlgmr.msra.gmra.mrb[8].mxu1 %vm234_vm2, %v383_v56 }
 0x12d   : > { %1027 = vmatpush3.bf16.msra.mxu1 %v1241_v13  ;;  %1030 = vmatprep.mubr.msk.bf16.mxu1 %vm1160_vm1, %v1159_v4 }
 0x12e   : > { %1028 = vmatprep.subr.bf16.mxu1 %v1159_v4 }
 0x131   : > { %1029 = vmatpush3.bf16.msra.mxu1 %v1251_v16 }
 0x132   : > { %1042 = vmatprep.subr.bf16.mxu1 %v1159_v4 }
 0x1f7   : > { %v421_v58 = vpop.f32.mrb[4].mxu1  ;;  %v468_v59 = vpop.f32.mrb[8].mxu0 }
 0x1f8   : > { %v427_v60 = vadd.f32 %v907_v57, %v421_v58  ;;  %v1000_v62 = vpop.f32.mrb[5].mxu1  ;;  %v1008_v63 = vpop.f32.mrb[9].mxu0  ;;  %v474_v7 = vadd.f32 %v908_v61, %v468_v59 }
 0x1f9   : > { %v424_v0 = vpop.f32.mrb[6].mxu1  ;;  %v471_v1 = vpop.f32.mrb[10].mxu0 }
 0x1fa   : > { %v911_v2 = vmul.f32 -1.442695, %v427_v60  ;;  %v1001_v3 = vpop.f32.mrb[7].mxu1  ;;  %v1009_v6 = vpop.f32.mrb[11].mxu0  ;;  %v913_v8 = vmul.f32 -1.442695, %v474_v7 }
 0x1fb   : > { %v923_v1 = vld [vmem:[%s1202_s20 + $0x12] sm:$0x3]  ;;  %v924_v7 = vld [vmem:[%s1202_s20 + $0x14] sm:$0x3] }
 0x1fc   : > { %1104 = vpow2.f32 %v911_v2 }
 0x1fd   : > { %1106 = vpow2.f32 %v913_v8 }
 0x1ff   : > { %v515_v9 = vpop.f32.mrb[8].mxu1 }
 0x200   : > { %v1016_v10 = vpop.f32.mrb[9].mxu1  ;;  %v516_v22 = vadd.f32 %v1296_v43, %v515_v9 }
 0x201   : > { %v518_v12 = vpop.f32.mrb[10].mxu1 }
 0x202   : > { %v1017_v14 = vpop.f32.mrb[11].mxu1 }
 0x206   : > { %v1105_v15 = vpop.eup %1104 }
 0x207   : > { %v431_v17 = vadd.f32 1.0, %v1105_v15  ;;  %v1107_v19 = vpop.eup %1106 }
 0x208   : > { %v478_v20 = vadd.f32 1.0, %v1107_v19 }
 0x209   : > { %1108 = vrcp.f32 %v431_v17 }
 0x20a   : > { %1110 = vrcp.f32 %v478_v20 }
 0x213   : > { %v1109_v23 = vpop.eup %1108 }
 0x214   : > { %v521_v25 = vmul.f32 %v1109_v23, %v516_v22  ;;  %v1111_v27 = vpop.eup %1110 }
 0x215   : > { %v524_v28 = vsub.f32 1.0, %v1111_v27  ;;  %v526_v30 = vmul.f32 %v1111_v27, %v378_v55  ;;  %v917_v55 = vld [vmem:[%s1202_s20 + $0x10] sm:$0x3] }
 0x216   : > { %v522_v26 = vadd.f32 %v909_v24, %v521_v25 }
 0x218   : > { %1112 = vtanh.f32 %v522_v26 }
 0x222   : > { %v1113_v29 = vpop.eup %1112 }
 0x223   : > { %v525_v31 = vmul.f32 %v1113_v29, %v524_v28  ;;  %v925_v29 = vld [vmem:[%s1202_s20 + $0x16] sm:$0x3] }
 0x225   : > { %v527_v32 = vadd.f32 %v526_v30, %v525_v31 }
 0x227   : > { %v532_v33 = vpack.c.bf16 %v527_v32, %v527_v32 }
 0x229   : > { %1023 = vmatmul.mubr.msk.bf16.vlgmr.msra.gmra.mrb[12].mxu0 %vm234_vm2, %v532_v33  ;;  %1031 = vmatmul.mubr.msk.bf16.vlgmr.msra.gmra.mrb[12].mxu1 %vm234_vm2, %v532_v33 }
 0x22a   : > { %1035 = vmatpush3.bf16.msra.mxu0 %v1257_v18  ;;  %1038 = vmatprep.mubr.msk.bf16.mxu0 %vm1160_vm1, %v1159_v4 }
 0x22b   : > { %1036 = vmatprep.subr.bf16.mxu0 %v1159_v4  ;;  %1043 = vmatpush3.bf16.msra.mxu1 %v1214_v5  ;;  %v915_v5 = vld [vmem:[%s1202_s20 + $0xc] sm:$0x3] }
 0x22c   : > { %1044 = vmatprep.subr.bf16.mxu1 %v1159_v4  ;;  %1046 = vmatprep.mubr.msk.bf16.mxu1 %vm1160_vm1, %v1159_v4 }
 0x22e   : > { %1037 = vmatpush3.bf16.msra.mxu0 %v1270_v21 }
 0x22f   : > { %1050 = vmatprep.subr.bf16.mxu0 %v1159_v4  ;;  %1045 = vmatpush3.bf16.msra.mxu1 %v1237_v11 }
 0x230   : > { %1058 = vmatprep.subr.bf16.mxu1 %v1159_v4 }
 0x231   : > { %1039 = vmatmul.mubr.msk.bf16.vlgmr.msra.gmra.mrb[16].mxu0 %vm234_vm2, %v532_v33 }
 0x232   : > { %1051 = vmatpush3.bf16.msra.mxu0 %v1241_v13  ;;  %1054 = vmatprep.mubr.msk.bf16.mxu0 %vm1160_vm1, %v1159_v4 }
 0x233   : > { %1052 = vmatprep.subr.bf16.mxu0 %v1159_v4 }
 0x236   : > { %1053 = vmatpush3.bf16.msra.mxu0 %v1251_v16 }
 0x2fc   : > { %v570_v34 = vpop.f32.mrb[12].mxu0  ;;  %v617_v35 = vpop.f32.mrb[12].mxu1 }
 0x2fd   : > { %v576_v36 = vadd.f32 %v915_v5, %v570_v34  ;;  %v1024_v38 = vpop.f32.mrb[13].mxu0  ;;  %v1032_v11 = vpop.f32.mrb[13].mxu1  ;;  %v623_v13 = vadd.f32 %v916_v37, %v617_v35 }
 0x2fe   : > { %v573_v39 = vpop.f32.mrb[14].mxu0  ;;  %v620_v40 = vpop.f32.mrb[14].mxu1 }
 0x2ff   : > { %v919_v41 = vmul.f32 -1.442695, %v576_v36  ;;  %v1025_v42 = vpop.f32.mrb[15].mxu0  ;;  %v1033_v44 = vpop.f32.mrb[15].mxu1  ;;  %v921_v45 = vmul.f32 -1.442695, %v623_v13 }
 0x301   : > { %1114 = vpow2.f32 %v919_v41 }
 0x302   : > { %1116 = vpow2.f32 %v921_v45 }
 0x304   : > { %v664_v46 = vpop.f32.mrb[16].mxu0 }
 0x305   : > { %v1040_v47 = vpop.f32.mrb[17].mxu0  ;;  %v665_v53 = vadd.f32 %v1296_v43, %v664_v46 }
 0x306   : > { %v667_v48 = vpop.f32.mrb[18].mxu0 }
 0x307   : > { %v1041_v16 = vpop.f32.mrb[19].mxu0 }
 0x30b   : > { %v1115_v49 = vpop.eup %1114 }
 0x30c   : > { %v580_v50 = vadd.f32 1.0, %v1115_v49  ;;  %v1117_v51 = vpop.eup %1116 }
 0x30d   : > { %v627_v52 = vadd.f32 1.0, %v1117_v51 }
 0x30e   : > { %1118 = vrcp.f32 %v580_v50 }
 0x30f   : > { %1120 = vrcp.f32 %v627_v52 }
 0x318   : > { %v1119_v54 = vpop.eup %1118 }
 0x319   : > { %v670_v56 = vmul.f32 %v1119_v54, %v665_v53  ;;  %v1121_v58 = vpop.eup %1120 }
 0x31a   : > { %v673_v59 = vsub.f32 1.0, %v1121_v58  ;;  %v675_v61 = vmul.f32 %v1121_v58, %v527_v32 }
 0x31b   : > { %v671_v57 = vadd.f32 %v917_v55, %v670_v56 }
 0x31d   : > { %1122 = vtanh.f32 %v671_v57 }
 0x327   : > { %v1123_v60 = vpop.eup %1122 }
 0x328   : > { %v674_v62 = vmul.f32 %v1123_v60, %v673_v59 }
 0x32a   : > { %v676_v63 = vadd.f32 %v675_v61, %v674_v62 }
 0x32c   : > { %v681_v0 = vpack.c.bf16 %v676_v63, %v676_v63 }
 0x32e   : > { %1047 = vmatmul.mubr.msk.bf16.vlgmr.msra.gmra.mrb[16].mxu1 %vm234_vm2, %v681_v0  ;;  %1055 = vmatmul.mubr.msk.bf16.vlgmr.msra.gmra.mrb[20].mxu0 %vm234_vm2, %v681_v0 }
 0x32f   : > { %1059 = vmatpush3.bf16.msra.mxu1 %v1257_v18  ;;  %1062 = vmatprep.mubr.msk.bf16.mxu1 %vm1160_vm1, %v1159_v4 }
 0x330   : > { %1060 = vmatprep.subr.bf16.mxu1 %v1159_v4 }
 0x333   : > { %1061 = vmatpush3.bf16.msra.mxu1 %v1270_v21 }
 0x336   : > { %1063 = vmatmul.mubr.msk.bf16.vlgmr.msra.gmra.mrb[20].mxu1 %vm234_vm2, %v681_v0 }
 0x401   : > { %v719_v2 = vpop.f32.mrb[16].mxu1  ;;  %v766_v3 = vpop.f32.mrb[20].mxu0 }
 0x402   : > { %v725_v6 = vadd.f32 %v923_v1, %v719_v2  ;;  %v1048_v8 = vpop.f32.mrb[17].mxu1  ;;  %v1056_v9 = vpop.f32.mrb[21].mxu0  ;;  %v772_v17 = vadd.f32 %v924_v7, %v766_v3 }
 0x403   : > { %v722_v10 = vpop.f32.mrb[18].mxu1  ;;  %v769_v12 = vpop.f32.mrb[22].mxu0 }
 0x404   : > { %v927_v14 = vmul.f32 -1.442695, %v725_v6  ;;  %v1049_v18 = vpop.f32.mrb[19].mxu1  ;;  %v1057_v15 = vpop.f32.mrb[23].mxu0  ;;  %v929_v4 = vmul.f32 -1.442695, %v772_v17 }
 0x406   : > { %1124 = vpow2.f32 %v927_v14 }
 0x407   : > { %1126 = vpow2.f32 %v929_v4 }
 0x409   : > { %v813_v19 = vpop.f32.mrb[20].mxu1 }
 0x40a   : > { %v1064_v21 = vpop.f32.mrb[21].mxu1  ;;  %v814_v27 = vadd.f32 %v1296_v43, %v813_v19 }
 0x40b   : > { %v816_v20 = vpop.f32.mrb[22].mxu1 }
 0x40c   : > { %v1065_v22 = vpop.f32.mrb[23].mxu1 }
 0x410   : > { %v1125_v23 = vpop.eup %1124 }
 0x411   : > { %v729_v24 = vadd.f32 1.0, %v1125_v23  ;;  %v1127_v25 = vpop.eup %1126 }
 0x412   : > { %v776_v26 = vadd.f32 1.0, %v1127_v25 }
 0x413   : > { %1128 = vrcp.f32 %v729_v24 }
 0x414   : > { %1130 = vrcp.f32 %v776_v26 }
 0x41d   : > { %v1129_v28 = vpop.eup %1128 }
 0x41e   : > { %v819_v30 = vmul.f32 %v1129_v28, %v814_v27  ;;  %v1131_v32 = vpop.eup %1130 }
 0x41f   : > { %v822_v33 = vsub.f32 1.0, %v1131_v32  ;;  %v824_v34 = vmul.f32 %v1131_v32, %v676_v63 }
 0x420   : > { %v820_v31 = vadd.f32 %v925_v29, %v819_v30 }
 0x422   : > { %1132 = vtanh.f32 %v820_v31 }
 0x42c   : > { %v1133_v5 = vpop.eup %1132 }
 0x42d   : > { %v823_v35 = vmul.f32 %v1133_v5, %v822_v33 }
 0x42f   : > { %v825_v36 = vadd.f32 %v824_v34, %v823_v35 }
 0x431   : > { %827 = vst.msk [vmem:[#allocation2] sm:$0x3] %vm826_vm3, %v825_v36  ;;  %828 = vst.msk [vmem:[%s1377_s3] sm:$0x3] %vm826_vm3, %v825_v36 }
 0x432 PF: > { %s13_s14 = sadd.s32 1, %s1156_s14   ;;  %s1378_s12 = smov %s1152_s13 }
 0x433   : > { %p10_p6 = scmp.ge.s32.totalorder %s13_s14, 4   ;;  %s1379_s13 = smov %s1381_s15 }
 0x435   :  { %12 = sbr.rel (!%p10_p6) target bundleno = 2 (0x2), region = 69 }

// kernel: encoder_decoder_forward.10
= control target key start
LH: loop header
LB: loop body
LE: loop exit
PB: predicated region body
PF: predicated region fallthrough
CT: control target
= control target key end

     0   :  { %s1283_s15 = smov 0   ;;  %s1285_s16 = smov 0   ;;  %s1490_s0 = inlined_call_operand.vmem [shape: f32[8,3,2,32], index: 0, kind: input, shape index: {}]   ;;  %s1491_s1 = inlined_call_operand.vmem [shape: f32[2,32], index: 1, kind: input, shape index: {}]   ;;  %s1492_s2 = inlined_call_operand.vmem [shape: f32[3,32,32], index: 2, kind: input, shape index: {}]   ;;  %s1493_s3 = inlined_call_operand.vmem [shape: f32[1,32], index: 3, kind: input, shape index: {}]   ;;  %s1494_s4 = inlined_call_operand.vmem [shape: f32[8,2,32], index: 4, kind: output, shape index: {}]  }
   0x1   :  { %s1287_s17 = smov 0  }
   0x2 LB: > { %s23_s18 = sadd.s32 1, %s1250_s16  ;;  %p992_p0 = scmp.ge.s32.totalorder %s1254_s17, 1  ;;  %s1254_s17 = sphi %s1287_s17, %s14_s17   ;;  %s1250_s16 = sphi %s1285_s16, %s1496_s16   ;;  %s1246_s15 = sphi %s1283_s15, %s1495_s15  }
   0x3   : > { %p24_p1 = scmp.ge.s32.totalorder %s23_s18, 2  ;;  %p192_p2 = scmp.lt.s32.totalorder %s1254_s17, 3 }
   0x5   : > { %s1498_s18 = smov (%p24_p1, %s23_s18), 0  ;;  %p193_p3 = pnand %p992_p0, %p192_p2 }
   0x6   : > { %s993_s19 = sshll.u32 (!%p193_p3), %s1246_s15, 2  ;;  %p997_p5 = scmp.ne.s32.totalorder (!%p193_p3), %s1246_s15, 0 }
   0x7   : > { %196 = sbr.rel (%p193_p3) target bundleno = 1074 (0x432), region = 36  ;;  %p230_p4 = scmp.lt.s32.totalorder (!%p193_p3), %s993_s19, 7 }
   0xe   : > { %s1500_s19 = smov (!%p230_p4, %s993_s19), 7  ;;  %256 = sbr.rel (%p997_p5) target bundleno = 21 (0x15), region = 40 }
   0xf   : > { %s1165_s20 = smul.u32 6, %s1500_s19  ;;  %s996_s21 = sshll.u32 %s1500_s19, 1  ;;  %v257_v0 = vld [vmem:[%s1491_s1] sm:$0x3] (!%p997_p5)  ;;  %vm258_vm0 = vcmask (!%p997_p5), 254976  }
  0x10   : > { %s1304_s24 = scalar_lea.vmem %s1494_s4, %s996_s21  ;;  %259 = vst.msk [vmem:[#allocation2] sm:$0x3] (!%p997_p5), %vm258_vm0, %v257_v0 }
  0x11   : > { %s1309_s27 = scalar_lea.vmem %s1490_s0, %s1165_s20 }
  0x15 PF: > { %v260_v1 = vld [vmem:[%s1492_s2] sm:$0xff]  ;;  %v261_v2 = vld [vmem:[%s1492_s2 + $0x8] sm:$0xff]  ;;  %v262_v3 = vld [vmem:[%s1492_s2 + $0x10] sm:$0xff]  ;;  %v1256_v4 = vmov 0.0   ;;  %vm1257_vm1 = vmmov 0   ;;  %vm290_vm2 = vcmask 261120  }
  0x16   : > { %1069 = vmatprep.subr.bf16.mxu0 %v1256_v4  ;;  %v1324_v5 = vpack.c.bf16 %v261_v2, %v260_v1  ;;  %v263_v6 = vld [vmem:[%s1492_s2 + $0x18] sm:$0xff]  ;;  %1073 = vmatprep.mubr.msk.bf16.mxu0 %vm1257_vm1, %v1256_v4  ;;  %v264_v7 = vld [vmem:[%s1492_s2 + $0x20] sm:$0xff]  ;;  %v265_v8 = vld [vmem:[%s1492_s2 + $0x28] sm:$0xff]  ;;  %vm435_vm3 = vcmask 254976  }
  0x17   : > { %1077 = vmatprep.subr.bf16.mxu1 %v1256_v4  ;;  %v266_v9 = vld [vmem:[%s1492_s2 + $0x30] sm:$0xff]  ;;  %v267_v10 = vld [vmem:[%s1492_s2 + $0x38] sm:$0xff]  ;;  %1081 = vmatprep.mubr.msk.bf16.mxu1 %vm1257_vm1, %v1256_v4  ;;  %v1347_v11 = vpack.c.bf16 %v263_v6, %v262_v3  ;;  %v1349_v12 = vld [vmem:[#allocation2] sm:$0x3]  ;;  %v1351_v13 = vpack.c.bf16 %v265_v8, %v264_v7 }
  0x18   : > { %1070 = vmatpush3.bf16.msra.mxu0 %v1324_v5  ;;  %v268_v14 = vld [vmem:[%s1492_s2 + $0x40] sm:$0xff]  ;;  %v269_v15 = vld [vmem:[%s1492_s2 + $0x48] sm:$0xff]  ;;  %v1361_v16 = vpack.c.bf16 %v267_v10, %v266_v9  ;;  %v289_v17 = vpack.c.bf16 %v1349_v12, %v1349_v12  ;;  %v270_v19 = vld [vmem:[%s1492_s2 + $0x50] sm:$0xff] }
  0x19   : > { %1071 = vmatprep.subr.bf16.mxu0 %v1256_v4  ;;  %1078 = vmatpush3.bf16.msra.mxu1 %v1351_v13  ;;  %v1367_v18 = vpack.c.bf16 %v269_v15, %v268_v14  ;;  %v271_v20 = vld [vmem:[%s1492_s2 + $0x58] sm:$0xff]  ;;  %v286_v22 = vld [vmem:[%s1309_s27] sm:$0x3]  ;;  %v287_v24 = vld [vmem:[%s1309_s27 + $0x2] sm:$0x3] }
  0x1a   : > { %1079 = vmatprep.subr.bf16.mxu1 %v1256_v4  ;;  %v1380_v21 = vpack.c.bf16 %v271_v20, %v270_v19  ;;  %v1406_v43 = vld [vmem:[%s1493_s3] ss:$0 sm:$0xff]  ;;  %v288_v47 = vld [vmem:[%s1309_s27 + $0x4] sm:$0x3]  ;;  %v1004_v57 = vld [vmem:[%s1309_s27 + $0x6] sm:$0x3] }
  0x1b   : > { %v1005_v61 = vld [vmem:[%s1309_s27 + $0x8] sm:$0x3] }
  0x1c   : > { %1072 = vmatpush3.bf16.msra.mxu0 %v1347_v11 }
  0x1d   : > { %1085 = vmatprep.subr.bf16.mxu0 %v1256_v4  ;;  %1080 = vmatpush3.bf16.msra.mxu1 %v1361_v16 }
  0x1e   : > { %1093 = vmatprep.subr.bf16.mxu1 %v1256_v4 }
  0x1f   : > { %1074 = vmatmul.mubr.msk.bf16.vlgmr.msra.gmra.mrb[0].mxu0 %vm290_vm2, %v289_v17 }
  0x20   : > { %1086 = vmatpush3.bf16.msra.mxu0 %v1367_v18  ;;  %1089 = vmatprep.mubr.msk.bf16.mxu0 %vm1257_vm1, %v1256_v4 }
  0x21   : > { %1082 = vmatmul.mubr.msk.bf16.vlgmr.msra.gmra.mrb[0].mxu1 %vm290_vm2, %v289_v17  ;;  %1087 = vmatprep.subr.bf16.mxu0 %v1256_v4 }
  0x22   : > { %1094 = vmatpush3.bf16.msra.mxu1 %v1324_v5  ;;  %1097 = vmatprep.mubr.msk.bf16.mxu1 %vm1257_vm1, %v1256_v4 }
  0x23   : > { %1095 = vmatprep.subr.bf16.mxu1 %v1256_v4 }
  0x24   : > { %1088 = vmatpush3.bf16.msra.mxu0 %v1380_v21 }
  0x25   : > { %1101 = vmatprep.subr.bf16.mxu0 %v1256_v4 }
  0x26   : > { %1096 = vmatpush3.bf16.msra.mxu1 %v1347_v11 }
  0x27   : > { %1090 = vmatmul.mubr.msk.bf16.vlgmr.msra.gmra.mrb[4].mxu0 %vm290_vm2, %v289_v17  ;;  %1109 = vmatprep.subr.bf16.mxu1 %v1256_v4 }
  0x28   : > { %1102 = vmatpush3.bf16.msra.mxu0 %v1351_v13  ;;  %1105 = vmatprep.mubr.msk.bf16.mxu0 %vm1257_vm1, %v1256_v4 }
  0x29   : > { %1103 = vmatprep.subr.bf16.mxu0 %v1256_v4 }
  0x2c   : > { %1104 = vmatpush3.bf16.msra.mxu0 %v1361_v16 }
  0x2d   : > { %1117 = vmatprep.subr.bf16.mxu0 %v1256_v4 }
  0xf2   : > { %v328_v23 = vpop.f32.mrb[0].mxu0 }
  0xf3   : > { %v334_v25 = vadd.f32 %v328_v23, %v286_v22  ;;  %v1075_v26 = vpop.f32.mrb[1].mxu0 }
  0xf4   : > { %v331_v27 = vpop.f32.mrb[2].mxu0  ;;  %v375_v28 = vpop.f32.mrb[0].mxu1 }
  0xf5   : > { %v1000_v29 = vmul.f32 -1.442695, %v334_v25  ;;  %v1076_v30 = vpop.f32.mrb[3].mxu0  ;;  %v381_v31 = vadd.f32 %v375_v28, %v287_v24  ;;  %v1083_v32 = vpop.f32.mrb[1].mxu1  ;;  %v1006_v24 = vld [vmem:[%s1309_s27 + $0xa] sm:$0x3] }
  0xf6   : > { %v378_v33 = vpop.f32.mrb[2].mxu1 }
  0xf7   : > { %1192 = vpow2.f32 %v1000_v29  ;;  %v1084_v34 = vpop.f32.mrb[3].mxu1  ;;  %v1002_v35 = vmul.f32 -1.442695, %v381_v31 }
  0xf9   : > { %1194 = vpow2.f32 %v1002_v35 }
  0xfa   : > { %v422_v36 = vpop.f32.mrb[4].mxu0 }
  0xfb   : > { %v1091_v37 = vpop.f32.mrb[5].mxu0  ;;  %v423_v45 = vadd.f32 %v1406_v43, %v422_v36 }
  0xfc   : > { %v425_v38 = vpop.f32.mrb[6].mxu0  ;;  %v1014_v37 = vld [vmem:[%s1309_s27 + $0xe] sm:$0x3] }
  0xfd   : > { %v1092_v39 = vpop.f32.mrb[7].mxu0 }
 0x101   : > { %v1193_v40 = vpop.eup %1192 }
 0x102   : > { %v338_v41 = vadd.f32 1.0, %v1193_v40 }
 0x103   : > { %v1195_v42 = vpop.eup %1194 }
 0x104   : > { %1196 = vrcp.f32 %v338_v41  ;;  %v385_v44 = vadd.f32 1.0, %v1195_v42 }
 0x106   : > { %1198 = vrcp.f32 %v385_v44 }
 0x10e   : > { %v1197_v46 = vpop.eup %1196 }
 0x10f   : > { %v428_v48 = vmul.f32 %v1197_v46, %v423_v45 }
 0x110   : > { %v1199_v50 = vpop.eup %1198 }
 0x111   : > { %v429_v49 = vadd.f32 %v428_v48, %v288_v47  ;;  %v431_v51 = vsub.f32 1.0, %v1199_v50  ;;  %v433_v53 = vmul.f32 %v1199_v50, %v1349_v12 }
 0x113   : > { %1200 = vtanh.f32 %v429_v49 }
 0x11d   : > { %v1201_v52 = vpop.eup %1200 }
 0x11e   : > { %v432_v54 = vmul.f32 %v1201_v52, %v431_v51 }
 0x120   : > { %v434_v55 = vadd.f32 %v433_v53, %v432_v54 }
 0x122   : > { %436 = vst.msk [vmem:[%s1304_s24] sm:$0x3] %vm435_vm3, %v434_v55  ;;  %v441_v56 = vpack.c.bf16 %v434_v55, %v434_v55 }
 0x124   : > { %1098 = vmatmul.mubr.msk.bf16.vlgmr.msra.gmra.mrb[4].mxu1 %vm290_vm2, %v441_v56  ;;  %1106 = vmatmul.mubr.msk.bf16.vlgmr.msra.gmra.mrb[8].mxu0 %vm290_vm2, %v441_v56 }
 0x125   : > { %1110 = vmatpush3.bf16.msra.mxu1 %v1367_v18  ;;  %1113 = vmatprep.mubr.msk.bf16.mxu1 %vm1257_vm1, %v1256_v4 }
 0x126   : > { %1111 = vmatprep.subr.bf16.mxu1 %v1256_v4  ;;  %1118 = vmatpush3.bf16.msra.mxu0 %v1324_v5 }
 0x127   : > { %1119 = vmatprep.subr.bf16.mxu0 %v1256_v4  ;;  %1121 = vmatprep.mubr.msk.bf16.mxu0 %vm1257_vm1, %v1256_v4 }
 0x129   : > { %1112 = vmatpush3.bf16.msra.mxu1 %v1380_v21 }
 0x12a   : > { %1125 = vmatprep.subr.bf16.mxu1 %v1256_v4  ;;  %1120 = vmatpush3.bf16.msra.mxu0 %v1347_v11 }
 0x12b   : > { %1133 = vmatprep.subr.bf16.mxu0 %v1256_v4 }
 0x12c   : > { %1114 = vmatmul.mubr.msk.bf16.vlgmr.msra.gmra.mrb[8].mxu1 %vm290_vm2, %v441_v56 }
 0x12d   : > { %1126 = vmatpush3.bf16.msra.mxu1 %v1351_v13  ;;  %1129 = vmatprep.mubr.msk.bf16.mxu1 %vm1257_vm1, %v1256_v4 }
 0x12e   : > { %1127 = vmatprep.subr.bf16.mxu1 %v1256_v4 }
 0x131   : > { %1128 = vmatpush3.bf16.msra.mxu1 %v1361_v16 }
 0x132   : > { %1141 = vmatprep.subr.bf16.mxu1 %v1256_v4 }
 0x1f7   : > { %v479_v58 = vpop.f32.mrb[4].mxu1  ;;  %v526_v59 = vpop.f32.mrb[8].mxu0 }
 0x1f8   : > { %v485_v60 = vadd.f32 %v1004_v57, %v479_v58  ;;  %v1099_v62 = vpop.f32.mrb[5].mxu1  ;;  %v1107_v63 = vpop.f32.mrb[9].mxu0  ;;  %v532_v7 = vadd.f32 %v1005_v61, %v526_v59 }
 0x1f9   : > { %v482_v0 = vpop.f32.mrb[6].mxu1  ;;  %v529_v1 = vpop.f32.mrb[10].mxu0 }
 0x1fa   : > { %v1008_v2 = vmul.f32 -1.442695, %v485_v60  ;;  %v1100_v3 = vpop.f32.mrb[7].mxu1  ;;  %v1108_v6 = vpop.f32.mrb[11].mxu0  ;;  %v1010_v8 = vmul.f32 -1.442695, %v532_v7 }
 0x1fb   : > { %v1022_v1 = vld [vmem:[%s1309_s27 + $0x12] sm:$0x3]  ;;  %v1023_v7 = vld [vmem:[%s1309_s27 + $0x14] sm:$0x3] }
 0x1fc   : > { %1202 = vpow2.f32 %v1008_v2 }
 0x1fd   : > { %1204 = vpow2.f32 %v1010_v8 }
 0x1ff   : > { %v573_v9 = vpop.f32.mrb[8].mxu1 }
 0x200   : > { %v1115_v10 = vpop.f32.mrb[9].mxu1  ;;  %v574_v22 = vadd.f32 %v1406_v43, %v573_v9 }
 0x201   : > { %v576_v12 = vpop.f32.mrb[10].mxu1 }
 0x202   : > { %v1116_v14 = vpop.f32.mrb[11].mxu1 }
 0x206   : > { %v1203_v15 = vpop.eup %1202 }
 0x207   : > { %v489_v17 = vadd.f32 1.0, %v1203_v15  ;;  %v1205_v19 = vpop.eup %1204 }
 0x208   : > { %v536_v20 = vadd.f32 1.0, %v1205_v19 }
 0x209   : > { %1206 = vrcp.f32 %v489_v17 }
 0x20a   : > { %1208 = vrcp.f32 %v536_v20 }
 0x213   : > { %v1207_v23 = vpop.eup %1206 }
 0x214   : > { %v579_v25 = vmul.f32 %v1207_v23, %v574_v22  ;;  %v1209_v27 = vpop.eup %1208 }
 0x215   : > { %v582_v28 = vsub.f32 1.0, %v1209_v27  ;;  %v584_v30 = vmul.f32 %v1209_v27, %v434_v55  ;;  %v1015_v55 = vld [vmem:[%s1309_s27 + $0x10] sm:$0x3] }
 0x216   : > { %v580_v26 = vadd.f32 %v1006_v24, %v579_v25 }
 0x218   : > { %1210 = vtanh.f32 %v580_v26 }
 0x222   : > { %v1211_v29 = vpop.eup %1210 }
 0x223   : > { %v583_v31 = vmul.f32 %v1211_v29, %v582_v28  ;;  %v1024_v29 = vld [vmem:[%s1309_s27 + $0x16] sm:$0x3] }
 0x225   : > { %v585_v32 = vadd.f32 %v584_v30, %v583_v31 }
 0x227   : > { %1012 = vst.msk [vmem:[%s1304_s24 + $0x2] sm:$0x3] %vm435_vm3, %v585_v32  ;;  %v592_v33 = vpack.c.bf16 %v585_v32, %v585_v32 }
 0x229   : > { %1122 = vmatmul.mubr.msk.bf16.vlgmr.msra.gmra.mrb[12].mxu0 %vm290_vm2, %v592_v33  ;;  %1130 = vmatmul.mubr.msk.bf16.vlgmr.msra.gmra.mrb[12].mxu1 %vm290_vm2, %v592_v33 }
 0x22a   : > { %1134 = vmatpush3.bf16.msra.mxu0 %v1367_v18  ;;  %1137 = vmatprep.mubr.msk.bf16.mxu0 %vm1257_vm1, %v1256_v4 }
 0x22b   : > { %1135 = vmatprep.subr.bf16.mxu0 %v1256_v4  ;;  %1142 = vmatpush3.bf16.msra.mxu1 %v1324_v5  ;;  %v1013_v5 = vld [vmem:[%s1309_s27 + $0xc] sm:$0x3] }
 0x22c   : > { %1143 = vmatprep.subr.bf16.mxu1 %v1256_v4  ;;  %1145 = vmatprep.mubr.msk.bf16.mxu1 %vm1257_vm1, %v1256_v4 }
 0x22e   : > { %1136 = vmatpush3.bf16.msra.mxu0 %v1380_v21 }
 0x22f   : > { %1149 = vmatprep.subr.bf16.mxu0 %v1256_v4  ;;  %1144 = vmatpush3.bf16.msra.mxu1 %v1347_v11 }
 0x230   : > { %1157 = vmatprep.subr.bf16.mxu1 %v1256_v4 }
 0x231   : > { %1138 = vmatmul.mubr.msk.bf16.vlgmr.msra.gmra.mrb[16].mxu0 %vm290_vm2, %v592_v33 }
 0x232   : > { %1150 = vmatpush3.bf16.msra.mxu0 %v1351_v13  ;;  %1153 = vmatprep.mubr.msk.bf16.mxu0 %vm1257_vm1, %v1256_v4 }
 0x233   : > { %1151 = vmatprep.subr.bf16.mxu0 %v1256_v4 }
 0x236   : > { %1152 = vmatpush3.bf16.msra.mxu0 %v1361_v16 }
 0x2fc   : > { %v630_v34 = vpop.f32.mrb[12].mxu0  ;;  %v677_v35 = vpop.f32.mrb[12].mxu1 }
 0x2fd   : > { %v636_v36 = vadd.f32 %v1013_v5, %v630_v34  ;;  %v1123_v38 = vpop.f32.mrb[13].mxu0  ;;  %v1131_v11 = vpop.f32.mrb[13].mxu1  ;;  %v683_v13 = vadd.f32 %v1014_v37, %v677_v35 }
 0x2fe   : > { %v633_v39 = vpop.f32.mrb[14].mxu0  ;;  %v680_v40 = vpop.f32.mrb[14].mxu1 }
 0x2ff   : > { %v1017_v41 = vmul.f32 -1.442695, %v636_v36  ;;  %v1124_v42 = vpop.f32.mrb[15].mxu0  ;;  %v1132_v44 = vpop.f32.mrb[15].mxu1  ;;  %v1019_v45 = vmul.f32 -1.442695, %v683_v13 }
 0x301   : > { %1212 = vpow2.f32 %v1017_v41 }
 0x302   : > { %1214 = vpow2.f32 %v1019_v45 }
 0x304   : > { %v724_v46 = vpop.f32.mrb[16].mxu0 }
 0x305   : > { %v1139_v47 = vpop.f32.mrb[17].mxu0  ;;  %v725_v53 = vadd.f32 %v1406_v43, %v724_v46 }
 0x306   : > { %v727_v48 = vpop.f32.mrb[18].mxu0 }
 0x307   : > { %v1140_v16 = vpop.f32.mrb[19].mxu0 }
 0x30b   : > { %v1213_v49 = vpop.eup %1212 }
 0x30c   : > { %v640_v50 = vadd.f32 1.0, %v1213_v49  ;;  %v1215_v51 = vpop.eup %1214 }
 0x30d   : > { %v687_v52 = vadd.f32 1.0, %v1215_v51 }
 0x30e   : > { %1216 = vrcp.f32 %v640_v50 }
 0x30f   : > { %1218 = vrcp.f32 %v687_v52 }
 0x318   : > { %v1217_v54 = vpop.eup %1216 }
 0x319   : > { %v730_v56 = vmul.f32 %v1217_v54, %v725_v53  ;;  %v1219_v58 = vpop.eup %1218 }
 0x31a   : > { %v733_v59 = vsub.f32 1.0, %v1219_v58  ;;  %v735_v61 = vmul.f32 %v1219_v58, %v585_v32 }
 0x31b   : > { %v731_v57 = vadd.f32 %v1015_v55, %v730_v56 }
 0x31d   : > { %1220 = vtanh.f32 %v731_v57 }
 0x327   : > { %v1221_v60 = vpop.eup %1220 }
 0x328   : > { %v734_v62 = vmul.f32 %v1221_v60, %v733_v59 }
 0x32a   : > { %v736_v63 = vadd.f32 %v735_v61, %v734_v62 }
 0x32c   : > { %1021 = vst.msk [vmem:[%s1304_s24 + $0x4] sm:$0x3] %vm435_vm3, %v736_v63  ;;  %v743_v0 = vpack.c.bf16 %v736_v63, %v736_v63 }
 0x32e   : > { %1146 = vmatmul.mubr.msk.bf16.vlgmr.msra.gmra.mrb[16].mxu1 %vm290_vm2, %v743_v0  ;;  %1154 = vmatmul.mubr.msk.bf16.vlgmr.msra.gmra.mrb[20].mxu0 %vm290_vm2, %v743_v0 }
 0x32f   : > { %1158 = vmatpush3.bf16.msra.mxu1 %v1367_v18  ;;  %1161 = vmatprep.mubr.msk.bf16.mxu1 %vm1257_vm1, %v1256_v4 }
 0x330   : > { %1159 = vmatprep.subr.bf16.mxu1 %v1256_v4 }
 0x333   : > { %1160 = vmatpush3.bf16.msra.mxu1 %v1380_v21 }
 0x336   : > { %1162 = vmatmul.mubr.msk.bf16.vlgmr.msra.gmra.mrb[20].mxu1 %vm290_vm2, %v743_v0 }
 0x401   : > { %v781_v2 = vpop.f32.mrb[16].mxu1  ;;  %v828_v3 = vpop.f32.mrb[20].mxu0 }
 0x402   : > { %v787_v6 = vadd.f32 %v1022_v1, %v781_v2  ;;  %v1147_v8 = vpop.f32.mrb[17].mxu1  ;;  %v1155_v9 = vpop.f32.mrb[21].mxu0  ;;  %v834_v17 = vadd.f32 %v1023_v7, %v828_v3 }
 0x403   : > { %v784_v10 = vpop.f32.mrb[18].mxu1  ;;  %v831_v12 = vpop.f32.mrb[22].mxu0 }
 0x404   : > { %v1026_v14 = vmul.f32 -1.442695, %v787_v6  ;;  %v1148_v18 = vpop.f32.mrb[19].mxu1  ;;  %v1156_v15 = vpop.f32.mrb[23].mxu0  ;;  %v1028_v4 = vmul.f32 -1.442695, %v834_v17 }
 0x406   : > { %1222 = vpow2.f32 %v1026_v14 }
 0x407   : > { %1224 = vpow2.f32 %v1028_v4 }
 0x409   : > { %v875_v19 = vpop.f32.mrb[20].mxu1 }
 0x40a   : > { %v1163_v21 = vpop.f32.mrb[21].mxu1  ;;  %v876_v27 = vadd.f32 %v1406_v43, %v875_v19 }
 0x40b   : > { %v878_v20 = vpop.f32.mrb[22].mxu1 }
 0x40c   : > { %v1164_v22 = vpop.f32.mrb[23].mxu1 }
 0x410   : > { %v1223_v23 = vpop.eup %1222 }
 0x411   : > { %v791_v24 = vadd.f32 1.0, %v1223_v23  ;;  %v1225_v25 = vpop.eup %1224 }
 0x412   : > { %v838_v26 = vadd.f32 1.0, %v1225_v25 }
 0x413   : > { %1226 = vrcp.f32 %v791_v24 }
 0x414   : > { %1228 = vrcp.f32 %v838_v26 }
 0x41d   : > { %v1227_v28 = vpop.eup %1226 }
 0x41e   : > { %v881_v30 = vmul.f32 %v1227_v28, %v876_v27  ;;  %v1229_v32 = vpop.eup %1228 }
 0x41f   : > { %v884_v33 = vsub.f32 1.0, %v1229_v32  ;;  %v886_v34 = vmul.f32 %v1229_v32, %v736_v63 }
 0x420   : > { %v882_v31 = vadd.f32 %v1024_v29, %v881_v30 }
 0x422   : > { %1230 = vtanh.f32 %v882_v31 }
 0x42c   : > { %v1231_v5 = vpop.eup %1230 }
 0x42d   : > { %v885_v35 = vmul.f32 %v1231_v5, %v884_v33 }
 0x42f   : > { %v887_v36 = vadd.f32 %v886_v34, %v885_v35 }
 0x431   : > { %1030 = vst.msk [vmem:[%s1304_s24 + $0x6] sm:$0x3] %vm435_vm3, %v887_v36  ;;  %890 = vst.msk [vmem:[#allocation2] sm:$0x3] %vm435_vm3, %v887_v36 }
 0x432 PF: > { %s14_s17 = sadd.s32 1, %s1254_s17   ;;  %s1495_s15 = smov %s1250_s16 }
 0x433   : > { %p11_p6 = scmp.ge.s32.totalorder %s14_s17, 4   ;;  %s1496_s16 = smov %s1498_s18 }
 0x435   :  { %13 = sbr.rel (!%p11_p6) target bundleno = 2 (0x2), region = 79 }

// kernel: encoder_decoder_forward.11
= control target key start
LH: loop header
LB: loop body
LE: loop exit
PB: predicated region body
PF: predicated region fallthrough
CT: control target
= control target key end

     0   :  { %v764_v3 = vmov 0.0   ;;  %vm765_vm0 = vmmov 0   ;;  %s933_s0 = inlined_call_operand.vmem [shape: f32[8,2,32], index: 0, kind: input, shape index: {}]   ;;  %s934_s1 = inlined_call_operand.vmem [shape: f32[32,16], index: 1, kind: input, shape index: {}]   ;;  %s935_s2 = inlined_call_operand.vmem [shape: f32[1,16], index: 2, kind: input, shape index: {}]   ;;  %s936_s3 = inlined_call_operand.hbm [shape: f32[2,8,16], index: 3, kind: output, shape index: {}]  }
   0x1   :  { %v16_v0 = vld [vmem:[%s934_s1] sm:$0xff]  ;;  %v17_v1 = vld [vmem:[%s934_s1 + $0x8] sm:$0xff]  ;;  %v18_v2 = vld [vmem:[%s934_s1 + $0x10] sm:$0xff]  ;;  %670 = vmatprep.subr.bf16.mxu0 %v764_v3  ;;  %678 = vmatprep.subr.bf16.mxu1 %v764_v3 }
   0x2   :  { %v20_v4 = vpack.c.bf16 %v17_v1, %v16_v0  ;;  %v19_v5 = vld [vmem:[%s934_s1 + $0x18] sm:$0xff]  ;;  %674 = vmatprep.mubr.msk.bf16.mxu0 %vm765_vm0, %v764_v3  ;;  %682 = vmatprep.mubr.msk.bf16.mxu1 %vm765_vm0, %v764_v3  ;;  %v29_v7 = vld [vmem:[%s933_s0] sm:$0x3]  ;;  %v632_v8 = vld [vmem:[%s933_s0 + $0x2] sm:$0x3] }
   0x3   :  { %v21_v6 = vpack.c.bf16 %v19_v5, %v18_v2 }
   0x4   :  { %671 = vmatpush3.bf16.msra.mxu0 %v20_v4  ;;  %679 = vmatpush3.bf16.msra.mxu1 %v20_v4 }
   0x5   :  { %672 = vmatprep.subr.bf16.mxu0 %v764_v3  ;;  %680 = vmatprep.subr.bf16.mxu1 %v764_v3 }
   0x6   :  { %8 = vsyncpa [#allocation3], 0  ;;  %v30_v9 = vpack.c.bf16 %v29_v7, %v29_v7  ;;  %v105_v10 = vpack.c.bf16 %v632_v8, %v632_v8  ;;  %vm31_vm1 = vcmask 261120   ;;  %v634_v11 = vld [vmem:[%s933_s0 + $0x4] sm:$0x3]  ;;  %v79_v25 = vlaneseq }
   0x7   :  { %v636_v12 = vld [vmem:[%s933_s0 + $0x6] sm:$0x3]  ;;  %v178_v13 = vpack.c.bf16 %v634_v11, %v634_v11  ;;  %v638_v15 = vld [vmem:[%s933_s0 + $0x8] sm:$0x3]  ;;  %v640_v16 = vld [vmem:[%s933_s0 + $0xa] sm:$0x3] }
   0x8   :  { %673 = vmatpush3.bf16.msra.mxu0 %v21_v6  ;;  %681 = vmatpush3.bf16.msra.mxu1 %v21_v6  ;;  %v251_v14 = vpack.c.bf16 %v636_v12, %v636_v12  ;;  %v324_v17 = vpack.c.bf16 %v638_v15, %v638_v15  ;;  %v397_v18 = vpack.c.bf16 %v640_v16, %v640_v16  ;;  %v642_v19 = vld [vmem:[%s933_s0 + $0xc] sm:$0x3]  ;;  %v644_v20 = vld [vmem:[%s933_s0 + $0xe] sm:$0x3]  ;;  %v766_v23 = vmov 1966171168  }
   0x9   :  { %686 = vmatprep.subr.bf16.mxu0 %v764_v3  ;;  %694 = vmatprep.subr.bf16.mxu1 %v764_v3  ;;  %v470_v21 = vpack.c.bf16 %v642_v19, %v642_v19  ;;  %v543_v22 = vpack.c.bf16 %v644_v20, %v644_v20  ;;  %v77_v24 = vunpack.c.l.s4 %v766_v23  ;;  %v80_v27 = vshrl.u32 %v79_v25, 7  ;;  %v869_v28 = vld [vmem:[%s935_s2] ss:$0 sm:$0xff]  ;;  %s767_s2 = smov [#allocation2]  }
   0xa   :  { %vm100_vm2 = vcmask 122880   ;;  %s619_s9 = sshll.u32 %s767_s2, 4  ;;  %s620_s9 = int_to_ptr.vmem [resolvable:$true] %s619_s9 }
   0xb   :  { %675 = vmatmul.mubr.msk.bf16.vlgmr.msra.gmra.mrb[0].mxu0 %vm31_vm1, %v30_v9  ;;  %683 = vmatmul.mubr.msk.bf16.vlgmr.msra.gmra.mrb[0].mxu1 %vm31_vm1, %v105_v10  ;;  %v78_v26 = vunpack.c.0.s8 %v77_v24  ;;  %s740_s10 = scalar_lea.vmem %s620_s9, 256  ;;  %p745_p1 = scmp.lt.s32.totalorder %s620_s9, %s620_s9 }
   0xc   :  { %687 = vmatpush3.bf16.msra.mxu0 %v20_v4  ;;  %695 = vmatpush3.bf16.msra.mxu1 %v20_v4  ;;  %p741_p0 = scmp.ne.s32.totalorder %s620_s9, %s740_s10  ;;  %p746_p2 = scmp.lt.s32.totalorder %s740_s10, %s740_s10 }
   0xd   :  { %688 = vmatprep.subr.bf16.mxu0 %v764_v3  ;;  %696 = vmatprep.subr.bf16.mxu1 %v764_v3  ;;  %v871_v29 = vsub.s32 %v78_v26, %v80_v27 }
   0xe   :  { %690 = vmatprep.mubr.msk.bf16.mxu0 %vm765_vm0, %v764_v3  ;;  %698 = vmatprep.mubr.msk.bf16.mxu1 %vm765_vm0, %v764_v3  ;;  %p747_p3 = por %p746_p2, %p745_p1 }
  0x10   :  { %689 = vmatpush3.bf16.msra.mxu0 %v21_v6  ;;  %697 = vmatpush3.bf16.msra.mxu1 %v21_v6  ;;  %p748_p4 = pnand %p747_p3, %p741_p0 }
  0x11   :  { %702 = vmatprep.subr.bf16.mxu0 %v764_v3  ;;  %710 = vmatprep.subr.bf16.mxu1 %v764_v3 }
  0x13   :  { %691 = vmatmul.mubr.msk.bf16.vlgmr.msra.gmra.mrb[4].mxu0 %vm31_vm1, %v178_v13  ;;  %699 = vmatmul.mubr.msk.bf16.vlgmr.msra.gmra.mrb[4].mxu1 %vm31_vm1, %v251_v14 }
  0x14   :  { %703 = vmatpush3.bf16.msra.mxu0 %v20_v4  ;;  %711 = vmatpush3.bf16.msra.mxu1 %v20_v4 }
  0x15   :  { %704 = vmatprep.subr.bf16.mxu0 %v764_v3  ;;  %712 = vmatprep.subr.bf16.mxu1 %v764_v3 }
  0x16   :  { %706 = vmatprep.mubr.msk.bf16.mxu0 %vm765_vm0, %v764_v3  ;;  %714 = vmatprep.mubr.msk.bf16.mxu1 %vm765_vm0, %v764_v3 }
  0x18   :  { %705 = vmatpush3.bf16.msra.mxu0 %v21_v6  ;;  %713 = vmatpush3.bf16.msra.mxu1 %v21_v6 }
  0x19   :  { %718 = vmatprep.subr.bf16.mxu0 %v764_v3  ;;  %726 = vmatprep.subr.bf16.mxu1 %v764_v3 }
  0x1b   :  { %707 = vmatmul.mubr.msk.bf16.vlgmr.msra.gmra.mrb[8].mxu0 %vm31_vm1, %v324_v17  ;;  %715 = vmatmul.mubr.msk.bf16.vlgmr.msra.gmra.mrb[8].mxu1 %vm31_vm1, %v397_v18 }
  0x1c   :  { %719 = vmatpush3.bf16.msra.mxu0 %v20_v4  ;;  %727 = vmatpush3.bf16.msra.mxu1 %v20_v4 }
  0x1d   :  { %720 = vmatprep.subr.bf16.mxu0 %v764_v3  ;;  %728 = vmatprep.subr.bf16.mxu1 %v764_v3 }
  0x1e   :  { %722 = vmatprep.mubr.msk.bf16.mxu0 %vm765_vm0, %v764_v3  ;;  %730 = vmatprep.mubr.msk.bf16.mxu1 %vm765_vm0, %v764_v3 }
  0x20   :  { %721 = vmatpush3.bf16.msra.mxu0 %v21_v6  ;;  %729 = vmatpush3.bf16.msra.mxu1 %v21_v6 }
  0x23   :  { %723 = vmatmul.mubr.msk.bf16.vlgmr.msra.gmra.mrb[12].mxu0 %vm31_vm1, %v470_v21  ;;  %731 = vmatmul.mubr.msk.bf16.vlgmr.msra.gmra.mrb[12].mxu1 %vm31_vm1, %v543_v22 }
  0xde   :  { %v69_v30 = vpop.f32.mrb[0].mxu0  ;;  %v143_v31 = vpop.f32.mrb[0].mxu1 }
  0xdf   :  { %v70_v32 = vadd.f32 %v869_v28, %v69_v30  ;;  %v144_v33 = vadd.f32 %v869_v28, %v143_v31  ;;  %v676_v34 = vpop.f32.mrb[1].mxu0  ;;  %v684_v35 = vpop.f32.mrb[1].mxu1 }
  0xe0   :  { %v72_v36 = vpop.f32.mrb[2].mxu0  ;;  %v146_v37 = vpop.f32.mrb[2].mxu1 }
  0xe1   :  { %v82_v38 = vrot.slane %v70_v32, %v871_v29  ;;  %v156_v39 = vrot.slane %v144_v33, %v871_v29  ;;  %v677_v40 = vpop.f32.mrb[3].mxu0  ;;  %v685_v41 = vpop.f32.mrb[3].mxu1 }
  0xe3   :  { %v83_v42 = vcombine.high %v82_v38, %v82_v38  ;;  %v90_v43 = vrot.slane %v82_v38, %v871_v29  ;;  %v157_v44 = vcombine.high %v156_v39, %v156_v39  ;;  %v164_v45 = vrot.slane %v156_v39, %v871_v29 }
  0xe5   :  { %v97_v46 = vrot.slane %v83_v42, %v871_v29  ;;  %101 = vst.msk [vmem:[#allocation2] sm:$0x1] %vm100_vm2, %v90_v43  ;;  %v171_v47 = vrot.slane %v157_v44, %v871_v29  ;;  %174 = vst.msk [vmem:[#allocation2 + $0x1] sm:$0x1] %vm100_vm2, %v164_v45 }
  0xe6   :  { %v216_v48 = vpop.f32.mrb[4].mxu0  ;;  %v289_v49 = vpop.f32.mrb[4].mxu1 }
  0xe7   :  { %102 = vst.msk [vmem:[#allocation2 + $0x8] sm:$0x1] %vm100_vm2, %v97_v46  ;;  %175 = vst.msk [vmem:[#allocation2 + $0x9] sm:$0x1] %vm100_vm2, %v171_v47  ;;  %v217_v50 = vadd.f32 %v869_v28, %v216_v48  ;;  %v290_v51 = vadd.f32 %v869_v28, %v289_v49  ;;  %v692_v52 = vpop.f32.mrb[5].mxu0  ;;  %v700_v53 = vpop.f32.mrb[5].mxu1 }
  0xe8   :  { %v219_v54 = vpop.f32.mrb[6].mxu0  ;;  %v292_v55 = vpop.f32.mrb[6].mxu1 }
  0xe9   :  { %v229_v56 = vrot.slane %v217_v50, %v871_v29  ;;  %v302_v57 = vrot.slane %v290_v51, %v871_v29  ;;  %v693_v58 = vpop.f32.mrb[7].mxu0  ;;  %v701_v59 = vpop.f32.mrb[7].mxu1 }
  0xeb   :  { %v230_v60 = vcombine.high %v229_v56, %v229_v56  ;;  %v237_v61 = vrot.slane %v229_v56, %v871_v29  ;;  %v303_v62 = vcombine.high %v302_v57, %v302_v57  ;;  %v310_v63 = vrot.slane %v302_v57, %v871_v29 }
  0xed   :  { %v244_v0 = vrot.slane %v230_v60, %v871_v29  ;;  %247 = vst.msk [vmem:[#allocation2 + $0x2] sm:$0x1] %vm100_vm2, %v237_v61  ;;  %v317_v1 = vrot.slane %v303_v62, %v871_v29  ;;  %320 = vst.msk [vmem:[#allocation2 + $0x3] sm:$0x1] %vm100_vm2, %v310_v63 }
  0xee   :  { %v362_v2 = vpop.f32.mrb[8].mxu0  ;;  %v435_v3 = vpop.f32.mrb[8].mxu1 }
  0xef   :  { %248 = vst.msk [vmem:[#allocation2 + $0xa] sm:$0x1] %vm100_vm2, %v244_v0  ;;  %321 = vst.msk [vmem:[#allocation2 + $0xb] sm:$0x1] %vm100_vm2, %v317_v1  ;;  %v363_v4 = vadd.f32 %v869_v28, %v362_v2  ;;  %v436_v5 = vadd.f32 %v869_v28, %v435_v3  ;;  %v708_v6 = vpop.f32.mrb[9].mxu0  ;;  %v716_v7 = vpop.f32.mrb[9].mxu1 }
  0xf0   :  { %v365_v8 = vpop.f32.mrb[10].mxu0  ;;  %v438_v9 = vpop.f32.mrb[10].mxu1 }
  0xf1   :  { %v375_v10 = vrot.slane %v363_v4, %v871_v29  ;;  %v448_v11 = vrot.slane %v436_v5, %v871_v29  ;;  %v709_v12 = vpop.f32.mrb[11].mxu0  ;;  %v717_v13 = vpop.f32.mrb[11].mxu1 }
  0xf3   :  { %v376_v14 = vcombine.high %v375_v10, %v375_v10  ;;  %v383_v15 = vrot.slane %v375_v10, %v871_v29  ;;  %v449_v16 = vcombine.high %v448_v11, %v448_v11  ;;  %v456_v17 = vrot.slane %v448_v11, %v871_v29 }
  0xf5   :  { %v390_v18 = vrot.slane %v376_v14, %v871_v29  ;;  %393 = vst.msk [vmem:[#allocation2 + $0x4] sm:$0x1] %vm100_vm2, %v383_v15  ;;  %v463_v19 = vrot.slane %v449_v16, %v871_v29  ;;  %466 = vst.msk [vmem:[#allocation2 + $0x5] sm:$0x1] %vm100_vm2, %v456_v17 }
  0xf6   :  { %v508_v20 = vpop.f32.mrb[12].mxu0  ;;  %v581_v21 = vpop.f32.mrb[12].mxu1 }
  0xf7   :  { %394 = vst.msk [vmem:[#allocation2 + $0xc] sm:$0x1] %vm100_vm2, %v390_v18  ;;  %467 = vst.msk [vmem:[#allocation2 + $0xd] sm:$0x1] %vm100_vm2, %v463_v19  ;;  %v509_v22 = vadd.f32 %v869_v28, %v508_v20  ;;  %v582_v23 = vadd.f32 %v869_v28, %v581_v21  ;;  %v724_v24 = vpop.f32.mrb[13].mxu0  ;;  %v732_v25 = vpop.f32.mrb[13].mxu1 }
  0xf8   :  { %v511_v26 = vpop.f32.mrb[14].mxu0  ;;  %v584_v27 = vpop.f32.mrb[14].mxu1 }
  0xf9   :  { %v521_v30 = vrot.slane %v509_v22, %v871_v29  ;;  %v594_v31 = vrot.slane %v582_v23, %v871_v29  ;;  %v725_v32 = vpop.f32.mrb[15].mxu0  ;;  %v733_v33 = vpop.f32.mrb[15].mxu1 }
  0xfb   :  { %v522_v34 = vcombine.high %v521_v30, %v521_v30  ;;  %v529_v35 = vrot.slane %v521_v30, %v871_v29  ;;  %v595_v36 = vcombine.high %v594_v31, %v594_v31  ;;  %v602_v37 = vrot.slane %v594_v31, %v871_v29 }
  0xfd   :  { %v536_v28 = vrot.slane %v522_v34, %v871_v29  ;;  %539 = vst.msk [vmem:[#allocation2 + $0x6] sm:$0x1] %vm100_vm2, %v529_v35  ;;  %v609_v38 = vrot.slane %v595_v36, %v871_v29  ;;  %612 = vst.msk [vmem:[#allocation2 + $0x7] sm:$0x1] %vm100_vm2, %v602_v37 }
  0xff   :  { %540 = vst.msk [vmem:[#allocation2 + $0xe] sm:$0x1] %vm100_vm2, %v536_v28  ;;  %613 = vst.msk [vmem:[#allocation2 + $0xf] sm:$0x1] %vm100_vm2, %v609_v38 }
 0x100   :  { %751 = shalt.err (!%p748_p4)
}
 0x101   :  { %s752_s13 = scalar_lea.hbm %s936_s3, 256 }
 0x102   :  { %p753_p5 = scmp.ne.s32.totalorder %s936_s3, %s752_s13  ;;  %p756_p6 = scmp.lt.u32.totalorder %s752_s13, %s936_s3 }
 0x104   :  { %p758_p7 = pnand %p756_p6, %p753_p5 }
 0x106   :  { %761 = shalt.err (!%p758_p7)
}
 0x107   :  { %s768_s18 = smov 128   ;;  %s769_s19 = smov 8  }
 0x108   :  { %625 = dma.vmem_to_hbm [thread:$0]  %s620_s9, 256, %s936_s3, [#allocation3], %s768_s18, %s768_s18, %s769_s19  }
 0x109   :  { %762 = dma.done.wait [#allocation3], 256  }
 0x10a   :  { %763 = vsyncadd [#allocation3], 4294967040 }
 0x10b   :  { %629 = vsyncpa [#allocation3], 1 }

</bundles_post_ra>
